<compile_context>
chip_gen: v5e
topology: v5e:2x2
jax: 0.10.0
libtpu: 0.0.40
codegen_flags: <defaults>
</compile_context>

<pallas_src>
import functools

import jax
import jax.numpy as jnp
from jax import lax
from jax.experimental import pallas as pl
from jax.experimental.pallas import tpu as pltpu


def _round_up(x, m):
    return ((x + m - 1) // m) * m


def _physical_vmem_bytes():
    """Per-TensorCore VMEM capacity; conservative 64 MiB (v7x) fallback."""
    try:
        info = pltpu.get_tpu_info()
        for attr in ("vmem_capacity_bytes", "vmem_size_bytes", "vmem_bytes"):
            v = getattr(info, attr, None)
            if v:
                return int(v)
    except Exception:
        pass
    return 64 * 1024 * 1024


def _vmem_estimate_bytes(th, wp, cpin, cpo, ctile, w_resident):
    m = th * wp
    xbuf = 2 * (th + 4) * wp * cpin * 2          # double-buffered bf16 halo window
    outb = 2 * m * ctile * 2                     # double-buffered bf16 output block
    wblk = 2 * 9 * cpin * (cpo if w_resident else ctile) * 2
    acc = m * ctile * 4                          # f32 accumulator (vregs / spill)
    lhs = 2 * m * cpin * 2                       # realigned per-tap operand copies
    return xbuf + outb + wblk + acc + lhs + (2 << 20)


def _pick_row_tile(h, wp, cpin, cpo, ctile, w_resident, budget):
    # Largest divisor of H (<= 64) whose VMEM footprint fits the budget.
    # No forced minimum tile count: on single-TensorCore chips extra row tiles
    # only add per-step overhead and halo re-reads.
    best = 1
    for th in range(1, min(h, 64) + 1):
        if h % th:
            continue
        if _vmem_estimate_bytes(th, wp, cpin, cpo, ctile, w_resident) <= budget:
            best = th
    return best


# -----------------------------------------------------------------------------
# Pallas kernel: fused 3x3 conv (stride 1, pad 1) + folded BN + ReLU
# One grid step = (batch n, row tile t, Cout tile c).  The haloed input window
# is fetched once per (n, t), double-buffered, and reused for every Cout tile.
# -----------------------------------------------------------------------------
def _conv_bn_relu_kernel(x_hbm, w_ref, scale_ref, shift_ref, o_ref, xbuf, sem,
                         *, tile_rows, wp, valid_w, apply_relu,
                         num_cout_tiles, w_resident):
    n = pl.program_id(0)
    t = pl.program_id(1)
    c = pl.program_id(2)
    num_t = pl.num_programs(1)
    cin = xbuf.shape[-1]                 # padded input channels (mult of 128)
    ctile = o_ref.shape[-1]              # 128 or 256
    m_rows = tile_rows * wp
    slot = t % 2

    # Window buffer layout (flattened rows, per slot):
    #   [0, wp)                : spare guard zone (only read at masked outputs)
    #   [wp, 2*wp)             : top halo  = image row t*TH - 1 (zero at t==0)
    #   [2*wp, (TH+2)*wp)      : body      = image rows t*TH .. t*TH + TH - 1
    #   [(TH+2)*wp, (TH+3)*wp) : bot halo  = image row t*TH + TH (zero at last t)
    #   [(TH+3)*wp, (TH+4)*wp) : spare guard zone
    def zero_rows(s, start, nrows):
        xbuf[s, pl.ds(start, nrows)] = jnp.zeros((nrows, cin), dtype=xbuf.dtype)

    def window_copies(t_w, s):
        row0 = t_w * tile_rows * wp
        body = pltpu.make_async_copy(
            x_hbm.at[n, pl.ds(row0, m_rows)],
            xbuf.at[s, pl.ds(2 * wp, m_rows)], sem.at[s, 0])
        top = pltpu.make_async_copy(
            x_hbm.at[n, pl.ds(row0 - wp, wp)],
            xbuf.at[s, pl.ds(wp, wp)], sem.at[s, 1])
        bot = pltpu.make_async_copy(
            x_hbm.at[n, pl.ds(row0 + m_rows, wp)],
            xbuf.at[s, pl.ds((tile_rows + 2) * wp, wp)], sem.at[s, 2])
        return body, top, bot

    def start_window(t_w, s):
        # All copies of a window are started before any of them is waited on.
        body, top, bot = window_copies(t_w, s)
        body.start()

        @pl.when(t_w > 0)
        def _():
            top.start()

        @pl.when(t_w < num_t - 1)
        def _():
            bot.start()

    def wait_window(t_w, s):
        body, top, bot = window_copies(t_w, s)
        body.wait()

        @pl.when(t_w > 0)
        def _():
            top.wait()

        @pl.when(t_w == 0)            # image top border -> zero halo row
        def _():
            zero_rows(s, wp, wp)

        @pl.when(t_w < num_t - 1)
        def _():
            bot.wait()

        @pl.when(t_w == num_t - 1)    # image bottom border -> zero halo row
        def _():
            zero_rows(s, (tile_rows + 2) * wp, wp)

    # ---------------- window fill / prefetch (only at c == 0) ---------------- #
    @pl.when(c == 0)
    def _fill():
        @pl.when(t == 0)
        def _first():
            # Spare guard zones are only ever read at masked output positions;
            # zero them once per image so stale VMEM can never leak elsewhere.
            for s in (0, 1):
                zero_rows(s, 0, wp)
                zero_rows(s, (tile_rows + 3) * wp, wp)
            start_window(t, slot)            # first window: no overlap possible

        wait_window(t, slot)

        @pl.when(t + 1 < num_t)
        def _prefetch():
            # Prefetch the next row-tile window into the other buffer; it is
            # consumed (waited) only at the next tile's c == 0, so the DMA is
            # hidden behind this tile's Cout-tile compute.
            start_window(t + 1, 1 - slot)

    # ------------------- 9 accumulating per-tap MXU matmuls ------------------ #
    # lhs for tap (kh, kw) is the flattened window shifted by (kh+1)*wp + kw-1;
    # the (M, 9*Cp) im2col patch is never materialised.
    if w_resident and num_cout_tiles > 1:
        coff = pl.multiple_of(c * ctile, 128)

    acc = None
    for kh in range(3):
        for kw in range(3):
            tap = kh * 3 + kw
            start = (kh + 1) * wp + (kw - 1)
            lhs = xbuf[slot, pl.ds(start, m_rows)]
            if w_resident and num_cout_tiles > 1:
                rhs = w_ref[pl.ds(tap * cin, cin), pl.ds(coff, ctile)]
            else:
                rhs = w_ref[pl.ds(tap * cin, cin), :]
            part = jnp.dot(lhs, rhs, preferred_element_type=jnp.float32)
            acc = part if acc is None else acc + part

    # ------------- f32 epilogue: BN scale/shift + ReLU, bf16 col mask -------- #
    out = acc * scale_ref[...] + shift_ref[...]          # (m_rows, ctile) f32
    if apply_relu:
        out = jnp.maximum(out, 0.0)
    out = out.astype(o_ref.dtype).reshape(tile_rows, wp, ctile)
    # Keep the stored width-pad columns exactly zero (they are the conv zero
    # padding for the next layer); the select runs on bf16 (half the lane work).
    col = lax.broadcasted_iota(jnp.int32, (wp, ctile), 0)
    keep = ((col >= 1) & (col <= valid_w)).reshape(1, wp, ctile)
    out = jnp.where(keep, out, jnp.zeros((), o_ref.dtype))
    o_ref[...] = out.reshape(1, m_rows, ctile)


def _conv_bn_relu_layer(x, w2, scale, shift, *, h_img, wp, valid_w, tile_rows,
                        apply_relu, ctile, w_resident, vmem_limit):
    """One fused layer.

    x:     (N, H*Wp, Cpin) padded, flattened NHWC activations (bf16)
    w2:    (9*Cpin, Cpo)   taps folded into the contraction dim (bf16)
    scale: (1, Cpo) f32    folded BN scale (1 where BN is absent / padded)
    shift: (1, Cpo) f32    folded BN shift + conv bias (0 where padded)
    """
    n = x.shape[0]
    cpin = x.shape[-1]
    cpo = w2.shape[1]
    num_t = h_img // tile_rows
    num_c = cpo // ctile
    grid = (n, num_t, num_c)

    if w_resident:
        # Full weight resident in VMEM: fetched once, never re-DMA'd per step.
        w_spec = pl.BlockSpec((w2.shape[0], cpo), lambda n_, t_, c_: (0, 0))
    else:
        w_spec = pl.BlockSpec((w2.shape[0], ctile), lambda n_, t_, c_: (0, c_))

    kernel = functools.partial(
        _conv_bn_relu_kernel, tile_rows=tile_rows, wp=wp, valid_w=valid_w,
        apply_relu=apply_relu, num_cout_tiles=num_c, w_resident=w_resident)

    return pl.pallas_call(
        kernel,
        out_shape=jax.ShapeDtypeStruct((n, h_img * wp, cpo), x.dtype),
        grid_spec=pltpu.PrefetchScalarGridSpec(
            num_scalar_prefetch=0,
            grid=grid,
            in_specs=[
                # Raw HBM ref; the kernel DMAs the haloed row window itself.
                pl.BlockSpec(memory_space=pl.ANY),
                w_spec,
                pl.BlockSpec((1, ctile), lambda n_, t_, c_: (0, c_)),
                pl.BlockSpec((1, ctile), lambda n_, t_, c_: (0, c_)),
            ],
            # Lane-dense output block: last dim 128/256 -> unmasked stores.
            out_specs=pl.BlockSpec((1, tile_rows * wp, ctile),
                                   lambda n_, t_, c_: (n_, t_, c_)),
            scratch_shapes=[
                pltpu.VMEM((2, (tile_rows + 4) * wp, cpin), x.dtype),
                pltpu.SemaphoreType.DMA((2, 3)),
            ],
        ),
        compiler_params=pltpu.CompilerParams(
            # Batch axis shards across TensorCores (v7x megacore); row-tile and
            # Cout axes must stay sequential: the manual window prefetch and its
            # reuse across Cout tiles depend on that iteration order.
            dimension_semantics=("parallel", "arbitrary", "arbitrary"),
            vmem_limit_bytes=vmem_limit,
        ),
    )(x, w2, scale, shift)


# -----------------------------------------------------------------------------
# Parameter construction (deterministic, mirrors the PyTorch __init__ shapes)
# -----------------------------------------------------------------------------
def init_conv_layer_params(key, feat_dims, kernel=3):
    params = []
    for i in range(len(feat_dims) - 1):
        cin, cout = feat_dims[i], feat_dims[i + 1]
        key, kw_, kb_ = jax.random.split(key, 3)
        bound = 1.0 / jnp.sqrt(cin * kernel * kernel)
        w_oihw = jax.random.uniform(kw_, (cout, cin, kernel, kernel),
                                    jnp.float32, -bound, bound)
        b = jax.random.uniform(kb_, (cout,), jnp.float32, -bound, bound)
        params.append(dict(
            w=w_oihw, b=b,
            gamma=jnp.ones((cout,), jnp.float32),
            beta=jnp.zeros((cout,), jnp.float32),
            mean=jnp.zeros((cout,), jnp.float32),
            var=jnp.ones((cout,), jnp.float32)))
    return params


def _fold_bn_scale_shift(p, has_bnrelu, eps):
    if has_bnrelu:
        inv_std = 1.0 / jnp.sqrt(p["var"] + eps)
        scale = p["gamma"] * inv_std
        shift = (p["b"] - p["mean"]) * scale + p["beta"]
    else:
        scale = jnp.ones_like(p["b"])
        shift = p["b"]
    return scale.astype(jnp.float32), shift.astype(jnp.float32)


# -----------------------------------------------------------------------------
# Forward pass (sequential conv -> BN -> ReLU, BN/ReLU optional on last layer)
# -----------------------------------------------------------------------------
def conv_layer_forward(x_nchw, params, bnrelu_final=True, eps=1e-5,
                       act_dtype=jnp.bfloat16, compute_dtype=jnp.bfloat16):
    n, c0, h, w = x_nchw.shape
    wp = _round_up(w + 2, 8)
    cp0 = _round_up(c0, 128)

    phys_vmem = _physical_vmem_bytes()
    budget = int(0.55 * phys_vmem)
    vmem_limit = max(32 << 20, min(int(0.9 * phys_vmem), 100 << 20))

    # NCHW -> lane-dense padded NHWC, flattened over (H, Wp), done ONCE; the
    # kernels maintain the zero pad columns / channels from here on.
    x = jnp.transpose(x_nchw, (0, 2, 3, 1))
    x = jnp.pad(x, ((0, 0), (0, 0), (1, wp - w - 1), (0, cp0 - c0)))
    x = x.astype(act_dtype).reshape(n, h * wp, cp0)

    n_layers = len(params)
    for i, p in enumerate(params):
        has_bnrelu = (i < n_layers - 1) or bnrelu_final
        cout, cin = p["w"].shape[0], p["w"].shape[1]
        cpin = _round_up(cin, 128)
        cpo = _round_up(cout, 128)
        assert cpin == x.shape[-1]

        # Full v6e/v7x MXU width when the padded Cout allows a 256-wide tile.
        ctile = 256 if cpo % 256 == 0 else 128
        w_resident = (9 * cpin * cpo * 2) <= (8 << 20)
        tile_rows = _pick_row_tile(h, wp, cpin, cpo, ctile, w_resident, budget)

        # (Cout, Cin, KH, KW) -> (KH, KW, Cin, Cout), zero-pad channels, fold
        # the 3x3 taps into the contraction dim -> (9*Cpin, Cpo).
        wk = jnp.transpose(p["w"], (2, 3, 1, 0))
        wk = jnp.pad(wk, ((0, 0), (0, 0), (0, cpin - cin), (0, cpo - cout)))
        w2 = wk.reshape(9 * cpin, cpo).astype(compute_dtype)

        scale, shift = _fold_bn_scale_shift(p, has_bnrelu, eps)
        scale = jnp.pad(scale, (0, cpo - cout), constant_values=1.0).reshape(1, cpo)
        shift = jnp.pad(shift, (0, cpo - cout)).reshape(1, cpo)

        x = _conv_bn_relu_layer(x, w2, scale, shift, h_img=h, wp=wp, valid_w=w,
                                tile_rows=tile_rows, apply_relu=has_bnrelu,
                                ctile=ctile, w_resident=w_resident,
                                vmem_limit=vmem_limit)

    cout_last = params[-1]["w"].shape[0]
    out = x.reshape(n, h, wp, -1)[:, :, 1:1 + w, :cout_last].astype(jnp.float32)
    return jnp.transpose(out, (0, 3, 1, 2))          # back to NCHW


# -----------------------------------------------------------------------------
# Pure-JAX reference (same eval-mode BN fold and bf16 quantization points)
# -----------------------------------------------------------------------------
def reference_forward(x_nchw, params, bnrelu_final=True, eps=1e-5,
                      act_dtype=jnp.bfloat16, compute_dtype=jnp.bfloat16):
    x = x_nchw.astype(act_dtype).astype(jnp.float32)
    n_layers = len(params)
    for i, p in enumerate(params):
        has_bnrelu = (i < n_layers - 1) or bnrelu_final
        wk = p["w"].astype(compute_dtype).astype(jnp.float32)
        y = jax.lax.conv_general_dilated(
            x, wk, window_strides=(1, 1), padding=((1, 1), (1, 1)),
            dimension_numbers=("NCHW", "OIHW", "NCHW"))
        scale, shift = _fold_bn_scale_shift(p, has_bnrelu, eps)
        y = y * scale.reshape(1, -1, 1, 1) + shift.reshape(1, -1, 1, 1)
        if has_bnrelu:
            y = jnp.maximum(y, 0.0)
        x = y.astype(act_dtype).astype(jnp.float32)
    return x


if __name__ == "__main__":
    key = jax.random.PRNGKey(0)
    k_x, k_p, k_x2, k_p2 = jax.random.split(key, 4)

    # Main case: two Conv2d(3x3, s=1, p=1) + BN + ReLU layers.
    feat_dims = [4, 8, 8]
    x = jax.random.normal(k_x, (2, 4, 16, 16), dtype=jnp.float32)  # NCHW
    params = init_conv_layer_params(k_p, feat_dims, kernel=3)

    fwd = jax.jit(lambda xin: conv_layer_forward(xin, params, bnrelu_final=True))
    out = jax.block_until_ready(fwd(x))
    assert out.shape == (2, 8, 16, 16), out.shape
    assert bool(jnp.all(jnp.isfinite(out)))

    ref = reference_forward(x, params, bnrelu_final=True)
    max_err = float(jnp.max(jnp.abs(out - ref)))
    assert max_err < 5e-2, max_err

    # Second case: single layer, bnrelu_final=False, width such that Wp == W+2.
    feat_dims2 = [4, 8]
    x2 = jax.random.normal(k_x2, (1, 4, 8, 14), dtype=jnp.float32)
    params2 = init_conv_layer_params(k_p2, feat_dims2, kernel=3)
    fwd2 = jax.jit(lambda xin: conv_layer_forward(xin, params2, bnrelu_final=False))
    out2 = jax.block_until_ready(fwd2(x2))
    assert out2.shape == (1, 8, 8, 14), out2.shape
    ref2 = reference_forward(x2, params2, bnrelu_final=False)
    max_err2 = float(jnp.max(jnp.abs(out2 - ref2)))
    assert max_err2 < 5e-2, max_err2

    print("KERNEL_OK")
</pallas_src>

<mosaic_0001>
module attributes {stable_mosaic.version = 11 : i64} {
  func.func @_conv_bn_relu_kernel(%arg0: i32, %arg1: i32, %arg2: i32, %arg3: memref<2x384x128xbf16, #tpu.memory_space<any>>, %arg4: memref<1152x128xbf16, #tpu.memory_space<vmem>>, %arg5: memref<1x128xf32, #tpu.memory_space<vmem>>, %arg6: memref<1x128xf32, #tpu.memory_space<vmem>>, %arg7: memref<1x384x128xbf16, #tpu.memory_space<vmem>>, %arg8: memref<2x480x128xbf16, #tpu.memory_space<vmem>>, %arg9: memref<2x3x!tpu.dma_semaphore, #tpu.memory_space<semaphore_mem>>) attributes {dimension_semantics = [#tpu.dimension_semantics<parallel>, #tpu.dimension_semantics<arbitrary>, #tpu.dimension_semantics<arbitrary>], iteration_bounds = array<i64: 2, 1, 1>, scalar_prefetch = 0 : i64, scratch_operands = 2 : i64, tpu.core_type = #tpu.core_type<tc>, window_params = [{}, {pipeline_mode = #tpu.pipeline_mode<synchronous>, transform_indices = @transform_1, window_bounds = array<i64: 1152, 128>}, {transform_indices = @transform_2, window_bounds = array<i64: 1, 128>}, {transform_indices = @transform_3, window_bounds = array<i64: 1, 128>}, {transform_indices = @transform_4, window_bounds = array<i64: 1, 384, 128>}]} {
    %c2_i32 = arith.constant 2 : i32
    %c0_i32 = arith.constant 0 : i32
    %0 = arith.cmpi eq, %c2_i32, %c0_i32 : i32
    %c1_i32 = arith.constant 1 : i32
    %1 = arith.select %0, %c1_i32, %c2_i32 : i32
    %2 = arith.remsi %arg1, %1 : i32
    %c0_i32_0 = arith.constant 0 : i32
    %3 = arith.cmpi ne, %2, %c0_i32_0 : i32
    %c0_i32_1 = arith.constant 0 : i32
    %4 = arith.cmpi slt, %2, %c0_i32_1 : i32
    %c0_i32_2 = arith.constant 0 : i32
    %5 = arith.cmpi slt, %1, %c0_i32_2 : i32
    %6 = arith.xori %4, %5 : i1
    %7 = arith.andi %6, %3 : i1
    %8 = arith.addi %2, %1 : i32
    %9 = arith.select %7, %8, %2 : i32
    %c0_i32_3 = arith.constant 0 : i32
    %10 = arith.cmpi eq, %arg2, %c0_i32_3 : i32
    %11 = arith.extui %10 : i1 to i32
    %c0_i32_4 = arith.constant 0 : i32
    %12 = arith.cmpi ne, %11, %c0_i32_4 : i32
    scf.if %12 {
      %c0_i32_41 = arith.constant 0 : i32
      %89 = arith.cmpi eq, %arg1, %c0_i32_41 : i32
      %90 = arith.extui %89 : i1 to i32
      %c0_i32_42 = arith.constant 0 : i32
      %91 = arith.cmpi ne, %90, %c0_i32_42 : i32
      scf.if %91 {
        %cst_61 = arith.constant 0.000000e+00 : bf16
        %118 = vector.broadcast %cst_61 : bf16 to vector<24x128xbf16>
        %c0_62 = arith.constant 0 : index
        %c0_63 = arith.constant 0 : index
        %c0_64 = arith.constant 0 : index
        %119 = vector.load %arg8[%c0_62, %c0_63, %c0_64] : memref<2x480x128xbf16, #tpu.memory_space<vmem>>, vector<1x24x128xbf16>
        %120 = vector.shape_cast %119 : vector<1x24x128xbf16> to vector<24x128xbf16>
        %121 = vector.shape_cast %118 : vector<24x128xbf16> to vector<1x24x128xbf16>
        tpu.vector_store %arg8[%c0_62, %c0_63, %c0_64], %121 {strides = array<i32>} : memref<2x480x128xbf16, #tpu.memory_space<vmem>>, vector<1x24x128xbf16>,
        %cst_65 = arith.constant 0.000000e+00 : bf16
        %122 = vector.broadcast %cst_65 : bf16 to vector<24x128xbf16>
        %c0_66 = arith.constant 0 : index
        %c456 = arith.constant 456 : index
        %c0_67 = arith.constant 0 : index
        %123 = vector.load %arg8[%c0_66, %c456, %c0_67] : memref<2x480x128xbf16, #tpu.memory_space<vmem>>, vector<1x24x128xbf16>
        %124 = vector.shape_cast %123 : vector<1x24x128xbf16> to vector<24x128xbf16>
        %125 = vector.shape_cast %122 : vector<24x128xbf16> to vector<1x24x128xbf16>
        tpu.vector_store %arg8[%c0_66, %c456, %c0_67], %125 {strides = array<i32>} : memref<2x480x128xbf16, #tpu.memory_space<vmem>>, vector<1x24x128xbf16>,
        %cst_68 = arith.constant 0.000000e+00 : bf16
        %126 = vector.broadcast %cst_68 : bf16 to vector<24x128xbf16>
        %c1 = arith.constant 1 : index
        %c0_69 = arith.constant 0 : index
        %c0_70 = arith.constant 0 : index
        %127 = vector.load %arg8[%c1, %c0_69, %c0_70] : memref<2x480x128xbf16, #tpu.memory_space<vmem>>, vector<1x24x128xbf16>
        %128 = vector.shape_cast %127 : vector<1x24x128xbf16> to vector<24x128xbf16>
        %129 = vector.shape_cast %126 : vector<24x128xbf16> to vector<1x24x128xbf16>
        tpu.vector_store %arg8[%c1, %c0_69, %c0_70], %129 {strides = array<i32>} : memref<2x480x128xbf16, #tpu.memory_space<vmem>>, vector<1x24x128xbf16>,
        %cst_71 = arith.constant 0.000000e+00 : bf16
        %130 = vector.broadcast %cst_71 : bf16 to vector<24x128xbf16>
        %c1_72 = arith.constant 1 : index
        %c456_73 = arith.constant 456 : index
        %c0_74 = arith.constant 0 : index
        %131 = vector.load %arg8[%c1_72, %c456_73, %c0_74] : memref<2x480x128xbf16, #tpu.memory_space<vmem>>, vector<1x24x128xbf16>
        %132 = vector.shape_cast %131 : vector<1x24x128xbf16> to vector<24x128xbf16>
        %133 = vector.shape_cast %130 : vector<24x128xbf16> to vector<1x24x128xbf16>
        tpu.vector_store %arg8[%c1_72, %c456_73, %c0_74], %133 {strides = array<i32>} : memref<2x480x128xbf16, #tpu.memory_space<vmem>>, vector<1x24x128xbf16>,
        %c16_i32_75 = arith.constant 16 : i32
        %134 = arith.muli %arg1, %c16_i32_75 : i32
        %c24_i32_76 = arith.constant 24 : i32
        %135 = arith.muli %134, %c24_i32_76 : i32
        %c24_i32_77 = arith.constant 24 : i32
        %136 = arith.subi %135, %c24_i32_77 : i32
        %c384_i32_78 = arith.constant 384 : i32
        %137 = arith.addi %135, %c384_i32_78 : i32
        %c0_i32_79 = arith.constant 0 : i32
        %c0_i32_80 = arith.constant 0 : i32
        %138 = tpu.memref_slice %arg3[%arg0, %135, %c0_i32_80] : memref<2x384x128xbf16, #tpu.memory_space<any>> -> memref<1x384x128xbf16, #tpu.memory_space<any>>
        %139 = tpu.memref_squeeze %138 : memref<1x384x128xbf16, #tpu.memory_space<any>> -> memref<384x128xbf16, #tpu.memory_space<any>>
        %c48_i32_81 = arith.constant 48 : i32
        %c0_i32_82 = arith.constant 0 : i32
        %140 = tpu.memref_slice %arg8[%9, %c48_i32_81, %c0_i32_82] : memref<2x480x128xbf16, #tpu.memory_space<vmem>> -> memref<1x384x128xbf16, #tpu.memory_space<vmem>>
        %141 = tpu.memref_squeeze %140 : memref<1x384x128xbf16, #tpu.memory_space<vmem>> -> memref<384x128xbf16, #tpu.memory_space<vmem>>
        %142 = tpu.memref_slice %arg9[%9, %c0_i32_79] : memref<2x3x!tpu.dma_semaphore, #tpu.memory_space<semaphore_mem>> -> memref<1x1x!tpu.dma_semaphore, #tpu.memory_space<semaphore_mem>>
        %143 = tpu.memref_squeeze %142 : memref<1x1x!tpu.dma_semaphore, #tpu.memory_space<semaphore_mem>> -> memref<!tpu.dma_semaphore, #tpu.memory_space<semaphore_mem>>
        tpu.enqueue_dma source(%139 : memref<384x128xbf16, #tpu.memory_space<any>>) target(%141 : memref<384x128xbf16, #tpu.memory_space<vmem>>) target_semaphore(%143 : memref<!tpu.dma_semaphore, #tpu.memory_space<semaphore_mem>>)
        %c0_i32_83 = arith.constant 0 : i32
        %144 = arith.cmpi sgt, %arg1, %c0_i32_83 : i32
        %145 = arith.extui %144 : i1 to i32
        %c1_i32_84 = arith.constant 1 : i32
        %c0_i32_85 = arith.constant 0 : i32
        %146 = arith.cmpi ne, %145, %c0_i32_85 : i32
        scf.if %146 {
          %c0_i32_89 = arith.constant 0 : i32
          %150 = tpu.memref_slice %arg3[%arg0, %136, %c0_i32_89] : memref<2x384x128xbf16, #tpu.memory_space<any>> -> memref<1x24x128xbf16, #tpu.memory_space<any>>
          %151 = tpu.memref_squeeze %150 : memref<1x24x128xbf16, #tpu.memory_space<any>> -> memref<24x128xbf16, #tpu.memory_space<any>>
          %c24_i32_90 = arith.constant 24 : i32
          %c0_i32_91 = arith.constant 0 : i32
          %152 = tpu.memref_slice %arg8[%9, %c24_i32_90, %c0_i32_91] : memref<2x480x128xbf16, #tpu.memory_space<vmem>> -> memref<1x24x128xbf16, #tpu.memory_space<vmem>>
          %153 = tpu.memref_squeeze %152 : memref<1x24x128xbf16, #tpu.memory_space<vmem>> -> memref<24x128xbf16, #tpu.memory_space<vmem>>
          %154 = tpu.memref_slice %arg9[%9, %c1_i32_84] : memref<2x3x!tpu.dma_semaphore, #tpu.memory_space<semaphore_mem>> -> memref<1x1x!tpu.dma_semaphore, #tpu.memory_space<semaphore_mem>>
          %155 = tpu.memref_squeeze %154 : memref<1x1x!tpu.dma_semaphore, #tpu.memory_space<semaphore_mem>> -> memref<!tpu.dma_semaphore, #tpu.memory_space<semaphore_mem>>
          tpu.enqueue_dma source(%151 : memref<24x128xbf16, #tpu.memory_space<any>>) target(%153 : memref<24x128xbf16, #tpu.memory_space<vmem>>) target_semaphore(%155 : memref<!tpu.dma_semaphore, #tpu.memory_space<semaphore_mem>>)
        } else {
        }
        %c0_i32_86 = arith.constant 0 : i32
        %147 = arith.cmpi slt, %arg1, %c0_i32_86 : i32
        %148 = arith.extui %147 : i1 to i32
        %c2_i32_87 = arith.constant 2 : i32
        %c0_i32_88 = arith.constant 0 : i32
        %149 = arith.cmpi ne, %148, %c0_i32_88 : i32
        scf.if %149 {
          %c0_i32_89 = arith.constant 0 : i32
          %150 = tpu.memref_slice %arg3[%arg0, %137, %c0_i32_89] : memref<2x384x128xbf16, #tpu.memory_space<any>> -> memref<1x24x128xbf16, #tpu.memory_space<any>>
          %151 = tpu.memref_squeeze %150 : memref<1x24x128xbf16, #tpu.memory_space<any>> -> memref<24x128xbf16, #tpu.memory_space<any>>
          %c432_i32 = arith.constant 432 : i32
          %c0_i32_90 = arith.constant 0 : i32
          %152 = tpu.memref_slice %arg8[%9, %c432_i32, %c0_i32_90] : memref<2x480x128xbf16, #tpu.memory_space<vmem>> -> memref<1x24x128xbf16, #tpu.memory_space<vmem>>
          %153 = tpu.memref_squeeze %152 : memref<1x24x128xbf16, #tpu.memory_space<vmem>> -> memref<24x128xbf16, #tpu.memory_space<vmem>>
          %154 = tpu.memref_slice %arg9[%9, %c2_i32_87] : memref<2x3x!tpu.dma_semaphore, #tpu.memory_space<semaphore_mem>> -> memref<1x1x!tpu.dma_semaphore, #tpu.memory_space<semaphore_mem>>
          %155 = tpu.memref_squeeze %154 : memref<1x1x!tpu.dma_semaphore, #tpu.memory_space<semaphore_mem>> -> memref<!tpu.dma_semaphore, #tpu.memory_space<semaphore_mem>>
          tpu.enqueue_dma source(%151 : memref<24x128xbf16, #tpu.memory_space<any>>) target(%153 : memref<24x128xbf16, #tpu.memory_space<vmem>>) target_semaphore(%155 : memref<!tpu.dma_semaphore, #tpu.memory_space<semaphore_mem>>)
        } else {
        }
      } else {
      }
      %c16_i32_43 = arith.constant 16 : i32
      %92 = arith.muli %arg1, %c16_i32_43 : i32
      %c24_i32 = arith.constant 24 : i32
      %93 = arith.muli %92, %c24_i32 : i32
      %c24_i32_44 = arith.constant 24 : i32
      %94 = arith.subi %93, %c24_i32_44 : i32
      %c384_i32 = arith.constant 384 : i32
      %95 = arith.addi %93, %c384_i32 : i32
      %c0_i32_45 = arith.constant 0 : i32
      %c0_i32_46 = arith.constant 0 : i32
      %96 = tpu.memref_slice %arg3[%arg0, %93, %c0_i32_46] : memref<2x384x128xbf16, #tpu.memory_space<any>> -> memref<1x384x128xbf16, #tpu.memory_space<any>>
      %97 = tpu.memref_squeeze %96 : memref<1x384x128xbf16, #tpu.memory_space<any>> -> memref<384x128xbf16, #tpu.memory_space<any>>
      %c48_i32 = arith.constant 48 : i32
      %c0_i32_47 = arith.constant 0 : i32
      %98 = tpu.memref_slice %arg8[%9, %c48_i32, %c0_i32_47] : memref<2x480x128xbf16, #tpu.memory_space<vmem>> -> memref<1x384x128xbf16, #tpu.memory_space<vmem>>
      %99 = tpu.memref_squeeze %98 : memref<1x384x128xbf16, #tpu.memory_space<vmem>> -> memref<384x128xbf16, #tpu.memory_space<vmem>>
      %100 = tpu.memref_slice %arg9[%9, %c0_i32_45] : memref<2x3x!tpu.dma_semaphore, #tpu.memory_space<semaphore_mem>> -> memref<1x1x!tpu.dma_semaphore, #tpu.memory_space<semaphore_mem>>
      %101 = tpu.memref_squeeze %100 : memref<1x1x!tpu.dma_semaphore, #tpu.memory_space<semaphore_mem>> -> memref<!tpu.dma_semaphore, #tpu.memory_space<semaphore_mem>>
      tpu.wait_dma2 semaphore(%101 : memref<!tpu.dma_semaphore, #tpu.memory_space<semaphore_mem>>) src(%97 : memref<384x128xbf16, #tpu.memory_space<any>>) dst(%99 : memref<384x128xbf16, #tpu.memory_space<vmem>>)
      %c0_i32_48 = arith.constant 0 : i32
      %102 = arith.cmpi sgt, %arg1, %c0_i32_48 : i32
      %103 = arith.extui %102 : i1 to i32
      %c1_i32_49 = arith.constant 1 : i32
      %c0_i32_50 = arith.constant 0 : i32
      %104 = arith.cmpi ne, %103, %c0_i32_50 : i32
      scf.if %104 {
        %c0_i32_61 = arith.constant 0 : i32
        %118 = tpu.memref_slice %arg3[%arg0, %94, %c0_i32_61] : memref<2x384x128xbf16, #tpu.memory_space<any>> -> memref<1x24x128xbf16, #tpu.memory_space<any>>
        %119 = tpu.memref_squeeze %118 : memref<1x24x128xbf16, #tpu.memory_space<any>> -> memref<24x128xbf16, #tpu.memory_space<any>>
        %c24_i32_62 = arith.constant 24 : i32
        %c0_i32_63 = arith.constant 0 : i32
        %120 = tpu.memref_slice %arg8[%9, %c24_i32_62, %c0_i32_63] : memref<2x480x128xbf16, #tpu.memory_space<vmem>> -> memref<1x24x128xbf16, #tpu.memory_space<vmem>>
        %121 = tpu.memref_squeeze %120 : memref<1x24x128xbf16, #tpu.memory_space<vmem>> -> memref<24x128xbf16, #tpu.memory_space<vmem>>
        %122 = tpu.memref_slice %arg9[%9, %c1_i32_49] : memref<2x3x!tpu.dma_semaphore, #tpu.memory_space<semaphore_mem>> -> memref<1x1x!tpu.dma_semaphore, #tpu.memory_space<semaphore_mem>>
        %123 = tpu.memref_squeeze %122 : memref<1x1x!tpu.dma_semaphore, #tpu.memory_space<semaphore_mem>> -> memref<!tpu.dma_semaphore, #tpu.memory_space<semaphore_mem>>
        tpu.wait_dma2 semaphore(%123 : memref<!tpu.dma_semaphore, #tpu.memory_space<semaphore_mem>>) src(%119 : memref<24x128xbf16, #tpu.memory_space<any>>) dst(%121 : memref<24x128xbf16, #tpu.memory_space<vmem>>)
      } else {
      }
      %c0_i32_51 = arith.constant 0 : i32
      %105 = arith.cmpi eq, %arg1, %c0_i32_51 : i32
      %106 = arith.extui %105 : i1 to i32
      %c0_i32_52 = arith.constant 0 : i32
      %107 = arith.cmpi ne, %106, %c0_i32_52 : i32
      scf.if %107 {
        %cst_61 = arith.constant 0.000000e+00 : bf16
        %118 = vector.broadcast %cst_61 : bf16 to vector<24x128xbf16>
        %119 = arith.index_cast %9 : i32 to index
        %c24_62 = arith.constant 24 : index
        %c0_63 = arith.constant 0 : index
        %120 = vector.load %arg8[%119, %c24_62, %c0_63] : memref<2x480x128xbf16, #tpu.memory_space<vmem>>, vector<1x24x128xbf16>
        %121 = vector.shape_cast %120 : vector<1x24x128xbf16> to vector<24x128xbf16>
        %122 = vector.shape_cast %118 : vector<24x128xbf16> to vector<1x24x128xbf16>
        tpu.vector_store %arg8[%119, %c24_62, %c0_63], %122 {strides = array<i32>} : memref<2x480x128xbf16, #tpu.memory_space<vmem>>, vector<1x24x128xbf16>,
      } else {
      }
      %c0_i32_53 = arith.constant 0 : i32
      %108 = arith.cmpi slt, %arg1, %c0_i32_53 : i32
      %109 = arith.extui %108 : i1 to i32
      %c2_i32_54 = arith.constant 2 : i32
      %c0_i32_55 = arith.constant 0 : i32
      %110 = arith.cmpi ne, %109, %c0_i32_55 : i32
      scf.if %110 {
        %c0_i32_61 = arith.constant 0 : i32
        %118 = tpu.memref_slice %arg3[%arg0, %95, %c0_i32_61] : memref<2x384x128xbf16, #tpu.memory_space<any>> -> memref<1x24x128xbf16, #tpu.memory_space<any>>
        %119 = tpu.memref_squeeze %118 : memref<1x24x128xbf16, #tpu.memory_space<any>> -> memref<24x128xbf16, #tpu.memory_space<any>>
        %c432_i32 = arith.constant 432 : i32
        %c0_i32_62 = arith.constant 0 : i32
        %120 = tpu.memref_slice %arg8[%9, %c432_i32, %c0_i32_62] : memref<2x480x128xbf16, #tpu.memory_space<vmem>> -> memref<1x24x128xbf16, #tpu.memory_space<vmem>>
        %121 = tpu.memref_squeeze %120 : memref<1x24x128xbf16, #tpu.memory_space<vmem>> -> memref<24x128xbf16, #tpu.memory_space<vmem>>
        %122 = tpu.memref_slice %arg9[%9, %c2_i32_54] : memref<2x3x!tpu.dma_semaphore, #tpu.memory_space<semaphore_mem>> -> memref<1x1x!tpu.dma_semaphore, #tpu.memory_space<semaphore_mem>>
        %123 = tpu.memref_squeeze %122 : memref<1x1x!tpu.dma_semaphore, #tpu.memory_space<semaphore_mem>> -> memref<!tpu.dma_semaphore, #tpu.memory_space<semaphore_mem>>
        tpu.wait_dma2 semaphore(%123 : memref<!tpu.dma_semaphore, #tpu.memory_space<semaphore_mem>>) src(%119 : memref<24x128xbf16, #tpu.memory_space<any>>) dst(%121 : memref<24x128xbf16, #tpu.memory_space<vmem>>)
      } else {
      }
      %c0_i32_56 = arith.constant 0 : i32
      %111 = arith.cmpi eq, %arg1, %c0_i32_56 : i32
      %112 = arith.extui %111 : i1 to i32
      %c0_i32_57 = arith.constant 0 : i32
      %113 = arith.cmpi ne, %112, %c0_i32_57 : i32
      scf.if %113 {
        %cst_61 = arith.constant 0.000000e+00 : bf16
        %118 = vector.broadcast %cst_61 : bf16 to vector<24x128xbf16>
        %119 = arith.index_cast %9 : i32 to index
        %c432 = arith.constant 432 : index
        %c0_62 = arith.constant 0 : index
        %120 = vector.load %arg8[%119, %c432, %c0_62] : memref<2x480x128xbf16, #tpu.memory_space<vmem>>, vector<1x24x128xbf16>
        %121 = vector.shape_cast %120 : vector<1x24x128xbf16> to vector<24x128xbf16>
        %122 = vector.shape_cast %118 : vector<24x128xbf16> to vector<1x24x128xbf16>
        tpu.vector_store %arg8[%119, %c432, %c0_62], %122 {strides = array<i32>} : memref<2x480x128xbf16, #tpu.memory_space<vmem>>, vector<1x24x128xbf16>,
      } else {
      }
      %c1_i32_58 = arith.constant 1 : i32
      %114 = arith.addi %arg1, %c1_i32_58 : i32
      %c1_i32_59 = arith.constant 1 : i32
      %115 = arith.cmpi slt, %114, %c1_i32_59 : i32
      %116 = arith.extui %115 : i1 to i32
      %c0_i32_60 = arith.constant 0 : i32
      %117 = arith.cmpi ne, %116, %c0_i32_60 : i32
      scf.if %117 {
        %c1_i32_61 = arith.constant 1 : i32
        %118 = arith.addi %arg1, %c1_i32_61 : i32
        %c1_i32_62 = arith.constant 1 : i32
        %119 = arith.subi %c1_i32_62, %9 : i32
        %c16_i32_63 = arith.constant 16 : i32
        %120 = arith.muli %118, %c16_i32_63 : i32
        %c24_i32_64 = arith.constant 24 : i32
        %121 = arith.muli %120, %c24_i32_64 : i32
        %c24_i32_65 = arith.constant 24 : i32
        %122 = arith.subi %121, %c24_i32_65 : i32
        %c384_i32_66 = arith.constant 384 : i32
        %123 = arith.addi %121, %c384_i32_66 : i32
        %c0_i32_67 = arith.constant 0 : i32
        %c0_i32_68 = arith.constant 0 : i32
        %124 = tpu.memref_slice %arg3[%arg0, %121, %c0_i32_68] : memref<2x384x128xbf16, #tpu.memory_space<any>> -> memref<1x384x128xbf16, #tpu.memory_space<any>>
        %125 = tpu.memref_squeeze %124 : memref<1x384x128xbf16, #tpu.memory_space<any>> -> memref<384x128xbf16, #tpu.memory_space<any>>
        %c48_i32_69 = arith.constant 48 : i32
        %c0_i32_70 = arith.constant 0 : i32
        %126 = tpu.memref_slice %arg8[%119, %c48_i32_69, %c0_i32_70] : memref<2x480x128xbf16, #tpu.memory_space<vmem>> -> memref<1x384x128xbf16, #tpu.memory_space<vmem>>
        %127 = tpu.memref_squeeze %126 : memref<1x384x128xbf16, #tpu.memory_space<vmem>> -> memref<384x128xbf16, #tpu.memory_space<vmem>>
        %128 = tpu.memref_slice %arg9[%119, %c0_i32_67] : memref<2x3x!tpu.dma_semaphore, #tpu.memory_space<semaphore_mem>> -> memref<1x1x!tpu.dma_semaphore, #tpu.memory_space<semaphore_mem>>
        %129 = tpu.memref_squeeze %128 : memref<1x1x!tpu.dma_semaphore, #tpu.memory_space<semaphore_mem>> -> memref<!tpu.dma_semaphore, #tpu.memory_space<semaphore_mem>>
        tpu.enqueue_dma source(%125 : memref<384x128xbf16, #tpu.memory_space<any>>) target(%127 : memref<384x128xbf16, #tpu.memory_space<vmem>>) target_semaphore(%129 : memref<!tpu.dma_semaphore, #tpu.memory_space<semaphore_mem>>)
        %c0_i32_71 = arith.constant 0 : i32
        %130 = arith.cmpi sgt, %118, %c0_i32_71 : i32
        %131 = arith.extui %130 : i1 to i32
        %c1_i32_72 = arith.constant 1 : i32
        %c0_i32_73 = arith.constant 0 : i32
        %132 = arith.cmpi ne, %131, %c0_i32_73 : i32
        scf.if %132 {
          %c0_i32_77 = arith.constant 0 : i32
          %136 = tpu.memref_slice %arg3[%arg0, %122, %c0_i32_77] : memref<2x384x128xbf16, #tpu.memory_space<any>> -> memref<1x24x128xbf16, #tpu.memory_space<any>>
          %137 = tpu.memref_squeeze %136 : memref<1x24x128xbf16, #tpu.memory_space<any>> -> memref<24x128xbf16, #tpu.memory_space<any>>
          %c24_i32_78 = arith.constant 24 : i32
          %c0_i32_79 = arith.constant 0 : i32
          %138 = tpu.memref_slice %arg8[%119, %c24_i32_78, %c0_i32_79] : memref<2x480x128xbf16, #tpu.memory_space<vmem>> -> memref<1x24x128xbf16, #tpu.memory_space<vmem>>
          %139 = tpu.memref_squeeze %138 : memref<1x24x128xbf16, #tpu.memory_space<vmem>> -> memref<24x128xbf16, #tpu.memory_space<vmem>>
          %140 = tpu.memref_slice %arg9[%119, %c1_i32_72] : memref<2x3x!tpu.dma_semaphore, #tpu.memory_space<semaphore_mem>> -> memref<1x1x!tpu.dma_semaphore, #tpu.memory_space<semaphore_mem>>
          %141 = tpu.memref_squeeze %140 : memref<1x1x!tpu.dma_semaphore, #tpu.memory_space<semaphore_mem>> -> memref<!tpu.dma_semaphore, #tpu.memory_space<semaphore_mem>>
          tpu.enqueue_dma source(%137 : memref<24x128xbf16, #tpu.memory_space<any>>) target(%139 : memref<24x128xbf16, #tpu.memory_space<vmem>>) target_semaphore(%141 : memref<!tpu.dma_semaphore, #tpu.memory_space<semaphore_mem>>)
        } else {
        }
        %c0_i32_74 = arith.constant 0 : i32
        %133 = arith.cmpi slt, %118, %c0_i32_74 : i32
        %134 = arith.extui %133 : i1 to i32
        %c2_i32_75 = arith.constant 2 : i32
        %c0_i32_76 = arith.constant 0 : i32
        %135 = arith.cmpi ne, %134, %c0_i32_76 : i32
        scf.if %135 {
          %c0_i32_77 = arith.constant 0 : i32
          %136 = tpu.memref_slice %arg3[%arg0, %123, %c0_i32_77] : memref<2x384x128xbf16, #tpu.memory_space<any>> -> memref<1x24x128xbf16, #tpu.memory_space<any>>
          %137 = tpu.memref_squeeze %136 : memref<1x24x128xbf16, #tpu.memory_space<any>> -> memref<24x128xbf16, #tpu.memory_space<any>>
          %c432_i32 = arith.constant 432 : i32
          %c0_i32_78 = arith.constant 0 : i32
          %138 = tpu.memref_slice %arg8[%119, %c432_i32, %c0_i32_78] : memref<2x480x128xbf16, #tpu.memory_space<vmem>> -> memref<1x24x128xbf16, #tpu.memory_space<vmem>>
          %139 = tpu.memref_squeeze %138 : memref<1x24x128xbf16, #tpu.memory_space<vmem>> -> memref<24x128xbf16, #tpu.memory_space<vmem>>
          %140 = tpu.memref_slice %arg9[%119, %c2_i32_75] : memref<2x3x!tpu.dma_semaphore, #tpu.memory_space<semaphore_mem>> -> memref<1x1x!tpu.dma_semaphore, #tpu.memory_space<semaphore_mem>>
          %141 = tpu.memref_squeeze %140 : memref<1x1x!tpu.dma_semaphore, #tpu.memory_space<semaphore_mem>> -> memref<!tpu.dma_semaphore, #tpu.memory_space<semaphore_mem>>
          tpu.enqueue_dma source(%137 : memref<24x128xbf16, #tpu.memory_space<any>>) target(%139 : memref<24x128xbf16, #tpu.memory_space<vmem>>) target_semaphore(%141 : memref<!tpu.dma_semaphore, #tpu.memory_space<semaphore_mem>>)
        } else {
        }
      } else {
      }
    } else {
    }
    %13 = arith.index_cast %9 : i32 to index
    %c23 = arith.constant 23 : index
    %c0 = arith.constant 0 : index
    %14 = vector.load %arg8[%13, %c23, %c0] : memref<2x480x128xbf16, #tpu.memory_space<vmem>>, vector<1x384x128xbf16>
    %15 = vector.shape_cast %14 : vector<1x384x128xbf16> to vector<384x128xbf16>
    %c0_5 = arith.constant 0 : index
    %c0_6 = arith.constant 0 : index
    %16 = vector.load %arg4[%c0_5, %c0_6] : memref<1152x128xbf16, #tpu.memory_space<vmem>>, vector<128x128xbf16>
    %cst = arith.constant dense<0.000000e+00> : vector<384x128xf32>
    %17 = tpu.matmul %15, %16, %cst {dimension_numbers = #tpu.dot_dimension_numbers<[1], [0], [0], [1], [0, 0, 1, 1], [], []>} : vector<384x128xbf16>, vector<128x128xbf16>, vector<384x128xf32> -> vector<384x128xf32>
    %18 = arith.index_cast %9 : i32 to index
    %c24 = arith.constant 24 : index
    %c0_7 = arith.constant 0 : index
    %19 = vector.load %arg8[%18, %c24, %c0_7] : memref<2x480x128xbf16, #tpu.memory_space<vmem>>, vector<1x384x128xbf16>
    %20 = vector.shape_cast %19 : vector<1x384x128xbf16> to vector<384x128xbf16>
    %c128 = arith.constant 128 : index
    %c0_8 = arith.constant 0 : index
    %21 = vector.load %arg4[%c128, %c0_8] : memref<1152x128xbf16, #tpu.memory_space<vmem>>, vector<128x128xbf16>
    %cst_9 = arith.constant dense<0.000000e+00> : vector<384x128xf32>
    %22 = tpu.matmul %20, %21, %cst_9 {dimension_numbers = #tpu.dot_dimension_numbers<[1], [0], [0], [1], [0, 0, 1, 1], [], []>} : vector<384x128xbf16>, vector<128x128xbf16>, vector<384x128xf32> -> vector<384x128xf32>
    %23 = arith.addf %17, %22 : vector<384x128xf32>
    %24 = arith.index_cast %9 : i32 to index
    %c25 = arith.constant 25 : index
    %c0_10 = arith.constant 0 : index
    %25 = vector.load %arg8[%24, %c25, %c0_10] : memref<2x480x128xbf16, #tpu.memory_space<vmem>>, vector<1x384x128xbf16>
    %26 = vector.shape_cast %25 : vector<1x384x128xbf16> to vector<384x128xbf16>
    %c256 = arith.constant 256 : index
    %c0_11 = arith.constant 0 : index
    %27 = vector.load %arg4[%c256, %c0_11] : memref<1152x128xbf16, #tpu.memory_space<vmem>>, vector<128x128xbf16>
    %cst_12 = arith.constant dense<0.000000e+00> : vector<384x128xf32>
    %28 = tpu.matmul %26, %27, %cst_12 {dimension_numbers = #tpu.dot_dimension_numbers<[1], [0], [0], [1], [0, 0, 1, 1], [], []>} : vector<384x128xbf16>, vector<128x128xbf16>, vector<384x128xf32> -> vector<384x128xf32>
    %29 = arith.addf %23, %28 : vector<384x128xf32>
    %30 = arith.index_cast %9 : i32 to index
    %c47 = arith.constant 47 : index
    %c0_13 = arith.constant 0 : index
    %31 = vector.load %arg8[%30, %c47, %c0_13] : memref<2x480x128xbf16, #tpu.memory_space<vmem>>, vector<1x384x128xbf16>
    %32 = vector.shape_cast %31 : vector<1x384x128xbf16> to vector<384x128xbf16>
    %c384 = arith.constant 384 : index
    %c0_14 = arith.constant 0 : index
    %33 = vector.load %arg4[%c384, %c0_14] : memref<1152x128xbf16, #tpu.memory_space<vmem>>, vector<128x128xbf16>
    %cst_15 = arith.constant dense<0.000000e+00> : vector<384x128xf32>
    %34 = tpu.matmul %32, %33, %cst_15 {dimension_numbers = #tpu.dot_dimension_numbers<[1], [0], [0], [1], [0, 0, 1, 1], [], []>} : vector<384x128xbf16>, vector<128x128xbf16>, vector<384x128xf32> -> vector<384x128xf32>
    %35 = arith.addf %29, %34 : vector<384x128xf32>
    %36 = arith.index_cast %9 : i32 to index
    %c48 = arith.constant 48 : index
    %c0_16 = arith.constant 0 : index
    %37 = vector.load %arg8[%36, %c48, %c0_16] : memref<2x480x128xbf16, #tpu.memory_space<vmem>>, vector<1x384x128xbf16>
    %38 = vector.shape_cast %37 : vector<1x384x128xbf16> to vector<384x128xbf16>
    %c512 = arith.constant 512 : index
    %c0_17 = arith.constant 0 : index
    %39 = vector.load %arg4[%c512, %c0_17] : memref<1152x128xbf16, #tpu.memory_space<vmem>>, vector<128x128xbf16>
    %cst_18 = arith.constant dense<0.000000e+00> : vector<384x128xf32>
    %40 = tpu.matmul %38, %39, %cst_18 {dimension_numbers = #tpu.dot_dimension_numbers<[1], [0], [0], [1], [0, 0, 1, 1], [], []>} : vector<384x128xbf16>, vector<128x128xbf16>, vector<384x128xf32> -> vector<384x128xf32>
    %41 = arith.addf %35, %40 : vector<384x128xf32>
    %42 = arith.index_cast %9 : i32 to index
    %c49 = arith.constant 49 : index
    %c0_19 = arith.constant 0 : index
    %43 = vector.load %arg8[%42, %c49, %c0_19] : memref<2x480x128xbf16, #tpu.memory_space<vmem>>, vector<1x384x128xbf16>
    %44 = vector.shape_cast %43 : vector<1x384x128xbf16> to vector<384x128xbf16>
    %c640 = arith.constant 640 : index
    %c0_20 = arith.constant 0 : index
    %45 = vector.load %arg4[%c640, %c0_20] : memref<1152x128xbf16, #tpu.memory_space<vmem>>, vector<128x128xbf16>
    %cst_21 = arith.constant dense<0.000000e+00> : vector<384x128xf32>
    %46 = tpu.matmul %44, %45, %cst_21 {dimension_numbers = #tpu.dot_dimension_numbers<[1], [0], [0], [1], [0, 0, 1, 1], [], []>} : vector<384x128xbf16>, vector<128x128xbf16>, vector<384x128xf32> -> vector<384x128xf32>
    %47 = arith.addf %41, %46 : vector<384x128xf32>
    %48 = arith.index_cast %9 : i32 to index
    %c71 = arith.constant 71 : index
    %c0_22 = arith.constant 0 : index
    %49 = vector.load %arg8[%48, %c71, %c0_22] : memref<2x480x128xbf16, #tpu.memory_space<vmem>>, vector<1x384x128xbf16>
    %50 = vector.shape_cast %49 : vector<1x384x128xbf16> to vector<384x128xbf16>
    %c768 = arith.constant 768 : index
    %c0_23 = arith.constant 0 : index
    %51 = vector.load %arg4[%c768, %c0_23] : memref<1152x128xbf16, #tpu.memory_space<vmem>>, vector<128x128xbf16>
    %cst_24 = arith.constant dense<0.000000e+00> : vector<384x128xf32>
    %52 = tpu.matmul %50, %51, %cst_24 {dimension_numbers = #tpu.dot_dimension_numbers<[1], [0], [0], [1], [0, 0, 1, 1], [], []>} : vector<384x128xbf16>, vector<128x128xbf16>, vector<384x128xf32> -> vector<384x128xf32>
    %53 = arith.addf %47, %52 : vector<384x128xf32>
    %54 = arith.index_cast %9 : i32 to index
    %c72 = arith.constant 72 : index
    %c0_25 = arith.constant 0 : index
    %55 = vector.load %arg8[%54, %c72, %c0_25] : memref<2x480x128xbf16, #tpu.memory_space<vmem>>, vector<1x384x128xbf16>
    %56 = vector.shape_cast %55 : vector<1x384x128xbf16> to vector<384x128xbf16>
    %c896 = arith.constant 896 : index
    %c0_26 = arith.constant 0 : index
    %57 = vector.load %arg4[%c896, %c0_26] : memref<1152x128xbf16, #tpu.memory_space<vmem>>, vector<128x128xbf16>
    %cst_27 = arith.constant dense<0.000000e+00> : vector<384x128xf32>
    %58 = tpu.matmul %56, %57, %cst_27 {dimension_numbers = #tpu.dot_dimension_numbers<[1], [0], [0], [1], [0, 0, 1, 1], [], []>} : vector<384x128xbf16>, vector<128x128xbf16>, vector<384x128xf32> -> vector<384x128xf32>
    %59 = arith.addf %53, %58 : vector<384x128xf32>
    %60 = arith.index_cast %9 : i32 to index
    %c73 = arith.constant 73 : index
    %c0_28 = arith.constant 0 : index
    %61 = vector.load %arg8[%60, %c73, %c0_28] : memref<2x480x128xbf16, #tpu.memory_space<vmem>>, vector<1x384x128xbf16>
    %62 = vector.shape_cast %61 : vector<1x384x128xbf16> to vector<384x128xbf16>
    %c1024 = arith.constant 1024 : index
    %c0_29 = arith.constant 0 : index
    %63 = vector.load %arg4[%c1024, %c0_29] : memref<1152x128xbf16, #tpu.memory_space<vmem>>, vector<128x128xbf16>
    %cst_30 = arith.constant dense<0.000000e+00> : vector<384x128xf32>
    %64 = tpu.matmul %62, %63, %cst_30 {dimension_numbers = #tpu.dot_dimension_numbers<[1], [0], [0], [1], [0, 0, 1, 1], [], []>} : vector<384x128xbf16>, vector<128x128xbf16>, vector<384x128xf32> -> vector<384x128xf32>
    %65 = arith.addf %59, %64 : vector<384x128xf32>
    %c0_31 = arith.constant 0 : index
    %c0_32 = arith.constant 0 : index
    %66 = vector.load %arg5[%c0_31, %c0_32] : memref<1x128xf32, #tpu.memory_space<vmem>>, vector<1x128xf32>
    %67 = vector.broadcast %66 : vector<1x128xf32> to vector<384x128xf32>
    %68 = arith.mulf %65, %67 : vector<384x128xf32>
    %c0_33 = arith.constant 0 : index
    %c0_34 = arith.constant 0 : index
    %69 = vector.load %arg6[%c0_33, %c0_34] : memref<1x128xf32, #tpu.memory_space<vmem>>, vector<1x128xf32>
    %70 = vector.broadcast %69 : vector<1x128xf32> to vector<384x128xf32>
    %71 = arith.addf %68, %70 : vector<384x128xf32>
    %cst_35 = arith.constant 0.000000e+00 : f32
    %72 = vector.broadcast %cst_35 : f32 to vector<384x128xf32>
    %73 = arith.maximumf %71, %72 : vector<384x128xf32>
    %74 = arith.truncf %73 : vector<384x128xf32> to vector<384x128xbf16>
    %75 = vector.shape_cast %74 : vector<384x128xbf16> to vector<16x24x128xbf16>
    %76 = tpu.iota {dimensions = array<i32: 0>} : vector<24x128xi32>
    %c1_i32_36 = arith.constant 1 : i32
    %77 = vector.broadcast %c1_i32_36 : i32 to vector<24x128xi32>
    %78 = arith.cmpi sge, %76, %77 : vector<24x128xi32>
    %c16_i32 = arith.constant 16 : i32
    %79 = vector.broadcast %c16_i32 : i32 to vector<24x128xi32>
    %80 = arith.cmpi sle, %76, %79 : vector<24x128xi32>
    %81 = arith.andi %78, %80 : vector<24x128xi1>
    %82 = vector.shape_cast %81 : vector<24x128xi1> to vector<1x24x128xi1>
    %cst_37 = arith.constant 0.000000e+00 : bf16
    %83 = vector.shape_cast %82 : vector<1x24x128xi1> to vector<1x24x128xi1>
    %84 = vector.broadcast %83 : vector<1x24x128xi1> to vector<16x24x128xi1>
    %85 = vector.broadcast %cst_37 : bf16 to vector<16x24x128xbf16>
    %86 = arith.select %84, %75, %85 : vector<16x24x128xi1>, vector<16x24x128xbf16>
    %87 = vector.shape_cast %86 : vector<16x24x128xbf16> to vector<1x384x128xbf16>
    %c0_38 = arith.constant 0 : index
    %c0_39 = arith.constant 0 : index
    %c0_40 = arith.constant 0 : index
    %88 = vector.load %arg7[%c0_38, %c0_39, %c0_40] : memref<1x384x128xbf16, #tpu.memory_space<vmem>>, vector<1x384x128xbf16>
    tpu.vector_store %arg7[%c0_38, %c0_39, %c0_40], %87 {strides = array<i32>} : memref<1x384x128xbf16, #tpu.memory_space<vmem>>, vector<1x384x128xbf16>,
    return
  }
  func.func @transform_1(%arg0: i32, %arg1: i32, %arg2: i32) -> (i32, i32) {
    %c0_i32 = arith.constant 0 : i32
    %c0_i32_0 = arith.constant 0 : i32
    %c0_i32_1 = arith.constant 0 : i32
    return %c0_i32, %c0_i32_0 : i32, i32
  }
  func.func @transform_2(%arg0: i32, %arg1: i32, %arg2: i32) -> (i32, i32) {
    %c0_i32 = arith.constant 0 : i32
    %c0_i32_0 = arith.constant 0 : i32
    return %c0_i32, %arg2 : i32, i32
  }
  func.func @transform_3(%arg0: i32, %arg1: i32, %arg2: i32) -> (i32, i32) {
    %c0_i32 = arith.constant 0 : i32
    %c0_i32_0 = arith.constant 0 : i32
    return %c0_i32, %arg2 : i32, i32
  }
  func.func @transform_4(%arg0: i32, %arg1: i32, %arg2: i32) -> (i32, i32, i32) {
    %c0_i32 = arith.constant 0 : i32
    return %arg0, %arg1, %arg2 : i32, i32, i32
  }
}

</mosaic_0001>

<bundles_post_ra>
// kernel: _lambda_.2
= control target key start
LH: loop header
LB: loop body
LE: loop exit
PB: predicated region body
PF: predicated region fallthrough
CT: control target
= control target key end

     0   :  { %s7632_s15 = smov 0   ;;  %s7634_s16 = smov 0   ;;  %s8876_s0 = inlined_call_operand.vmem [shape: bf16[2,384,128], index: 0, kind: input, shape index: {}]   ;;  %s8877_s1 = inlined_call_operand.vmem [shape: bf16[1152,128], index: 1, kind: input, shape index: {}]   ;;  %s8878_s2 = inlined_call_operand.vmem [shape: f32[1,128], index: 2, kind: input, shape index: {}]   ;;  %s8879_s3 = inlined_call_operand.vmem [shape: f32[1,128], index: 3, kind: input, shape index: {}]   ;;  %s8880_s4 = inlined_call_operand.vmem [shape: bf16[2,384,128], index: 4, kind: output, shape index: {}]  }
   0x1   :  { %s7636_s17 = smov 0  }
   0x2 LB: > { %s33_s18 = sadd.s32 1, %s7599_s16  ;;  %p5886_p0 = scmp.ge.s32.totalorder %s7603_s17, 1  ;;  %s7603_s17 = sphi %s7636_s17, %s14_s17   ;;  %s7599_s16 = sphi %s7634_s16, %s8948_s16   ;;  %s7595_s15 = sphi %s7632_s15, %s8947_s15  }
   0x3   : > { %p35_p1 = scmp.ge.s32.totalorder %s33_s18, 2  ;;  %p167_p2 = scmp.lt.s32.totalorder %s7603_s17, 3 }
   0x5   : > { %s8950_s18 = smov (%p35_p1, %s33_s18), 0  ;;  %p168_p3 = pnand %p5886_p0, %p167_p2 }
   0x7   : > { %171 = sbr.rel (%p168_p3) target bundleno = 1079 (0x437), region = 32 }
   0xc   : > { %p206_p4 = scmp.lt.s32.totalorder %s7595_s15, 1  ;;  %v7605_v0 = vmov 0   ;;  %s6545_s20 = smul.u32 192, %s7595_s15 }
   0xd   : > { %241 = vst [vmem:[#allocation2 + $0x8] sm:$0xf] %v7605_v0 }
   0xe   : > { %s207_s19 = scalar_select %p206_p4, %s7595_s15, 1  ;;  %242 = vst [vmem:[#allocation2 + $0xe4] sm:$0xf] %v7605_v0 }
   0xf   : > { %s7658_s27 = scalar_lea.vmem %s8876_s0, %s6545_s20 }
  0x10   : > { %s7546_s21 = smul.u32 192, %s207_s19  ;;  %v277_v1 = vld [vmem:[%s7658_s27] sm:$0xff]  ;;  %v279_v2 = vld [vmem:[%s7658_s27 + $0x8] sm:$0xff]  ;;  %v281_v3 = vld [vmem:[%s7658_s27 + $0x10] sm:$0xff] }
  0x11   : > { %5889 = vst [vmem:[#allocation2 + $0x18] sm:$0xff] %v277_v1  ;;  %v283_v4 = vld [vmem:[%s7658_s27 + $0x18] sm:$0xff]  ;;  %v285_v5 = vld [vmem:[%s7658_s27 + $0x20] sm:$0xff]  ;;  %v287_v6 = vld [vmem:[%s7658_s27 + $0x28] sm:$0xff] }
  0x12   : > { %s7653_s24 = scalar_lea.vmem %s8880_s4, %s7546_s21  ;;  %5890 = vst [vmem:[#allocation2 + $0x20] sm:$0xff] %v279_v2  ;;  %v289_v7 = vld [vmem:[%s7658_s27 + $0x30] sm:$0xff]  ;;  %v291_v8 = vld [vmem:[%s7658_s27 + $0x38] sm:$0xff]  ;;  %v293_v9 = vld [vmem:[%s7658_s27 + $0x40] sm:$0xff] }
  0x13   : > { %5891 = vst [vmem:[#allocation2 + $0x28] sm:$0xff] %v281_v3  ;;  %v295_v10 = vld [vmem:[%s7658_s27 + $0x48] sm:$0xff]  ;;  %v297_v11 = vld [vmem:[%s7658_s27 + $0x50] sm:$0xff]  ;;  %v299_v12 = vld [vmem:[%s7658_s27 + $0x58] sm:$0xff] }
  0x14   : > { %5892 = vst [vmem:[#allocation2 + $0x30] sm:$0xff] %v283_v4  ;;  %v301_v13 = vld [vmem:[%s7658_s27 + $0x60] sm:$0xff]  ;;  %v303_v14 = vld [vmem:[%s7658_s27 + $0x68] sm:$0xff]  ;;  %v305_v15 = vld [vmem:[%s7658_s27 + $0x70] sm:$0xff] }
  0x15   : > { %5893 = vst [vmem:[#allocation2 + $0x38] sm:$0xff] %v285_v5  ;;  %v307_v16 = vld [vmem:[%s7658_s27 + $0x78] sm:$0xff]  ;;  %v309_v17 = vld [vmem:[%s7658_s27 + $0x80] sm:$0xff]  ;;  %v311_v18 = vld [vmem:[%s7658_s27 + $0x88] sm:$0xff] }
  0x16   : > { %5894 = vst [vmem:[#allocation2 + $0x40] sm:$0xff] %v287_v6  ;;  %v313_v19 = vld [vmem:[%s7658_s27 + $0x90] sm:$0xff]  ;;  %v315_v20 = vld [vmem:[%s7658_s27 + $0x98] sm:$0xff]  ;;  %v317_v21 = vld [vmem:[%s7658_s27 + $0xa0] sm:$0xff] }
  0x17   : > { %5895 = vst [vmem:[#allocation2 + $0x48] sm:$0xff] %v289_v7  ;;  %v319_v22 = vld [vmem:[%s7658_s27 + $0xa8] sm:$0xff]  ;;  %v321_v23 = vld [vmem:[%s7658_s27 + $0xb0] sm:$0xff]  ;;  %v323_v24 = vld [vmem:[%s7658_s27 + $0xb8] sm:$0xff] }
  0x18   : > { %5896 = vst [vmem:[#allocation2 + $0x50] sm:$0xff] %v291_v8 }
  0x19   : > { %5897 = vst [vmem:[#allocation2 + $0x58] sm:$0xff] %v293_v9 }
  0x1a   : > { %5898 = vst [vmem:[#allocation2 + $0x60] sm:$0xff] %v295_v10 }
  0x1b   : > { %5899 = vst [vmem:[#allocation2 + $0x68] sm:$0xff] %v297_v11 }
  0x1c   : > { %5900 = vst [vmem:[#allocation2 + $0x70] sm:$0xff] %v299_v12 }
  0x1d   : > { %5901 = vst [vmem:[#allocation2 + $0x78] sm:$0xff] %v301_v13 }
  0x1e   : > { %5902 = vst [vmem:[#allocation2 + $0x80] sm:$0xff] %v303_v14 }
  0x1f   : > { %5903 = vst [vmem:[#allocation2 + $0x88] sm:$0xff] %v305_v15 }
  0x20   : > { %5904 = vst [vmem:[#allocation2 + $0x90] sm:$0xff] %v307_v16 }
  0x21   : > { %5905 = vst [vmem:[#allocation2 + $0x98] sm:$0xff] %v309_v17 }
  0x22   : > { %5906 = vst [vmem:[#allocation2 + $0xa0] sm:$0xff] %v311_v18 }
  0x23   : > { %5907 = vst [vmem:[#allocation2 + $0xa8] sm:$0xff] %v313_v19 }
  0x24   : > { %5908 = vst [vmem:[#allocation2 + $0xb0] sm:$0xff] %v315_v20 }
  0x25   : > { %5909 = vst [vmem:[#allocation2 + $0xb8] sm:$0xff] %v317_v21 }
  0x26   : > { %5910 = vst [vmem:[#allocation2 + $0xc0] sm:$0xff] %v319_v22 }
  0x27   : > { %5911 = vst [vmem:[#allocation2 + $0xc8] sm:$0xff] %v321_v23 }
  0x28   : > { %5912 = vst [vmem:[#allocation2 + $0xd0] sm:$0xff] %v323_v24 }
  0x29   : > { %330 = vsyncadd [#allocation3], 3072 }
  0x2a   : > { %7591 = dma.done.wait [#allocation3], 3072 }
  0x2b   : > { %7592 = vsyncadd [#allocation3], 4294964224  ;;  %441 = vst [vmem:[#allocation2 + $0xc] sm:$0xf] %v7605_v0  ;;  %v6569_v25 = vld [vmem:[%s8877_s1 + $0x78] sm:$0xff]  ;;  %v6568_v26 = vld [vmem:[%s8877_s1 + $0x70] sm:$0xff] }
  0x2c   : > { %442 = vst [vmem:[#allocation2 + $0x10] sm:$0xf] %v7605_v0  ;;  %7431 = vmatpush.bf16.msra.mxu1 %v6569_v25  ;;  %7432 = vmatpush.bf16.msra.mxu2 %v6569_v25  ;;  %v6567_v27 = vld [vmem:[%s8877_s1 + $0x68] sm:$0xff]  ;;  %v6566_v28 = vld [vmem:[%s8877_s1 + $0x60] sm:$0xff]  ;;  %v6565_v29 = vld [vmem:[%s8877_s1 + $0x58] sm:$0xff]  ;;  %vm7606_vm4 = vmmov 1  }
  0x2d   : > { %443 = vst [vmem:[#allocation2 + $0x14] sm:$0xf] %v7605_v0  ;;  %7433 = vmatpush.bf16.msra.mxu3 %v6569_v25  ;;  %912 = vmatpush.bf16.msra.mxu0 %v6569_v25  ;;  %v6564_v30 = vld [vmem:[%s8877_s1 + $0x50] sm:$0xff]  ;;  %v6563_v31 = vld [vmem:[%s8877_s1 + $0x48] sm:$0xff]  ;;  %v6562_v34 = vld [vmem:[%s8877_s1 + $0x40] sm:$0xff] }
  0x2e   : > { %460 = vst [vmem:[#allocation2 + $0xd8] sm:$0xf] %v7605_v0  ;;  %v6601_v37 = vld [vmem:[%s8877_s1 + $0xb8] sm:$0xff]  ;;  %v7479_v40 = vld [vmem:[#allocation2 + $0x6c] sm:$0xff]   ;;  %v6598_v53 = vld [vmem:[%s8877_s1 + $0xa0] sm:$0xff] }
  0x2f   : > { %461 = vst [vmem:[#allocation2 + $0xdc] sm:$0xf] %v7605_v0  ;;  %v6609_v38 = vld [vmem:[%s8877_s1 + $0xf8] sm:$0xff]  ;;  %v6600_v45 = vld [vmem:[%s8877_s1 + $0xb0] sm:$0xff]  ;;  %v6599_v49 = vld [vmem:[%s8877_s1 + $0xa8] sm:$0xff] }
  0x30   : > { %462 = vst [vmem:[#allocation2 + $0xe0] sm:$0xf] %v7605_v0  ;;  %7434 = vmatpush.bf16.msra.mxu1 %v6568_v26  ;;  %7435 = vmatpush.bf16.msra.mxu2 %v6568_v26  ;;  %v7467_v39 = vld [vmem:[#allocation2 + $0x3c] sm:$0xff]   ;;  %v6608_v46 = vld [vmem:[%s8877_s1 + $0xf0] sm:$0xff]  ;;  %v6607_v50 = vld [vmem:[%s8877_s1 + $0xe8] sm:$0xff] }
  0x31   : > { %7436 = vmatpush.bf16.msra.mxu3 %v6568_v26  ;;  %913 = vmatpush.bf16.msra.mxu0 %v6568_v26  ;;  %v7491_v41 = vld [vmem:[#allocation2 + $0x9c] sm:$0xff]   ;;  %v6560_v47 = vld [vmem:[%s8877_s1 + $0x30] sm:$0xff]  ;;  %v6559_v51 = vld [vmem:[%s8877_s1 + $0x28] sm:$0xff]  ;;  %vm1068_vm0 = vsmask.f32 4352 }
  0x32   : > { %v7705_v32 = vld [vmem:[#allocation2 + $0xc] sm:$0xf]  ;;  %v6561_v43 = vld [vmem:[%s8877_s1 + $0x38] sm:$0xff]  ;;  %v6616_v48 = vld [vmem:[%s8877_s1 + $0x130] sm:$0xff]  ;;  %vm1682_vm1 = vsmask.f32 7424 }
  0x33   : > { %v768_v36 = vunpack.c.l.b16 %v7705_v32  ;;  %v6617_v44 = vld [vmem:[%s8877_s1 + $0x138] sm:$0xff]  ;;  %v6615_v52 = vld [vmem:[%s8877_s1 + $0x128] sm:$0xff]  ;;  %v6606_v54 = vld [vmem:[%s8877_s1 + $0xe0] sm:$0xff] }
  0x34   : > { %7437 = vmatpush.bf16.msra.mxu1 %v6567_v27  ;;  %7438 = vmatpush.bf16.msra.mxu2 %v6567_v27  ;;  %v7707_v33 = vld [vmem:[#allocation2 + $0x10] sm:$0xff]   ;;  %v6558_v55 = vld [vmem:[%s8877_s1 + $0x20] sm:$0xff]  ;;  %v6597_v61 = vld [vmem:[%s8877_s1 + $0x98] sm:$0xff] }
  0x35   : > { %7439 = vmatpush.bf16.msra.mxu3 %v6567_v27  ;;  %914 = vmatpush.bf16.msra.mxu0 %v6567_v27  ;;  %v6700_v35 = vunpack.c.l.b16 %v7707_v33  ;;  %v6614_v56 = vld [vmem:[%s8877_s1 + $0x120] sm:$0xff]  ;;  %v7481_v58 = vld [vmem:[#allocation2 + $0x74] sm:$0xff]   ;;  %v7471_v3 = vld [vmem:[#allocation2 + $0x4c] sm:$0xff]   ;;  %v1078_v21 = vshrl.u32 %v7707_v33, 16  ;;  %v1081_v24 = vshll.u32 %v7707_v33, 16 }
  0x36   : > { %v7469_v57 = vld [vmem:[#allocation2 + $0x44] sm:$0xff]   ;;  %v7457_v60 = vld [vmem:[#allocation2 + $0x14] sm:$0xff]   ;;  %v7483_v4 = vld [vmem:[#allocation2 + $0x7c] sm:$0xff]  }
  0x37   : > { %v816_v42 = vpack.c.b16 %v6700_v35, %v768_v36  ;;  %v7493_v59 = vld [vmem:[#allocation2 + $0xa4] sm:$0xff]   ;;  %v6605_v62 = vld [vmem:[%s8877_s1 + $0xd8] sm:$0xff]  ;;  %v6596_v1 = vld [vmem:[%s8877_s1 + $0x90] sm:$0xff]  ;;  %v1083_v32 = vrot.slane %v1081_v24, 4 }
  0x38   : > { %7440 = vmatpush.bf16.msra.mxu1 %v6566_v28  ;;  %7441 = vmatpush.bf16.msra.mxu2 %v6566_v28  ;;  %v6557_v63 = vld [vmem:[%s8877_s1 + $0x18] sm:$0xff]  ;;  %v6604_v2 = vld [vmem:[%s8877_s1 + $0xd0] sm:$0xff]  ;;  %v639_v7 = vld [vmem:[#allocation2 + $0x8] sm:$0x8] }
  0x39   : > { %7442 = vmatpush.bf16.msra.mxu3 %v6566_v28  ;;  %915 = vmatpush.bf16.msra.mxu0 %v6566_v28  ;;  %v6613_v0 = vld [vmem:[%s8877_s1 + $0x118] sm:$0xff]  ;;  %v7495_v5 = vld [vmem:[#allocation2 + $0xac] sm:$0xff]   ;;  %v1042_v12 = vunpack.c.l.b16 %v639_v7  ;;  %v7485_v18 = vld [vmem:[#allocation2 + $0x84] sm:$0xff]  }
  0x3a   : > { %v7459_v6 = vld [vmem:[#allocation2 + $0x1c] sm:$0xff]   ;;  %v6556_v8 = vld [vmem:[%s8877_s1 + $0x10] sm:$0xff]  ;;  %v6595_v10 = vld [vmem:[%s8877_s1 + $0x88] sm:$0xff] }
  0x3b   : > { %v6612_v9 = vld [vmem:[%s8877_s1 + $0x110] sm:$0xff]  ;;  %v6603_v11 = vld [vmem:[%s8877_s1 + $0xc8] sm:$0xff]  ;;  %v1043_v14 = vpack.c.b16 %v768_v36, %v1042_v12  ;;  %v6594_v26 = vld [vmem:[%s8877_s1 + $0x80] sm:$0xff] }
  0x3c   : > { %7443 = vmatpush.bf16.msra.mxu1 %v6565_v29  ;;  %7444 = vmatpush.bf16.msra.mxu2 %v6565_v29  ;;  %v6555_v13 = vld [vmem:[%s8877_s1 + $0x8] sm:$0xff]  ;;  %v7473_v17 = vld [vmem:[#allocation2 + $0x54] sm:$0xff]   ;;  %v6602_v27 = vld [vmem:[%s8877_s1 + $0xc0] sm:$0xff] }
  0x3d   : > { %7445 = vmatpush.bf16.msra.mxu3 %v6565_v29  ;;  %916 = vmatpush.bf16.msra.mxu0 %v6565_v29  ;;  %v1070_v15 = vshrl.u32 %v1043_v14, 16  ;;  %v1073_v16 = vshll.u32 %v1043_v14, 16  ;;  %v7497_v19 = vld [vmem:[#allocation2 + $0xb4] sm:$0xff]   ;;  %v7461_v20 = vld [vmem:[#allocation2 + $0x24] sm:$0xff]   ;;  %v1080_v29 = vrot.slane %v1078_v21, 3  ;;  %v7475_v35 = vld [vmem:[#allocation2 + $0x5c] sm:$0xff]  }
  0x3e   : > { %v6611_v25 = vld [vmem:[%s8877_s1 + $0x108] sm:$0xff]  ;;  %v6554_v28 = vld [vmem:[%s8877_s1] sm:$0xff]  ;;  %vm8366_vm5 = vmpackc.low %vm7606_vm4, %vm7606_vm4 }
  0x3f   : > { %v1072_v22 = vrot.slane %v1070_v15, 3  ;;  %v1075_v23 = vrot.slane %v1073_v16, 4  ;;  %v7816_v33 = vor.u32 %v1083_v32, %v1080_v29  ;;  %v7487_v36 = vld [vmem:[#allocation2 + $0x8c] sm:$0xff]   ;;  %v7504_v12 = vld [vmem:[#allocation2 + $0x24] sm:$0xff]   ;;  %v6572_v15 = vld [vmem:[#allocation2 + $0x1c] sm:$0xff] }
  0x40   : > { %7446 = vmatpush.bf16.msra.mxu1 %v6564_v30  ;;  %7447 = vmatpush.bf16.msra.mxu2 %v6564_v30  ;;  %v2334_v16 = vshrl.u32 %v7504_v12, 16  ;;  %v1699_v21 = vshll.u32 %v6572_v15, 16  ;;  %v7506_v32 = vld [vmem:[#allocation2 + $0x2c] sm:$0xff]  }
  0x41   : > { %7448 = vmatpush.bf16.msra.mxu3 %v6564_v30  ;;  %917 = vmatpush.bf16.msra.mxu0 %v6564_v30  ;;  %v6610_v30 = vld [vmem:[%s8877_s1 + $0x100] sm:$0xff] }
  0x44   : > { %7449 = vmatpush.bf16.msra.mxu1 %v6563_v31  ;;  %7450 = vmatpush.bf16.msra.mxu2 %v6563_v31 }
  0x45   : > { %7451 = vmatpush.bf16.msra.mxu3 %v6563_v31  ;;  %918 = vmatpush.bf16.msra.mxu0 %v6563_v31  ;;  %v1076_v31 = vor.u32 %v1075_v23, %v1072_v22  ;;  %v2336_v22 = vrot.slane %v2334_v16, 3 }
  0x48   : > { %7452 = vmatpush.bf16.msra.mxu1 %v6562_v34  ;;  %7453 = vmatpush.bf16.msra.mxu2 %v6562_v34 }
  0x49   : > { %7454 = vmatpush.bf16.msra.mxu3 %v6562_v34  ;;  %919 = vmatpush.bf16.msra.mxu0 %v6562_v34  ;;  %v1085_v34 = vsel %vm1068_vm0, %v1076_v31, %v7816_v33  ;;  %v7002_v31 = vld [vmem:[#allocation2 + $0x20] sm:$0xff]  }
  0x4b   : > { %950 = vmatmul.bf16.vlgmr.msra.gmra.mxu1 %v7467_v39  ;;  %980 = vmatmul.bf16.vlgmr.msra.gmra.mxu2 %v7479_v40  ;;  %v6657_v39 = vld [vmem:[%s8877_s1 + $0x1b8] sm:$0xff] }
  0x4c   : > { %1951 = vmatpush.bf16.msrb.mxu2 %v6601_v37  ;;  %1010 = vmatmul.bf16.vlgmr.msra.gmra.mxu3 %v7491_v41  ;;  %v7498_v37 = vld [vmem:[#allocation2 + $0xbc] sm:$0xff]  }
  0x4d   : > { %2612 = vmatpush.bf16.msrb.mxu3 %v6609_v38  ;;  %920 = vmatmul.bf16.vlgmr.msra.gmra.mxu0 %v816_v42  ;;  %v7463_v38 = vld [vmem:[#allocation2 + $0x2c] sm:$0xff]   ;;  %v6665_v40 = vld [vmem:[%s8877_s1 + $0x1f8] sm:$0xff] }
  0x4e   : > { %1365 = vmatpush.bf16.msrb.mxu1 %v6561_v43  ;;  %2901 = vmatpush.bf16.msrb.mxu0 %v6617_v44  ;;  %v6649_v41 = vld [vmem:[%s8877_s1 + $0x178] sm:$0xff]  ;;  %v7000_v43 = vld [vmem:[#allocation2 + $0xc0] sm:$0xff]   ;;  %v687_v44 = vld [vmem:[#allocation2 + $0xc8] sm:$0xf] }
  0x4f   : > { %v6697_v42 = vld [vmem:[%s8877_s1 + $0x238] sm:$0xff] }
  0x50   : > { %1952 = vmatpush.bf16.msrb.mxu2 %v6600_v45  ;;  %v6789_v45 = vunpack.c.h.b16 %v7000_v43  ;;  %v1703_v43 = vshrl.u32 %v6572_v15, 16 }
  0x51   : > { %2613 = vmatpush.bf16.msrb.mxu3 %v6608_v46  ;;  %v7832_v46 = vunpack.c.l.b16 %v687_v44 }
  0x52   : > { %1366 = vmatpush.bf16.msrb.mxu1 %v6560_v47  ;;  %2902 = vmatpush.bf16.msrb.mxu0 %v6616_v48  ;;  %v7270_v47 = vld [vmem:[#allocation2 + $0x14] sm:$0x8]  ;;  %v7500_v48 = vld [vmem:[#allocation2 + $0x14] sm:$0xf0]  }
  0x54   : > { %1953 = vmatpush.bf16.msrb.mxu2 %v6599_v49  ;;  %v7477_v49 = vld [vmem:[#allocation2 + $0x64] sm:$0xff]  }
  0x55   : > { %2614 = vmatpush.bf16.msrb.mxu3 %v6607_v50  ;;  %v7489_v50 = vld [vmem:[#allocation2 + $0x94] sm:$0xff]  }
  0x56   : > { %1367 = vmatpush.bf16.msrb.mxu1 %v6559_v51  ;;  %2903 = vmatpush.bf16.msrb.mxu0 %v6615_v52  ;;  %v839_v51 = vpack.c.b16 %v7832_v46, %v6789_v45  ;;  %v7465_v52 = vld [vmem:[#allocation2 + $0x34] sm:$0xff]  }
  0x58   : > { %1954 = vmatpush.bf16.msrb.mxu2 %v6598_v53  ;;  %v6570_v53 = vld [vmem:[#allocation2 + $0xc] sm:$0xff] }
  0x59   : > { %2615 = vmatpush.bf16.msrb.mxu3 %v6606_v54  ;;  %v7502_v54 = vld [vmem:[#allocation2 + $0x1c] sm:$0xff]  }
  0x5a   : > { %1368 = vmatpush.bf16.msrb.mxu1 %v6558_v55  ;;  %2904 = vmatpush.bf16.msrb.mxu0 %v6614_v56  ;;  %v7271_v55 = vor.u32 %v7500_v48, %v7270_v47  ;;  %v6571_v56 = vld [vmem:[#allocation2 + $0x14] sm:$0xff] }
  0x5b   : > { %955 = vmatmul.bf16.gmra.mxu1 %v7469_v57  ;;  %985 = vmatmul.bf16.gmra.mxu2 %v7481_v58  ;;  %v1686_v57 = vshll.u32 %v6570_v53, 16  ;;  %v6696_v48 = vld [vmem:[%s8877_s1 + $0x230] sm:$0xff] }
  0x5c   : > { %1015 = vmatmul.bf16.gmra.mxu3 %v7493_v59  ;;  %1955 = vmatpush.bf16.msrb.mxu2 %v6597_v61  ;;  %v2317_v58 = vshrl.u32 %v7271_v55, 16  ;;  %v2320_v59 = vshll.u32 %v7271_v55, 16  ;;  %v2328_v61 = vshll.u32 %v7502_v54, 16 }
  0x5d   : > { %925 = vmatmul.bf16.gmra.mxu0 %v7457_v60  ;;  %2616 = vmatpush.bf16.msrb.mxu3 %v6605_v62  ;;  %v2325_v60 = vshrl.u32 %v7502_v54, 16  ;;  %v1684_v62 = vshrl.u32 %v6570_v53, 16 }
  0x5e   : > { %1369 = vmatpush.bf16.msrb.mxu1 %v6557_v63  ;;  %2905 = vmatpush.bf16.msrb.mxu0 %v6613_v0  ;;  %v1688_v63 = vrot.slane %v1686_v57, 1  ;;  %v1691_v0 = vshll.u32 %v6571_v56, 16 }
  0x60   : > { %1956 = vmatpush.bf16.msrb.mxu2 %v6596_v1  ;;  %v2319_v1 = vrot.slane %v2317_v58, 3  ;;  %v7003_v58 = vld [vmem:[#allocation2 + $0x28] sm:$0xff]  }
  0x61   : > { %2617 = vmatpush.bf16.msrb.mxu3 %v6604_v2  ;;  %v2322_v2 = vrot.slane %v2320_v59, 4  ;;  %v7508_v59 = vld [vmem:[#allocation2 + $0x34] sm:$0xff]  }
  0x62   : > { %1370 = vmatpush.bf16.msrb.mxu1 %v6556_v8  ;;  %2906 = vmatpush.bf16.msrb.mxu0 %v6612_v9 }
  0x63   : > { %v2323_v7 = vor.u32 %v2322_v2, %v2319_v1 }
  0x64   : > { %1957 = vmatpush.bf16.msrb.mxu2 %v6595_v10 }
  0x65   : > { %2618 = vmatpush.bf16.msrb.mxu3 %v6603_v11  ;;  %v7001_v11 = vld [vmem:[#allocation2 + $0x18] sm:$0xff]  }
  0x66   : > { %1371 = vmatpush.bf16.msrb.mxu1 %v6555_v13  ;;  %2907 = vmatpush.bf16.msrb.mxu0 %v6611_v25  ;;  %v1087_v13 = vshrl.u32 %v7001_v11, 16  ;;  %v1090_v14 = vshll.u32 %v7001_v11, 16 }
  0x68   : > { %1958 = vmatpush.bf16.msrb.mxu2 %v6594_v26  ;;  %v1701_v26 = vrot.slane %v1699_v21, 1 }
  0x69   : > { %2619 = vmatpush.bf16.msrb.mxu3 %v6602_v27 }
  0x6a   : > { %1372 = vmatpush.bf16.msrb.mxu1 %v6554_v28  ;;  %2908 = vmatpush.bf16.msrb.mxu0 %v6610_v30 }
  0x6b   : > { %960 = vmatmul.bf16.gmra.mxu1 %v7471_v3  ;;  %990 = vmatmul.bf16.gmra.mxu2 %v7483_v4  ;;  %v2327_v3 = vrot.slane %v2325_v60, 3  ;;  %v2330_v4 = vrot.slane %v2328_v61, 4  ;;  %v1105_v60 = vshrl.u32 %v7003_v58, 16  ;;  %v1108_v61 = vshll.u32 %v7003_v58, 16 }
  0x6c   : > { %1020 = vmatmul.bf16.gmra.mxu3 %v7495_v5  ;;  %4195 = vmatpush.bf16.msra.mxu2 %v6657_v39  ;;  %v1689_v5 = vor.u32 %v1688_v63, %v1684_v62  ;;  %v2346_v39 = vshll.u32 %v7506_v32, 16  ;;  %v6574_v62 = vld [vmem:[#allocation2 + $0x2c] sm:$0xff]  ;;  %v2352_v63 = vshrl.u32 %v7508_v59, 16 }
  0x6d   : > { %930 = vmatmul.bf16.gmra.mxu0 %v7459_v6  ;;  %4484 = vmatpush.bf16.msra.mxu3 %v6665_v40  ;;  %v1693_v6 = vrot.slane %v1691_v0, 1  ;;  %v2331_v8 = vor.u32 %v2330_v4, %v2327_v3  ;;  %v6648_v40 = vld [vmem:[%s8877_s1 + $0x170] sm:$0xff]  ;;  %v2355_v0 = vshll.u32 %v7508_v59, 16  ;;  %v1107_v4 = vrot.slane %v1105_v60, 3  ;;  %v6663_v59 = vld [vmem:[%s8877_s1 + $0x1e8] sm:$0xff] }
  0x6e   : > { %3534 = vmatpush.bf16.msra.mxu1 %v6649_v41  ;;  %5117 = vmatpush.bf16.msra.mxu0 %v6697_v42  ;;  %v2348_v47 = vrot.slane %v2346_v39, 4 }
  0x6f   : > { %v1694_v9 = vsel %vm1682_vm1, %v1689_v5, %v1693_v6  ;;  %v2332_v10 = vsel %vm1068_vm0, %v2323_v7, %v2331_v8  ;;  %v1110_v5 = vrot.slane %v1108_v61, 4  ;;  %v1715_v7 = vshll.u32 %v6574_v62, 16 }
  0x72   : > { %3535 = vmatpush.bf16.msra.mxu1 %v6648_v40  ;;  %5118 = vmatpush.bf16.msra.mxu0 %v6696_v48 }
  0x7b   : > { %965 = vmatmul.bf16.gmra.mxu1 %v7473_v17  ;;  %995 = vmatmul.bf16.gmra.mxu2 %v7485_v18  ;;  %v2337_v17 = vshll.u32 %v7504_v12, 16  ;;  %v1089_v18 = vrot.slane %v1087_v13, 3  ;;  %v1717_v13 = vrot.slane %v1715_v7, 1 }
  0x7c   : > { %1025 = vmatmul.bf16.gmra.mxu3 %v7497_v19  ;;  %v1092_v19 = vrot.slane %v1090_v14, 4 }
  0x7d   : > { %935 = vmatmul.bf16.gmra.mxu0 %v7461_v20  ;;  %v1695_v20 = vshrl.u32 %v6571_v56, 16  ;;  %v2339_v23 = vrot.slane %v2337_v17, 4 }
  0x7e   : > { %v1093_v24 = vor.u32 %v1092_v19, %v1089_v18 }
  0x7f   : > { %v1697_v25 = vor.u32 %v1695_v20, %v1693_v6  ;;  %v2340_v27 = vor.u32 %v2339_v23, %v2336_v22  ;;  %v7004_v22 = vld [vmem:[#allocation2 + $0x30] sm:$0xff]   ;;  %v7510_v23 = vld [vmem:[#allocation2 + $0x3c] sm:$0xff]  }
  0x80   : > { %v1094_v28 = vsel %vm1068_vm0, %v7816_v33, %v1093_v24  ;;  %v6664_v33 = vld [vmem:[%s8877_s1 + $0x1f0] sm:$0xff] }
  0x81   : > { %v1702_v29 = vsel %vm1682_vm1, %v1697_v25, %v1701_v26  ;;  %v2341_v30 = vsel %vm1068_vm0, %v2331_v8, %v2340_v27  ;;  %4485 = vmatpush.bf16.msra.mxu3 %v6664_v33  ;;  %v1117_v25 = vshll.u32 %v7004_v22, 16 }
  0x85   : > { %4486 = vmatpush.bf16.msra.mxu3 %v6663_v59 }
  0x8b   : > { %970 = vmatmul.bf16.gmra.mxu1 %v7475_v35  ;;  %1000 = vmatmul.bf16.gmra.mxu2 %v7487_v36  ;;  %v1099_v35 = vshll.u32 %v7002_v31, 16  ;;  %v6573_v36 = vld [vmem:[#allocation2 + $0x24] sm:$0xff] }
  0x8c   : > { %1030 = vmatmul.bf16.gmra.mxu3 %v7498_v37  ;;  %v6656_v37 = vld [vmem:[%s8877_s1 + $0x1b0] sm:$0xff]  ;;  %v1707_v44 = vshll.u32 %v6573_v36, 16  ;;  %v1711_v6 = vshrl.u32 %v6573_v36, 16 }
  0x8d   : > { %940 = vmatmul.bf16.gmra.mxu0 %v7463_v38  ;;  %v2343_v38 = vshrl.u32 %v7506_v32, 16  ;;  %4196 = vmatpush.bf16.msra.mxu2 %v6656_v37  ;;  %v1101_v42 = vrot.slane %v1099_v35, 4  ;;  %v1719_v35 = vshrl.u32 %v6574_v62, 16 }
  0x8f   : > { %v2345_v45 = vrot.slane %v2343_v38, 3  ;;  %v1721_v40 = vor.u32 %v1719_v35, %v1717_v13 }
  0x9b   : > { %975 = vmatmul.bf16.gmra.mxu1 %v7477_v49  ;;  %1005 = vmatmul.bf16.gmra.mxu2 %v7489_v50  ;;  %v1705_v50 = vor.u32 %v1703_v43, %v1701_v26  ;;  %v6575_v26 = vld [vmem:[#allocation2 + $0x34] sm:$0xff] }
  0x9c   : > { %1035 = vmatmul.bf16.gmra.mxu3 %v839_v51  ;;  %v1709_v51 = vrot.slane %v1707_v44, 1  ;;  %v1723_v36 = vshll.u32 %v6575_v26, 16  ;;  %v1727_v7 = vshrl.u32 %v6575_v26, 16 }
  0x9d   : > { %945 = vmatmul.bf16.gmra.mxu0 %v7465_v52  ;;  %v2349_v52 = vor.u32 %v2348_v47, %v2345_v45 }
  0x9e   : > { %v1710_v55 = vsel %vm1682_vm1, %v1705_v50, %v1709_v51  ;;  %v1713_v12 = vor.u32 %v1711_v6, %v1709_v51  ;;  %v7005_v51 = vld [vmem:[#allocation2 + $0x38] sm:$0xff]  }
  0x9f   : > { %v2350_v57 = vsel %vm1068_vm0, %v2340_v27, %v2349_v52  ;;  %v2361_v27 = vshrl.u32 %v7510_v23, 16 }
  0xa0   : > { %v1718_v19 = vsel %vm1682_vm1, %v1713_v12, %v1717_v13  ;;  %v6695_v13 = vld [vmem:[%s8877_s1 + $0x228] sm:$0xff] }
  0xa1   : > { %v2363_v33 = vrot.slane %v2361_v27, 3  ;;  %5119 = vmatpush.bf16.msra.mxu0 %v6695_v13  ;;  %v7516_v13 = vld [vmem:[#allocation2 + $0x54] sm:$0xff]  }
  0xab   : > { %1373 = vmatmul.bf16.vlgmr.msrb.gmra.mxu1 %v1085_v34  ;;  %1959 = vmatmul.bf16.vlgmr.msrb.gmra.mxu2 %v1694_v9  ;;  %v1096_v34 = vshrl.u32 %v7002_v31, 16  ;;  %v2354_v9 = vrot.slane %v2352_v63, 3 }
  0xac   : > { %2620 = vmatmul.bf16.vlgmr.msrb.gmra.mxu3 %v2332_v10  ;;  %v2357_v10 = vrot.slane %v2355_v0, 4  ;;  %v6647_v0 = vld [vmem:[%s8877_s1 + $0x168] sm:$0xff] }
  0xad   : > { %2909 = vmatmul.bf16.vlgmr.msrb.gmra.mxu0 %v7001_v11  ;;  %v1098_v41 = vrot.slane %v1096_v34, 3  ;;  %v1111_v11 = vor.u32 %v1110_v5, %v1107_v4  ;;  %v1119_v34 = vrot.slane %v1117_v25, 4  ;;  %3536 = vmatpush.bf16.msra.mxu1 %v6647_v0 }
  0xae   : > { %v2358_v14 = vor.u32 %v2357_v10, %v2354_v9 }
  0xaf   : > { %v1102_v49 = vor.u32 %v1101_v42, %v1098_v41  ;;  %v1725_v41 = vrot.slane %v1723_v36, 1 }
  0xb0   : > { %v2359_v21 = vsel %vm1068_vm0, %v2349_v52, %v2358_v14  ;;  %v7512_v52 = vld [vmem:[#allocation2 + $0x44] sm:$0xff]  }
  0xb1   : > { %v1103_v54 = vsel %vm1068_vm0, %v1093_v24, %v1102_v49  ;;  %v1112_v18 = vsel %vm1068_vm0, %v1102_v49, %v1111_v11  ;;  %v1114_v24 = vshrl.u32 %v7004_v22, 16  ;;  %v1726_v48 = vsel %vm1682_vm1, %v1721_v40, %v1725_v41 }
  0xb2   : > { %v2370_v60 = vshrl.u32 %v7512_v52, 16  ;;  %v2373_v61 = vshll.u32 %v7512_v52, 16 }
  0xb3   : > { %v1116_v32 = vrot.slane %v1114_v24, 3 }
  0xb4   : > { %v2375_v12 = vrot.slane %v2373_v61, 4 }
  0xb5   : > { %v1120_v39 = vor.u32 %v1119_v34, %v1116_v32  ;;  %v7006_v32 = vld [vmem:[#allocation2 + $0x40] sm:$0xff]   ;;  %v7514_v34 = vld [vmem:[#allocation2 + $0x4c] sm:$0xff]  }
  0xb6   : > { %v1132_v35 = vshrl.u32 %v7006_v32, 16  ;;  %v1135_v36 = vshll.u32 %v7006_v32, 16  ;;  %v2382_v40 = vshll.u32 %v7514_v34, 16 }
  0xb7   : > { %v1121_v47 = vsel %vm1068_vm0, %v1111_v11, %v1120_v39  ;;  %v2372_v11 = vrot.slane %v2370_v60, 3 }
  0xbb   : > { %1378 = vmatmul.bf16.gmra.mxu1 %v1094_v28  ;;  %1964 = vmatmul.bf16.gmra.mxu2 %v1702_v29  ;;  %v2364_v28 = vshll.u32 %v7510_v23, 16 }
  0xbc   : > { %2625 = vmatmul.bf16.gmra.mxu3 %v2341_v30 }
  0xbd   : > { %2914 = vmatmul.bf16.gmra.mxu0 %v7002_v31  ;;  %v2366_v38 = vrot.slane %v2364_v28, 4 }
  0xbf   : > { %v2367_v42 = vor.u32 %v2366_v38, %v2363_v33  ;;  %v6577_v33 = vld [vmem:[#allocation2 + $0x44] sm:$0xff]  ;;  %v2379_v38 = vshrl.u32 %v7514_v34, 16 }
  0xc1   : > { %v2368_v50 = vsel %vm1068_vm0, %v2358_v14, %v2367_v42 }
  0xc8   : > { %v7853_v53 = vpop.f32.mrf.mxu1 }
  0xca   : > { %v7857_v56 = vpop.f32.mrf.mxu0 }
  0xcb   : > { %1383 = vmatmul.bf16.gmra.mxu1 %v1103_v54  ;;  %1969 = vmatmul.bf16.gmra.mxu2 %v1710_v55  ;;  %v1123_v54 = vshrl.u32 %v7005_v51, 16  ;;  %v1126_v55 = vshll.u32 %v7005_v51, 16 }
  0xcc   : > { %2630 = vmatmul.bf16.gmra.mxu3 %v2350_v57  ;;  %v6576_v57 = vld [vmem:[#allocation2 + $0x3c] sm:$0xff] }
  0xcd   : > { %2919 = vmatmul.bf16.gmra.mxu0 %v7003_v58  ;;  %v6655_v58 = vld [vmem:[%s8877_s1 + $0x1a8] sm:$0xff]  ;;  %v1125_v5 = vrot.slane %v1123_v54, 3  ;;  %v1128_v6 = vrot.slane %v1126_v55, 4  ;;  %v1731_v9 = vshll.u32 %v6576_v57, 16  ;;  %v2381_v54 = vrot.slane %v2379_v38, 3 }
  0xce   : > { %v7860_v1 = vpop.f32.mrf.mxu2  ;;  %4197 = vmatpush.bf16.msra.mxu2 %v6655_v58  ;;  %v2384_v55 = vrot.slane %v2382_v40, 4 }
  0xcf   : > { %v7862_v2 = vpop.f32.mrf.mxu3  ;;  %v1129_v14 = vor.u32 %v1128_v6, %v1125_v5 }
  0xd0   : > { %8881 = vst [vmem:[#allocation11_spill] sm:$0xff] %v7862_v2  ;;  %v7864_v3 = vpop.f32.mrf.mxu1  ;;  %v2385_v61 = vor.u32 %v2384_v55, %v2381_v54 }
  0xd1   : > { %v1130_v25 = vsel %vm1068_vm0, %v1120_v39, %v1129_v14 }
  0xd2   : > { %v7866_v8 = vpop.f32.mrf.mxu0 }
  0xd6   : > { %v7868_v15 = vpop.f32.mrf.mxu2 }
  0xd7   : > { %v7870_v16 = vpop.f32.mrf.mxu3 }
  0xd8   : > { %8882 = vst [vmem:[#allocation12_spill] sm:$0xff] %v7870_v16  ;;  %v7872_v17 = vpop.f32.mrf.mxu1 }
  0xda   : > { %v7876_v20 = vpop.f32.mrf.mxu0 }
  0xdb   : > { %1388 = vmatmul.bf16.gmra.mxu1 %v1112_v18  ;;  %1974 = vmatmul.bf16.gmra.mxu2 %v1718_v19  ;;  %v1729_v18 = vor.u32 %v1727_v7, %v1725_v41  ;;  %v1733_v19 = vrot.slane %v1731_v9, 1 }
  0xdc   : > { %2635 = vmatmul.bf16.gmra.mxu3 %v2359_v21  ;;  %v2376_v21 = vor.u32 %v2375_v12, %v2372_v11  ;;  %v7007_v12 = vld [vmem:[#allocation2 + $0x48] sm:$0xff]  }
  0xdd   : > { %2924 = vmatmul.bf16.gmra.mxu0 %v7004_v22  ;;  %v1734_v26 = vsel %vm1682_vm1, %v1729_v18, %v1733_v19  ;;  %v1141_v18 = vshrl.u32 %v7007_v12, 16 }
  0xde   : > { %v7879_v29 = vpop.f32.mrf.mxu2  ;;  %v2377_v28 = vsel %vm1068_vm0, %v2367_v42, %v2376_v21  ;;  %v1735_v42 = vshrl.u32 %v6576_v57, 16  ;;  %v2386_v11 = vsel %vm1068_vm0, %v2376_v21, %v2385_v61  ;;  %v1743_v21 = vshrl.u32 %v6577_v33, 16 }
  0xdf   : > { %v7881_v30 = vpop.f32.mrf.mxu3 }
  0xe0   : > { %8883 = vst [vmem:[#allocation13_spill] sm:$0xff] %v7881_v30  ;;  %v7883_v31 = vpop.f32.mrf.mxu1  ;;  %v1737_v59 = vor.u32 %v1735_v42, %v1733_v19  ;;  %v1144_v19 = vshll.u32 %v7007_v12, 16 }
  0xe2   : > { %v7885_v37 = vpop.f32.mrf.mxu0 }
  0xe6   : > { %v7887_v43 = vpop.f32.mrf.mxu2 }
  0xe7   : > { %v7889_v44 = vpop.f32.mrf.mxu3 }
  0xe8   : > { %8884 = vst [vmem:[#allocation14_spill] sm:$0xff] %v7889_v44  ;;  %v7891_v45 = vpop.f32.mrf.mxu1  ;;  %v7520_v44 = vld [vmem:[#allocation2 + $0x64] sm:$0xff]  }
  0xea   : > { %v7895_v49 = vpop.f32.mrf.mxu0 }
  0xeb   : > { %1393 = vmatmul.bf16.gmra.mxu1 %v1121_v47  ;;  %1979 = vmatmul.bf16.gmra.mxu2 %v1726_v48  ;;  %v1134_v48 = vrot.slane %v1132_v35, 3  ;;  %v1143_v35 = vrot.slane %v1141_v18, 3  ;;  %v7008_v18 = vld [vmem:[#allocation2 + $0x50] sm:$0xff]  }
  0xec   : > { %2640 = vmatmul.bf16.gmra.mxu3 %v2368_v50  ;;  %v1137_v50 = vrot.slane %v1135_v36, 4  ;;  %v1146_v36 = vrot.slane %v1144_v19, 4  ;;  %v7518_v19 = vld [vmem:[#allocation2 + $0x5c] sm:$0xff]  }
  0xed   : > { %2929 = vmatmul.bf16.gmra.mxu0 %v7005_v51  ;;  %v1739_v51 = vshll.u32 %v6577_v33, 16 }
  0xee   : > { %v7904_v62 = vpop.f32.mrf.mxu2  ;;  %v1138_v58 = vor.u32 %v1137_v50, %v1134_v48  ;;  %v1147_v42 = vor.u32 %v1146_v36, %v1143_v35  ;;  %v6654_v35 = vld [vmem:[%s8877_s1 + $0x1a0] sm:$0xff]  ;;  %v2397_v36 = vshrl.u32 %v7518_v19, 16 }
  0xef   : > { %v7906_v63 = vpop.f32.mrf.mxu3  ;;  %v1741_v60 = vrot.slane %v1739_v51, 1  ;;  %4198 = vmatpush.bf16.msra.mxu2 %v6654_v35  ;;  %v6694_v35 = vld [vmem:[%s8877_s1 + $0x220] sm:$0xff] }
  0xf0   : > { %8885 = vst [vmem:[#allocation15_spill] sm:$0xff] %v7906_v63  ;;  %v7911_v4 = vpop.f32.mrf.mxu1  ;;  %v1139_v7 = vsel %vm1068_vm0, %v1129_v14, %v1138_v58  ;;  %5120 = vmatpush.bf16.msra.mxu0 %v6694_v35  ;;  %v7009_v63 = vld [vmem:[#allocation2 + $0x58] sm:$0xff]  }
  0xf1   : > { %v1742_v9 = vsel %vm1682_vm1, %v1737_v59, %v1741_v60  ;;  %v1745_v51 = vor.u32 %v1743_v21, %v1741_v60  ;;  %v1150_v60 = vshrl.u32 %v7008_v18, 16  ;;  %v2400_v21 = vshll.u32 %v7518_v19, 16  ;;  %v6646_v19 = vld [vmem:[%s8877_s1 + $0x160] sm:$0xff] }
  0xf2   : > { %v7913_v10 = vpop.f32.mrf.mxu0  ;;  %3537 = vmatpush.bf16.msra.mxu1 %v6646_v19 }
  0xf6   : > { %v7918_v22 = vpop.f32.mrf.mxu2 }
  0xf7   : > { %v7920_v23 = vpop.f32.mrf.mxu3 }
  0xf8   : > { %8886 = vst [vmem:[#allocation16_spill] sm:$0xff] %v7920_v23  ;;  %v7922_v24 = vpop.f32.mrf.mxu1 }
  0xfa   : > { %v7926_v27 = vpop.f32.mrf.mxu0 }
  0xfb   : > { %1398 = vmatmul.bf16.gmra.mxu1 %v1130_v25  ;;  %1984 = vmatmul.bf16.gmra.mxu2 %v1734_v26  ;;  %v6578_v25 = vld [vmem:[#allocation2 + $0x4c] sm:$0xff]  ;;  %v2388_v26 = vshrl.u32 %v7516_v13, 16 }
  0xfc   : > { %2645 = vmatmul.bf16.gmra.mxu3 %v2377_v28  ;;  %v2391_v28 = vshll.u32 %v7516_v13, 16  ;;  %v1747_v38 = vshll.u32 %v6578_v25, 16 }
  0xfd   : > { %2934 = vmatmul.bf16.gmra.mxu0 %v7006_v32  ;;  %v2390_v48 = vrot.slane %v2388_v26, 3  ;;  %v1153_v26 = vshll.u32 %v7008_v18, 16 }
  0xfe   : > { %v7929_v41 = vpop.f32.mrf.mxu2  ;;  %v2393_v50 = vrot.slane %v2391_v28, 4  ;;  %v1749_v54 = vrot.slane %v1747_v38, 1  ;;  %v6579_v28 = vld [vmem:[#allocation2 + $0x54] sm:$0xff] }
  0xff   : > { %v7931_v39 = vpop.f32.mrf.mxu3 }
 0x100   : > { %8887 = vst [vmem:[#allocation17_spill] sm:$0xff] %v7931_v39  ;;  %v7933_v47 = vpop.f32.mrf.mxu1  ;;  %v2394_v55 = vor.u32 %v2393_v50, %v2390_v48  ;;  %v1152_v50 = vrot.slane %v1150_v60, 3 }
 0x102   : > { %v7935_v52 = vpop.f32.mrf.mxu0  ;;  %v2395_v13 = vsel %vm1068_vm0, %v2385_v61, %v2394_v55 }
 0x106   : > { %v7937_v0 = vpop.f32.mrf.mxu2 }
 0x107   : > { %v7939_v5 = vpop.f32.mrf.mxu3 }
 0x108   : > { %8888 = vst [vmem:[#allocation18_spill] sm:$0xff] %v7939_v5  ;;  %v7941_v6 = vpop.f32.mrf.mxu1 }
 0x10a   : > { %v7945_v57 = vpop.f32.mrf.mxu0 }
 0x10b   : > { %1403 = vmatmul.bf16.gmra.mxu1 %v1139_v7  ;;  %1989 = vmatmul.bf16.gmra.mxu2 %v1742_v9 }
 0x10c   : > { %2650 = vmatmul.bf16.gmra.mxu3 %v2386_v11  ;;  %v1148_v11 = vsel %vm1068_vm0, %v1138_v58, %v1147_v42  ;;  %v6662_v58 = vld [vmem:[%s8877_s1 + $0x1e0] sm:$0xff] }
 0x10d   : > { %2939 = vmatmul.bf16.gmra.mxu0 %v7007_v12  ;;  %v1750_v12 = vsel %vm1682_vm1, %v1745_v51, %v1749_v54  ;;  %4487 = vmatpush.bf16.msra.mxu3 %v6662_v58  ;;  %v1155_v51 = vrot.slane %v1153_v26, 4 }
 0x10e   : > { %v7948_v32 = vpop.f32.mrf.mxu2 }
 0x10f   : > { %v7950_v14 = vpop.f32.mrf.mxu3  ;;  %v1156_v58 = vor.u32 %v1155_v51, %v1152_v50  ;;  %v6580_v50 = vld [vmem:[#allocation2 + $0x5c] sm:$0xff] }
 0x110   : > { %8889 = vst [vmem:[#allocation19_spill] sm:$0xff] %v7950_v14  ;;  %v7952_v34 = vpop.f32.mrf.mxu1  ;;  %v1763_v30 = vshll.u32 %v6580_v50, 16 }
 0x112   : > { %v7954_v40 = vpop.f32.mrf.mxu0 }
 0x116   : > { %v7956_v59 = vpop.f32.mrf.mxu2 }
 0x117   : > { %8890 = vst [vmem:[#allocation20_spill] sm:$0xff] %v7956_v59  ;;  %v7958_v7 = vpop.f32.mrf.mxu3 }
 0x118   : > { %8891 = vst [vmem:[#allocation21_spill] sm:$0xff] %v7958_v7  ;;  %v7960_v9 = vpop.f32.mrf.mxu1  ;;  %v2402_v7 = vrot.slane %v2400_v21, 4  ;;  %v1157_v21 = vsel %vm1068_vm0, %v1147_v42, %v1156_v58 }
 0x11a   : > { %v7964_v33 = vpop.f32.mrf.mxu0 }
 0x11b   : > { %1408 = vmatmul.bf16.gmra.mxu1 %v1148_v11  ;;  %1994 = vmatmul.bf16.gmra.mxu2 %v1750_v12  ;;  %v1751_v11 = vshrl.u32 %v6578_v25, 16  ;;  %v1755_v12 = vshll.u32 %v6579_v28, 16 }
 0x11c   : > { %2655 = vmatmul.bf16.gmra.mxu3 %v2395_v13 }
 0x11d   : > { %2944 = vmatmul.bf16.gmra.mxu0 %v7008_v18  ;;  %v2399_v18 = vrot.slane %v2397_v36, 3  ;;  %v1757_v60 = vrot.slane %v1755_v12, 1  ;;  %v2409_v12 = vshll.u32 %v7520_v44, 16 }
 0x11e   : > { %v7973_v61 = vpop.f32.mrf.mxu2 }
 0x11f   : > { %8892 = vst [vmem:[#allocation22_spill] sm:$0xff] %v7973_v61  ;;  %v7975_v38 = vpop.f32.mrf.mxu3  ;;  %v2403_v26 = vor.u32 %v2402_v7, %v2399_v18  ;;  %v1162_v7 = vshll.u32 %v7009_v63, 16  ;;  %v1765_v61 = vrot.slane %v1763_v30, 1 }
 0x120   : > { %8893 = vst [vmem:[#allocation23_spill] sm:$0xff] %v7975_v38  ;;  %v7977_v48 = vpop.f32.mrf.mxu1  ;;  %v1753_v38 = vor.u32 %v1751_v11, %v1749_v54  ;;  %v1159_v54 = vshrl.u32 %v7009_v63, 16  ;;  %v2406_v11 = vshrl.u32 %v7520_v44, 16 }
 0x121   : > { %v2404_v23 = vsel %vm1068_vm0, %v2394_v55, %v2403_v26  ;;  %v1759_v55 = vshrl.u32 %v6579_v28, 16 }
 0x122   : > { %v7979_v13 = vpop.f32.mrf.mxu0  ;;  %v1758_v5 = vsel %vm1682_vm1, %v1753_v38, %v1757_v60  ;;  %v1161_v35 = vrot.slane %v1159_v54, 3 }
 0x126   : > { %v7987_v25 = vpop.f32.mrf.mxu2 }
 0x127   : > { %8894 = vst [vmem:[#allocation24_spill] sm:$0xff] %v7987_v25  ;;  %v7989_v14 = vpop.f32.mrf.mxu3  ;;  %v1761_v25 = vor.u32 %v1759_v55, %v1757_v60  ;;  %v8003_v60 = vld [vmem:[#allocation2 + $0x64] sm:$0xff] }
 0x128   : > { %8895 = vst [vmem:[#allocation25_spill] sm:$0xff] %v7989_v14  ;;  %v1374_v36 = vpop.f32.mrf.mxu1  ;;  %v1164_v14 = vrot.slane %v1162_v7, 4 }
 0x129   : > { %v1375_v51 = vadd.f32 %v1374_v36, %v7857_v56  ;;  %v1766_v28 = vsel %vm1682_vm1, %v1761_v25, %v1765_v61 }
 0x12a   : > { %v2910_v39 = vpop.f32.mrf.mxu0 }
 0x12b   : > { %1413 = vmatmul.bf16.gmra.mxu1 %v1157_v21  ;;  %1999 = vmatmul.bf16.gmra.mxu2 %v1758_v5  ;;  %v2408_v5 = vrot.slane %v2406_v11, 3 }
 0x12c   : > { %2660 = vmatmul.bf16.gmra.mxu3 %v2404_v23  ;;  %v2411_v23 = vrot.slane %v2409_v12, 4 }
 0x12d   : > { %2949 = vmatmul.bf16.gmra.mxu0 %v7009_v63  ;;  %v1165_v63 = vor.u32 %v1164_v14, %v1161_v35 }
 0x12e   : > { %v1960_v18 = vpop.f32.mrf.mxu2  ;;  %v2412_v44 = vor.u32 %v2411_v23, %v2408_v5  ;;  %v1767_v23 = vshrl.u32 %v6580_v50, 16 }
 0x12f   : > { %v2080_v42 = vadd.f32 %v1960_v18, %v1375_v51  ;;  %v2621_v19 = vpop.f32.mrf.mxu3  ;;  %v1166_v54 = vsel %vm1068_vm0, %v1156_v58, %v1165_v63 }
 0x130   : > { %v1376_v38 = vpop.f32.mrf.mxu1  ;;  %v2413_v11 = vsel %vm1068_vm0, %v2403_v26, %v2412_v44 }
 0x131   : > { %v2741_v16 = vadd.f32 %v2621_v19, %v2080_v42  ;;  %v1377_v56 = vadd.f32 %v1376_v38, %v7866_v8 }
 0x132   : > { %v2912_v21 = vpop.f32.mrf.mxu0 }
 0x133   : > { %v7995_v2 = vadd.f32 %v2910_v39, %v2741_v16  ;;  %v7010_v16 = vld [vmem:[#allocation2 + $0x60] sm:$0xff]   ;;  %v7522_v39 = vld [vmem:[#allocation2 + $0x6c] sm:$0xff]  }
 0x134   : > { %v1168_v8 = vshrl.u32 %v7010_v16, 16  ;;  %v1171_v14 = vshll.u32 %v7010_v16, 16  ;;  %v2415_v12 = vshrl.u32 %v7522_v39, 16  ;;  %v2418_v25 = vshll.u32 %v7522_v39, 16 }
 0x136   : > { %v1962_v36 = vpop.f32.mrf.mxu2  ;;  %v1170_v55 = vrot.slane %v1168_v8, 3  ;;  %v1173_v5 = vrot.slane %v1171_v14, 4 }
 0x137   : > { %v2081_v51 = vadd.f32 %v1962_v36, %v1377_v56  ;;  %v2623_v18 = vpop.f32.mrf.mxu3 }
 0x138   : > { %v1379_v59 = vpop.f32.mrf.mxu1 }
 0x139   : > { %v2742_v7 = vadd.f32 %v2623_v18, %v2081_v51  ;;  %v1380_v58 = vadd.f32 %v1379_v59, %v7876_v20  ;;  %v2417_v51 = vrot.slane %v2415_v12, 3  ;;  %v2420_v18 = vrot.slane %v2418_v25, 4  ;;  %v7524_v25 = vld [vmem:[#allocation2 + $0x74] sm:$0xff]  }
 0x13a   : > { %v2915_v42 = vpop.f32.mrf.mxu0 }
 0x13b   : > { %1418 = vmatmul.bf16.gmra.mxu1 %v1166_v54  ;;  %2004 = vmatmul.bf16.gmra.mxu2 %v1766_v28  ;;  %v8001_v30 = vadd.f32 %v2912_v21, %v2742_v7  ;;  %v1771_v21 = vshll.u32 %v8003_v60, 16  ;;  %v1174_v28 = vor.u32 %v1173_v5, %v1170_v55  ;;  %v1769_v7 = vor.u32 %v1767_v23, %v1765_v61 }
 0x13c   : > { %2665 = vmatmul.bf16.gmra.mxu3 %v2413_v11  ;;  %v2421_v11 = vor.u32 %v2420_v18, %v2417_v51  ;;  %v2424_v5 = vshrl.u32 %v7524_v25, 16  ;;  %v2427_v23 = vshll.u32 %v7524_v25, 16 }
 0x13d   : > { %2954 = vmatmul.bf16.gmra.mxu0 %v7010_v16  ;;  %v1773_v20 = vrot.slane %v1771_v21, 1  ;;  %v1175_v50 = vsel %vm1068_vm0, %v1165_v63, %v1174_v28  ;;  %v6653_v63 = vld [vmem:[%s8877_s1 + $0x198] sm:$0xff] }
 0x13e   : > { %v1965_v19 = vpop.f32.mrf.mxu2  ;;  %v2422_v12 = vsel %vm1068_vm0, %v2412_v44, %v2421_v11  ;;  %v6661_v44 = vld [vmem:[%s8877_s1 + $0x1d8] sm:$0xff]  ;;  %4199 = vmatpush.bf16.msra.mxu2 %v6653_v63 }
 0x13f   : > { %v2082_v38 = vadd.f32 %v1965_v19, %v1380_v58  ;;  %v2626_v35 = vpop.f32.mrf.mxu3  ;;  %v1774_v14 = vsel %vm1682_vm1, %v1769_v7, %v1773_v20  ;;  %4488 = vmatpush.bf16.msra.mxu3 %v6661_v44 }
 0x140   : > { %v1381_v26 = vpop.f32.mrf.mxu1 }
 0x141   : > { %v2743_v56 = vadd.f32 %v2626_v35, %v2082_v38  ;;  %v1382_v59 = vadd.f32 %v1381_v26, %v7885_v37  ;;  %v8015_v26 = vld [vmem:[#allocation2 + $0x6c] sm:$0xff] }
 0x142   : > { %v2917_v36 = vpop.f32.mrf.mxu0 }
 0x143   : > { %v8007_v54 = vadd.f32 %v2915_v42, %v2743_v56  ;;  %v7011_v42 = vld [vmem:[#allocation2 + $0x68] sm:$0xff]  }
 0x144   : > { %v1177_v37 = vshrl.u32 %v7011_v42, 16  ;;  %v1180_v35 = vshll.u32 %v7011_v42, 16 }
 0x146   : > { %v1967_v16 = vpop.f32.mrf.mxu2  ;;  %v1179_v18 = vrot.slane %v1177_v37, 3  ;;  %v1182_v7 = vrot.slane %v1180_v35, 4 }
 0x147   : > { %v2083_v39 = vadd.f32 %v1967_v16, %v1382_v59  ;;  %v2628_v58 = vpop.f32.mrf.mxu3  ;;  %v1775_v59 = vshrl.u32 %v8003_v60, 16  ;;  %v1779_v16 = vshll.u32 %v8015_v26, 16 }
 0x148   : > { %v1384_v8 = vpop.f32.mrf.mxu1 }
 0x149   : > { %v2744_v19 = vadd.f32 %v2628_v58, %v2083_v39  ;;  %v1385_v55 = vadd.f32 %v1384_v8, %v7895_v49  ;;  %v6645_v49 = vld [vmem:[%s8877_s1 + $0x158] sm:$0xff]  ;;  %v1777_v60 = vor.u32 %v1775_v59, %v1773_v20 }
 0x14a   : > { %v2920_v38 = vpop.f32.mrf.mxu0  ;;  %v6693_v8 = vld [vmem:[%s8877_s1 + $0x218] sm:$0xff]  ;;  %3538 = vmatpush.bf16.msra.mxu1 %v6645_v49 }
 0x14b   : > { %1423 = vmatmul.bf16.gmra.mxu1 %v1175_v50  ;;  %2009 = vmatmul.bf16.gmra.mxu2 %v1774_v14  ;;  %v8013_v61 = vadd.f32 %v2917_v36, %v2744_v19  ;;  %v2426_v50 = vrot.slane %v2424_v5, 3  ;;  %v2429_v14 = vrot.slane %v2427_v23, 4 }
 0x14c   : > { %2670 = vmatmul.bf16.gmra.mxu3 %v2422_v12  ;;  %5121 = vmatpush.bf16.msra.mxu0 %v6693_v8  ;;  %v1183_v12 = vor.u32 %v1182_v7, %v1179_v18  ;;  %v6583_v18 = vld [vmem:[#allocation2 + $0x74] sm:$0xff] }
 0x14d   : > { %2959 = vmatmul.bf16.gmra.mxu0 %v7011_v42  ;;  %v1781_v42 = vrot.slane %v1779_v16, 1  ;;  %v2430_v37 = vor.u32 %v2429_v14, %v2426_v50 }
 0x14e   : > { %v1970_v21 = vpop.f32.mrf.mxu2  ;;  %v1184_v5 = vsel %vm1068_vm0, %v1174_v28, %v1183_v12 }
 0x14f   : > { %v2084_v56 = vadd.f32 %v1970_v21, %v1385_v55  ;;  %v2631_v36 = vpop.f32.mrf.mxu3  ;;  %v1782_v23 = vsel %vm1682_vm1, %v1777_v60, %v1781_v42  ;;  %v1783_v60 = vshrl.u32 %v8015_v26, 16 }
 0x150   : > { %v1386_v51 = vpop.f32.mrf.mxu1 }
 0x151   : > { %v2745_v39 = vadd.f32 %v2631_v36, %v2084_v56  ;;  %v1387_v25 = vadd.f32 %v1386_v51, %v7913_v10  ;;  %v2431_v36 = vsel %vm1068_vm0, %v2421_v11, %v2430_v37 }
 0x152   : > { %v2922_v58 = vpop.f32.mrf.mxu0 }
 0x153   : > { %v8032_v19 = vadd.f32 %v2920_v38, %v2745_v39  ;;  %v7012_v38 = vld [vmem:[#allocation2 + $0x70] sm:$0xff]   ;;  %v7526_v39 = vld [vmem:[#allocation2 + $0x7c] sm:$0xff]  }
 0x154   : > { %v1186_v10 = vshrl.u32 %v7012_v38, 16  ;;  %v1189_v51 = vshll.u32 %v7012_v38, 16  ;;  %v2433_v28 = vshrl.u32 %v7526_v39, 16  ;;  %v2436_v59 = vshll.u32 %v7526_v39, 16 }
 0x156   : > { %v1972_v35 = vpop.f32.mrf.mxu2  ;;  %v1188_v11 = vrot.slane %v1186_v10, 3  ;;  %v1191_v8 = vrot.slane %v1189_v51, 4 }
 0x157   : > { %v2085_v63 = vadd.f32 %v1972_v35, %v1387_v25  ;;  %v2633_v44 = vpop.f32.mrf.mxu3  ;;  %v1787_v25 = vshll.u32 %v6583_v18, 16 }
 0x158   : > { %v1389_v55 = vpop.f32.mrf.mxu1 }
 0x159   : > { %v2746_v21 = vadd.f32 %v2633_v44, %v2085_v63  ;;  %v1390_v7 = vadd.f32 %v1389_v55, %v7926_v27  ;;  %v2435_v63 = vrot.slane %v2433_v28, 3  ;;  %v2438_v44 = vrot.slane %v2436_v59, 4  ;;  %v7528_v59 = vld [vmem:[#allocation2 + $0x84] sm:$0xff]  }
 0x15a   : > { %v2925_v56 = vpop.f32.mrf.mxu0  ;;  %v1789_v27 = vrot.slane %v1787_v25, 1 }
 0x15b   : > { %1428 = vmatmul.bf16.gmra.mxu1 %v1184_v5  ;;  %2014 = vmatmul.bf16.gmra.mxu2 %v1782_v23  ;;  %v8038_v20 = vadd.f32 %v2922_v58, %v2746_v21  ;;  %v1192_v23 = vor.u32 %v1191_v8, %v1188_v11  ;;  %v1785_v21 = vor.u32 %v1783_v60, %v1781_v42  ;;  %v2442_v11 = vshrl.u32 %v7528_v59, 16 }
 0x15c   : > { %2675 = vmatmul.bf16.gmra.mxu3 %v2431_v36  ;;  %v2439_v36 = vor.u32 %v2438_v44, %v2435_v63  ;;  %v2445_v8 = vshll.u32 %v7528_v59, 16 }
 0x15d   : > { %2964 = vmatmul.bf16.gmra.mxu0 %v7012_v38  ;;  %v1193_v51 = vsel %vm1068_vm0, %v1183_v12, %v1192_v23  ;;  %v1790_v26 = vsel %vm1682_vm1, %v1785_v21, %v1789_v27  ;;  %v1791_v21 = vshrl.u32 %v6583_v18, 16 }
 0x15e   : > { %v1975_v16 = vpop.f32.mrf.mxu2  ;;  %v2440_v28 = vsel %vm1068_vm0, %v2430_v37, %v2439_v36 }
 0x15f   : > { %v2086_v50 = vadd.f32 %v1975_v16, %v1390_v7  ;;  %v2636_v14 = vpop.f32.mrf.mxu3 }
 0x160   : > { %v1391_v49 = vpop.f32.mrf.mxu1 }
 0x161   : > { %v2747_v58 = vadd.f32 %v2636_v14, %v2086_v50  ;;  %v1392_v55 = vadd.f32 %v1391_v49, %v7935_v52  ;;  %v8050_v49 = vld [vmem:[#allocation2 + $0x7c] sm:$0xff] }
 0x162   : > { %v2927_v35 = vpop.f32.mrf.mxu0 }
 0x163   : > { %v8042_v5 = vadd.f32 %v2925_v56, %v2747_v58  ;;  %v7013_v56 = vld [vmem:[#allocation2 + $0x78] sm:$0xff]  }
 0x164   : > { %v1195_v52 = vshrl.u32 %v7013_v56, 16  ;;  %v1198_v14 = vshll.u32 %v7013_v56, 16 }
 0x166   : > { %v1977_v38 = vpop.f32.mrf.mxu2  ;;  %v1197_v63 = vrot.slane %v1195_v52, 3  ;;  %v1200_v44 = vrot.slane %v1198_v14, 4 }
 0x167   : > { %v2087_v39 = vadd.f32 %v1977_v38, %v1392_v55  ;;  %v2638_v7 = vpop.f32.mrf.mxu3 }
 0x168   : > { %v1394_v10 = vpop.f32.mrf.mxu1 }
 0x169   : > { %v2748_v16 = vadd.f32 %v2638_v7, %v2087_v39  ;;  %v1395_v12 = vadd.f32 %v1394_v10, %v7945_v57  ;;  %v2444_v39 = vrot.slane %v2442_v11, 3  ;;  %v2447_v7 = vrot.slane %v2445_v8, 4  ;;  %v7530_v8 = vld [vmem:[#allocation2 + $0x8c] sm:$0xff]  }
 0x16a   : > { %v2930_v50 = vpop.f32.mrf.mxu0 }
 0x16b   : > { %1433 = vmatmul.bf16.gmra.mxu1 %v1193_v51  ;;  %2019 = vmatmul.bf16.gmra.mxu2 %v1790_v26  ;;  %v8048_v42 = vadd.f32 %v2927_v35, %v2748_v16  ;;  %v1795_v35 = vshll.u32 %v8050_v49, 16  ;;  %v1201_v26 = vor.u32 %v1200_v44, %v1197_v63  ;;  %v1793_v16 = vor.u32 %v1791_v21, %v1789_v27 }
 0x16c   : > { %2680 = vmatmul.bf16.gmra.mxu3 %v2440_v28  ;;  %v2448_v28 = vor.u32 %v2447_v7, %v2444_v39  ;;  %v2451_v44 = vshrl.u32 %v7530_v8, 16  ;;  %v2454_v21 = vshll.u32 %v7530_v8, 16 }
 0x16d   : > { %2969 = vmatmul.bf16.gmra.mxu0 %v7013_v56  ;;  %v1797_v57 = vrot.slane %v1795_v35, 1  ;;  %v1202_v18 = vsel %vm1068_vm0, %v1192_v23, %v1201_v26  ;;  %v6652_v23 = vld [vmem:[%s8877_s1 + $0x190] sm:$0xff] }
 0x16e   : > { %v1980_v60 = vpop.f32.mrf.mxu2  ;;  %v2449_v11 = vsel %vm1068_vm0, %v2439_v36, %v2448_v28  ;;  %v6660_v36 = vld [vmem:[%s8877_s1 + $0x1d0] sm:$0xff]  ;;  %4200 = vmatpush.bf16.msra.mxu2 %v6652_v23 }
 0x16f   : > { %v2088_v25 = vadd.f32 %v1980_v60, %v1395_v12  ;;  %v2641_v58 = vpop.f32.mrf.mxu3  ;;  %v1798_v14 = vsel %vm1682_vm1, %v1793_v16, %v1797_v57  ;;  %4489 = vmatpush.bf16.msra.mxu3 %v6660_v36 }
 0x170   : > { %v1396_v37 = vpop.f32.mrf.mxu1 }
 0x171   : > { %v2749_v55 = vadd.f32 %v2641_v58, %v2088_v25  ;;  %v1397_v10 = vadd.f32 %v1396_v37, %v7954_v40  ;;  %v8062_v37 = vld [vmem:[#allocation2 + $0x84] sm:$0xff] }
 0x172   : > { %v2932_v38 = vpop.f32.mrf.mxu0 }
 0x173   : > { %v8054_v51 = vadd.f32 %v2930_v50, %v2749_v55  ;;  %v7014_v50 = vld [vmem:[#allocation2 + $0x80] sm:$0xff]  }
 0x174   : > { %v1204_v40 = vshrl.u32 %v7014_v50, 16  ;;  %v1207_v58 = vshll.u32 %v7014_v50, 16 }
 0x176   : > { %v1982_v56 = vpop.f32.mrf.mxu2  ;;  %v1206_v7 = vrot.slane %v1204_v40, 3  ;;  %v1209_v16 = vrot.slane %v1207_v58, 4 }
 0x177   : > { %v2089_v59 = vadd.f32 %v1982_v56, %v1397_v10  ;;  %v2643_v12 = vpop.f32.mrf.mxu3  ;;  %v1799_v10 = vshrl.u32 %v8050_v49, 16  ;;  %v1803_v56 = vshll.u32 %v8062_v37, 16 }
 0x178   : > { %v1399_v52 = vpop.f32.mrf.mxu1 }
 0x179   : > { %v2750_v60 = vadd.f32 %v2643_v12, %v2089_v59  ;;  %v1400_v63 = vadd.f32 %v1399_v52, %v7964_v33  ;;  %v6644_v33 = vld [vmem:[%s8877_s1 + $0x150] sm:$0xff]  ;;  %v1801_v49 = vor.u32 %v1799_v10, %v1797_v57 }
 0x17a   : > { %v2935_v25 = vpop.f32.mrf.mxu0  ;;  %v6692_v52 = vld [vmem:[%s8877_s1 + $0x210] sm:$0xff]  ;;  %3539 = vmatpush.bf16.msra.mxu1 %v6644_v33 }
 0x17b   : > { %1438 = vmatmul.bf16.gmra.mxu1 %v1202_v18  ;;  %2024 = vmatmul.bf16.gmra.mxu2 %v1798_v14  ;;  %v8060_v27 = vadd.f32 %v2932_v38, %v2750_v60  ;;  %v2453_v18 = vrot.slane %v2451_v44, 3  ;;  %v2456_v14 = vrot.slane %v2454_v21, 4 }
 0x17c   : > { %2685 = vmatmul.bf16.gmra.mxu3 %v2449_v11  ;;  %5122 = vmatpush.bf16.msra.mxu0 %v6692_v52  ;;  %v1210_v11 = vor.u32 %v1209_v16, %v1206_v7  ;;  %v6586_v7 = vld [vmem:[#allocation2 + $0x8c] sm:$0xff] }
 0x17d   : > { %2974 = vmatmul.bf16.gmra.mxu0 %v7014_v50  ;;  %v1805_v50 = vrot.slane %v1803_v56, 1  ;;  %v2457_v40 = vor.u32 %v2456_v14, %v2453_v18 }
 0x17e   : > { %v1985_v35 = vpop.f32.mrf.mxu2  ;;  %v1211_v44 = vsel %vm1068_vm0, %v1201_v26, %v1210_v11 }
 0x17f   : > { %v2090_v55 = vadd.f32 %v1985_v35, %v1400_v63  ;;  %v2646_v38 = vpop.f32.mrf.mxu3  ;;  %v1806_v21 = vsel %vm1682_vm1, %v1801_v49, %v1805_v50  ;;  %v1807_v49 = vshrl.u32 %v8062_v37, 16 }
 0x180   : > { %v1401_v39 = vpop.f32.mrf.mxu1 }
 0x181   : > { %v2751_v59 = vadd.f32 %v2646_v38, %v2090_v55  ;;  %v1402_v8 = vadd.f32 %v1401_v39, %v7979_v13  ;;  %v2458_v38 = vsel %vm1068_vm0, %v2448_v28, %v2457_v40 }
 0x182   : > { %v2937_v12 = vpop.f32.mrf.mxu0 }
 0x183   : > { %v8079_v60 = vadd.f32 %v2935_v25, %v2751_v59  ;;  %v7015_v25 = vld [vmem:[#allocation2 + $0x88] sm:$0xff]   ;;  %v7532_v59 = vld [vmem:[#allocation2 + $0x94] sm:$0xff]  }
 0x184   : > { %v1213_v13 = vshrl.u32 %v7015_v25, 16  ;;  %v1216_v39 = vshll.u32 %v7015_v25, 16  ;;  %v2460_v26 = vshrl.u32 %v7532_v59, 16  ;;  %v2463_v10 = vshll.u32 %v7532_v59, 16 }
 0x186   : > { %v1987_v58 = vpop.f32.mrf.mxu2  ;;  %v1215_v28 = vrot.slane %v1213_v13, 3  ;;  %v1218_v52 = vrot.slane %v1216_v39, 4 }
 0x187   : > { %v2091_v23 = vadd.f32 %v1987_v58, %v1402_v8  ;;  %v2648_v36 = vpop.f32.mrf.mxu3  ;;  %v1811_v8 = vshll.u32 %v6586_v7, 16 }
 0x188   : > { %v1404_v63 = vpop.f32.mrf.mxu1 }
 0x189   : > { %v2752_v35 = vadd.f32 %v2648_v36, %v2091_v23  ;;  %v1405_v16 = vadd.f32 %v1404_v63, %v7853_v53  ;;  %v2462_v23 = vrot.slane %v2460_v26, 3  ;;  %v2465_v36 = vrot.slane %v2463_v10, 4  ;;  %v7534_v10 = vld [vmem:[#allocation2 + $0x9c] sm:$0xff]  }
 0x18a   : > { %v2940_v55 = vpop.f32.mrf.mxu0  ;;  %v1813_v53 = vrot.slane %v1811_v8, 1 }
 0x18b   : > { %1443 = vmatmul.bf16.gmra.mxu1 %v1211_v44  ;;  %2029 = vmatmul.bf16.gmra.mxu2 %v1806_v21  ;;  %v8085_v57 = vadd.f32 %v2937_v12, %v2752_v35  ;;  %v1219_v21 = vor.u32 %v1218_v52, %v1215_v28  ;;  %v1809_v35 = vor.u32 %v1807_v49, %v1805_v50  ;;  %v2469_v28 = vshrl.u32 %v7534_v10, 16 }
 0x18c   : > { %2690 = vmatmul.bf16.gmra.mxu3 %v2458_v38  ;;  %v2466_v38 = vor.u32 %v2465_v36, %v2462_v23  ;;  %v2472_v52 = vshll.u32 %v7534_v10, 16 }
 0x18d   : > { %2979 = vmatmul.bf16.gmra.mxu0 %v7015_v25  ;;  %v1220_v39 = vsel %vm1068_vm0, %v1210_v11, %v1219_v21  ;;  %v1814_v37 = vsel %vm1682_vm1, %v1809_v35, %v1813_v53  ;;  %v1815_v35 = vshrl.u32 %v6586_v7, 16 }
 0x18e   : > { %v1990_v56 = vpop.f32.mrf.mxu2  ;;  %v2467_v26 = vsel %vm1068_vm0, %v2457_v40, %v2466_v38 }
 0x18f   : > { %v2092_v18 = vadd.f32 %v1990_v56, %v1405_v16  ;;  %v2651_v14 = vpop.f32.mrf.mxu3 }
 0x190   : > { %v1406_v33 = vpop.f32.mrf.mxu1 }
 0x191   : > { %v2753_v12 = vadd.f32 %v2651_v14, %v2092_v18  ;;  %v1407_v63 = vadd.f32 %v1406_v33, %v7864_v3  ;;  %v8097_v33 = vld [vmem:[#allocation2 + $0x94] sm:$0xff] }
 0x192   : > { %v2942_v58 = vpop.f32.mrf.mxu0 }
 0x193   : > { %v8089_v44 = vadd.f32 %v2940_v55, %v2753_v12  ;;  %v7016_v55 = vld [vmem:[#allocation2 + $0x90] sm:$0xff]  }
 0x194   : > { %v1222_v3 = vshrl.u32 %v7016_v55, 16  ;;  %v1225_v14 = vshll.u32 %v7016_v55, 16 }
 0x196   : > { %v1992_v25 = vpop.f32.mrf.mxu2  ;;  %v1224_v23 = vrot.slane %v1222_v3, 3  ;;  %v1227_v36 = vrot.slane %v1225_v14, 4 }
 0x197   : > { %v2093_v59 = vadd.f32 %v1992_v25, %v1407_v63  ;;  %v2653_v16 = vpop.f32.mrf.mxu3 }
 0x198   : > { %v1409_v13 = vpop.f32.mrf.mxu1 }
 0x199   : > { %v2754_v56 = vadd.f32 %v2653_v16, %v2093_v59  ;;  %v1410_v11 = vadd.f32 %v1409_v13, %v7872_v17  ;;  %v2471_v59 = vrot.slane %v2469_v28, 3  ;;  %v2474_v16 = vrot.slane %v2472_v52, 4  ;;  %v7536_v52 = vld [vmem:[#allocation2 + $0xa4] sm:$0xff]  }
 0x19a   : > { %v2945_v18 = vpop.f32.mrf.mxu0 }
 0x19b   : > { %1448 = vmatmul.bf16.gmra.mxu1 %v1220_v39  ;;  %2034 = vmatmul.bf16.gmra.mxu2 %v1814_v37  ;;  %v8095_v50 = vadd.f32 %v2942_v58, %v2754_v56  ;;  %v1819_v58 = vshll.u32 %v8097_v33, 16  ;;  %v1228_v37 = vor.u32 %v1227_v36, %v1224_v23  ;;  %v1817_v56 = vor.u32 %v1815_v35, %v1813_v53 }
 0x19c   : > { %2695 = vmatmul.bf16.gmra.mxu3 %v2467_v26  ;;  %v2475_v26 = vor.u32 %v2474_v16, %v2471_v59  ;;  %v2478_v36 = vshrl.u32 %v7536_v52, 16  ;;  %v2481_v35 = vshll.u32 %v7536_v52, 16 }
 0x19d   : > { %2984 = vmatmul.bf16.gmra.mxu0 %v7016_v55  ;;  %v1821_v17 = vrot.slane %v1819_v58, 1  ;;  %v1229_v7 = vsel %vm1068_vm0, %v1219_v21, %v1228_v37  ;;  %v6651_v21 = vld [vmem:[%s8877_s1 + $0x188] sm:$0xff] }
 0x19e   : > { %v1995_v49 = vpop.f32.mrf.mxu2  ;;  %v2476_v28 = vsel %vm1068_vm0, %v2466_v38, %v2475_v26  ;;  %v6659_v38 = vld [vmem:[%s8877_s1 + $0x1c8] sm:$0xff]  ;;  %4201 = vmatpush.bf16.msra.mxu2 %v6651_v21 }
 0x19f   : > { %v2094_v8 = vadd.f32 %v1995_v49, %v1410_v11  ;;  %v2656_v12 = vpop.f32.mrf.mxu3  ;;  %v1822_v14 = vsel %vm1682_vm1, %v1817_v56, %v1821_v17  ;;  %4490 = vmatpush.bf16.msra.mxu3 %v6659_v38 }
 0x1a0   : > { %v1411_v40 = vpop.f32.mrf.mxu1 }
 0x1a1   : > { %v2755_v63 = vadd.f32 %v2656_v12, %v2094_v8  ;;  %v1412_v13 = vadd.f32 %v1411_v40, %v7883_v31  ;;  %v8109_v40 = vld [vmem:[#allocation2 + $0x9c] sm:$0xff] }
 0x1a2   : > { %v2947_v25 = vpop.f32.mrf.mxu0 }
 0x1a3   : > { %v8101_v39 = vadd.f32 %v2945_v18, %v2755_v63  ;;  %v7017_v18 = vld [vmem:[#allocation2 + $0x98] sm:$0xff]  }
 0x1a4   : > { %v1231_v31 = vshrl.u32 %v7017_v18, 16  ;;  %v1234_v12 = vshll.u32 %v7017_v18, 16 }
 0x1a6   : > { %v1997_v55 = vpop.f32.mrf.mxu2  ;;  %v1233_v16 = vrot.slane %v1231_v31, 3  ;;  %v1236_v56 = vrot.slane %v1234_v12, 4 }
 0x1a7   : > { %v2095_v10 = vadd.f32 %v1997_v55, %v1412_v13  ;;  %v2658_v11 = vpop.f32.mrf.mxu3  ;;  %v1823_v13 = vshrl.u32 %v8097_v33, 16  ;;  %v1827_v55 = vshll.u32 %v8109_v40, 16 }
 0x1a8   : > { %v1414_v3 = vpop.f32.mrf.mxu1 }
 0x1a9   : > { %v2756_v49 = vadd.f32 %v2658_v11, %v2095_v10  ;;  %v1415_v23 = vadd.f32 %v1414_v3, %v7891_v45  ;;  %v6643_v45 = vld [vmem:[%s8877_s1 + $0x148] sm:$0xff]  ;;  %v1825_v33 = vor.u32 %v1823_v13, %v1821_v17 }
 0x1aa   : > { %v2950_v8 = vpop.f32.mrf.mxu0  ;;  %v6691_v3 = vld [vmem:[%s8877_s1 + $0x208] sm:$0xff]  ;;  %3540 = vmatpush.bf16.msra.mxu1 %v6643_v45 }
 0x1ab   : > { %1453 = vmatmul.bf16.gmra.mxu1 %v1229_v7  ;;  %2039 = vmatmul.bf16.gmra.mxu2 %v1822_v14  ;;  %v8107_v53 = vadd.f32 %v2947_v25, %v2756_v49  ;;  %v2480_v7 = vrot.slane %v2478_v36, 3  ;;  %v2483_v14 = vrot.slane %v2481_v35, 4 }
 0x1ac   : > { %2700 = vmatmul.bf16.gmra.mxu3 %v2476_v28  ;;  %5123 = vmatpush.bf16.msra.mxu0 %v6691_v3  ;;  %v1237_v28 = vor.u32 %v1236_v56, %v1233_v16  ;;  %v6589_v16 = vld [vmem:[#allocation2 + $0xa4] sm:$0xff] }
 0x1ad   : > { %2989 = vmatmul.bf16.gmra.mxu0 %v7017_v18  ;;  %v1829_v18 = vrot.slane %v1827_v55, 1  ;;  %v2484_v31 = vor.u32 %v2483_v14, %v2480_v7 }
 0x1ae   : > { %v2000_v58 = vpop.f32.mrf.mxu2  ;;  %v1238_v36 = vsel %vm1068_vm0, %v1228_v37, %v1237_v28 }
 0x1af   : > { %v2096_v63 = vadd.f32 %v2000_v58, %v1415_v23  ;;  %v2661_v25 = vpop.f32.mrf.mxu3  ;;  %v1830_v35 = vsel %vm1682_vm1, %v1825_v33, %v1829_v18  ;;  %v1831_v33 = vshrl.u32 %v8109_v40, 16 }
 0x1b0   : > { %v1416_v59 = vpop.f32.mrf.mxu1 }
 0x1b1   : > { %v2757_v10 = vadd.f32 %v2661_v25, %v2096_v63  ;;  %v1417_v52 = vadd.f32 %v1416_v59, %v7911_v4  ;;  %v2485_v25 = vsel %vm1068_vm0, %v2475_v26, %v2484_v31 }
 0x1b2   : > { %v2952_v11 = vpop.f32.mrf.mxu0 }
 0x1b3   : > { %v8126_v49 = vadd.f32 %v2950_v8, %v2757_v10  ;;  %v7018_v8 = vld [vmem:[#allocation2 + $0xa0] sm:$0xff]   ;;  %v7538_v10 = vld [vmem:[#allocation2 + $0xac] sm:$0xff]  }
 0x1b4   : > { %v1240_v4 = vshrl.u32 %v7018_v8, 16  ;;  %v1243_v59 = vshll.u32 %v7018_v8, 16  ;;  %v2487_v37 = vshrl.u32 %v7538_v10, 16  ;;  %v2490_v13 = vshll.u32 %v7538_v10, 16 }
 0x1b6   : > { %v2002_v12 = vpop.f32.mrf.mxu2  ;;  %v1242_v26 = vrot.slane %v1240_v4, 3  ;;  %v1245_v3 = vrot.slane %v1243_v59, 4 }
 0x1b7   : > { %v2097_v21 = vadd.f32 %v2002_v12, %v1417_v52  ;;  %v2663_v38 = vpop.f32.mrf.mxu3  ;;  %v1835_v52 = vshll.u32 %v6589_v16, 16 }
 0x1b8   : > { %v1419_v23 = vpop.f32.mrf.mxu1 }
 0x1b9   : > { %v2758_v58 = vadd.f32 %v2663_v38, %v2097_v21  ;;  %v1420_v56 = vadd.f32 %v1419_v23, %v7922_v24  ;;  %v2489_v21 = vrot.slane %v2487_v37, 3  ;;  %v2492_v38 = vrot.slane %v2490_v13, 4  ;;  %v7540_v13 = vld [vmem:[#allocation2 + $0xb4] sm:$0xff]  }
 0x1ba   : > { %v2955_v63 = vpop.f32.mrf.mxu0  ;;  %v1837_v24 = vrot.slane %v1835_v52, 1 }
 0x1bb   : > { %1458 = vmatmul.bf16.gmra.mxu1 %v1238_v36  ;;  %2044 = vmatmul.bf16.gmra.mxu2 %v1830_v35  ;;  %v8132_v17 = vadd.f32 %v2952_v11, %v2758_v58  ;;  %v1246_v35 = vor.u32 %v1245_v3, %v1242_v26  ;;  %v1833_v58 = vor.u32 %v1831_v33, %v1829_v18  ;;  %v2496_v26 = vshrl.u32 %v7540_v13, 16 }
 0x1bc   : > { %2705 = vmatmul.bf16.gmra.mxu3 %v2485_v25  ;;  %v2493_v25 = vor.u32 %v2492_v38, %v2489_v21  ;;  %v2499_v3 = vshll.u32 %v7540_v13, 16 }
 0x1bd   : > { %2994 = vmatmul.bf16.gmra.mxu0 %v7018_v8  ;;  %v1247_v59 = vsel %vm1068_vm0, %v1237_v28, %v1246_v35  ;;  %v1838_v40 = vsel %vm1682_vm1, %v1833_v58, %v1837_v24  ;;  %v1839_v58 = vshrl.u32 %v6589_v16, 16 }
 0x1be   : > { %v2005_v55 = vpop.f32.mrf.mxu2  ;;  %v2494_v37 = vsel %vm1068_vm0, %v2484_v31, %v2493_v25 }
 0x1bf   : > { %v2098_v7 = vadd.f32 %v2005_v55, %v1420_v56  ;;  %v2666_v14 = vpop.f32.mrf.mxu3 }
 0x1c0   : > { %v1421_v45 = vpop.f32.mrf.mxu1 }
 0x1c1   : > { %v2759_v11 = vadd.f32 %v2666_v14, %v2098_v7  ;;  %v1422_v23 = vadd.f32 %v1421_v45, %v7933_v47  ;;  %v8144_v45 = vld [vmem:[#allocation2 + $0xac] sm:$0xff] }
 0x1c2   : > { %v2957_v12 = vpop.f32.mrf.mxu0 }
 0x1c3   : > { %v8136_v36 = vadd.f32 %v2955_v63, %v2759_v11  ;;  %v7019_v63 = vld [vmem:[#allocation2 + $0xa8] sm:$0xff]  }
 0x1c4   : > { %v1249_v47 = vshrl.u32 %v7019_v63, 16  ;;  %v1252_v14 = vshll.u32 %v7019_v63, 16 }
 0x1c6   : > { %v2007_v8 = vpop.f32.mrf.mxu2  ;;  %v1251_v21 = vrot.slane %v1249_v47, 3  ;;  %v1254_v38 = vrot.slane %v1252_v14, 4 }
 0x1c7   : > { %v2099_v10 = vadd.f32 %v2007_v8, %v1422_v23  ;;  %v2668_v56 = vpop.f32.mrf.mxu3 }
 0x1c8   : > { %v1424_v4 = vpop.f32.mrf.mxu1 }
 0x1c9   : > { %v2760_v55 = vadd.f32 %v2668_v56, %v2099_v10  ;;  %v1425_v28 = vadd.f32 %v1424_v4, %v7941_v6  ;;  %v2498_v10 = vrot.slane %v2496_v26, 3  ;;  %v2501_v56 = vrot.slane %v2499_v3, 4  ;;  %v7542_v3 = vld [vmem:[#allocation2 + $0xbc] sm:$0xff]  }
 0x1ca   : > { %v2960_v7 = vpop.f32.mrf.mxu0 }
 0x1cb   : > { %1463 = vmatmul.bf16.gmra.mxu1 %v1247_v59  ;;  %2049 = vmatmul.bf16.gmra.mxu2 %v1838_v40  ;;  %v8142_v18 = vadd.f32 %v2957_v12, %v2760_v55  ;;  %v1843_v12 = vshll.u32 %v8144_v45, 16  ;;  %v1255_v40 = vor.u32 %v1254_v38, %v1251_v21  ;;  %v1841_v55 = vor.u32 %v1839_v58, %v1837_v24 }
 0x1cc   : > { %2710 = vmatmul.bf16.gmra.mxu3 %v2494_v37  ;;  %v2502_v37 = vor.u32 %v2501_v56, %v2498_v10  ;;  %v2505_v38 = vshrl.u32 %v7542_v3, 16  ;;  %v2508_v58 = vshll.u32 %v7542_v3, 16 }
 0x1cd   : > { %2999 = vmatmul.bf16.gmra.mxu0 %v7019_v63  ;;  %v1845_v6 = vrot.slane %v1843_v12, 1  ;;  %v1256_v16 = vsel %vm1068_vm0, %v1246_v35, %v1255_v40  ;;  %v6650_v35 = vld [vmem:[%s8877_s1 + $0x180] sm:$0xff] }
 0x1ce   : > { %v2010_v33 = vpop.f32.mrf.mxu2  ;;  %v2503_v26 = vsel %vm1068_vm0, %v2493_v25, %v2502_v37  ;;  %v6658_v25 = vld [vmem:[%s8877_s1 + $0x1c0] sm:$0xff]  ;;  %4202 = vmatpush.bf16.msra.mxu2 %v6650_v35 }
 0x1cf   : > { %v2100_v52 = vadd.f32 %v2010_v33, %v1425_v28  ;;  %v2671_v11 = vpop.f32.mrf.mxu3  ;;  %v1846_v14 = vsel %vm1682_vm1, %v1841_v55, %v1845_v6  ;;  %4491 = vmatpush.bf16.msra.mxu3 %v6658_v25 }
 0x1d0   : > { %v1426_v31 = vpop.f32.mrf.mxu1 }
 0x1d1   : > { %v2761_v23 = vadd.f32 %v2671_v11, %v2100_v52  ;;  %v1427_v4 = vadd.f32 %v1426_v31, %v7952_v34  ;;  %v8156_v31 = vld [vmem:[#allocation2 + $0xb4] sm:$0xff] }
 0x1d2   : > { %v2962_v8 = vpop.f32.mrf.mxu0 }
 0x1d3   : > { %v8148_v59 = vadd.f32 %v2960_v7, %v2761_v23  ;;  %v7020_v7 = vld [vmem:[#allocation2 + $0xb0] sm:$0xff]  }
 0x1d4   : > { %v1258_v34 = vshrl.u32 %v7020_v7, 16  ;;  %v1261_v11 = vshll.u32 %v7020_v7, 16 }
 0x1d5   : > { %8896 = vst [vmem:[#allocation26_spill] sm:$0xff] %v8148_v59 }
 0x1d6   : > { %v2012_v63 = vpop.f32.mrf.mxu2  ;;  %v1260_v56 = vrot.slane %v1258_v34, 3  ;;  %v1263_v55 = vrot.slane %v1261_v11, 4 }
 0x1d7   : > { %v2101_v13 = vadd.f32 %v2012_v63, %v1427_v4  ;;  %v2673_v28 = vpop.f32.mrf.mxu3  ;;  %v1847_v4 = vshrl.u32 %v8144_v45, 16  ;;  %v1851_v63 = vshll.u32 %v8156_v31, 16 }
 0x1d8   : > { %v1429_v47 = vpop.f32.mrf.mxu1 }
 0x1d9   : > { %v2762_v33 = vadd.f32 %v2673_v28, %v2101_v13  ;;  %v1430_v21 = vadd.f32 %v1429_v47, %v7960_v9  ;;  %v6642_v9 = vld [vmem:[%s8877_s1 + $0x140] sm:$0xff]  ;;  %v1849_v45 = vor.u32 %v1847_v4, %v1845_v6  ;;  %v1067_v6 = vpack.c.b16 %v7832_v46, %v7832_v46 }
 0x1da   : > { %v2965_v52 = vpop.f32.mrf.mxu0  ;;  %v6690_v47 = vld [vmem:[%s8877_s1 + $0x200] sm:$0xff]  ;;  %3541 = vmatpush.bf16.msra.mxu1 %v6642_v9 }
 0x1db   : > { %1468 = vmatmul.bf16.gmra.mxu1 %v1256_v16  ;;  %2054 = vmatmul.bf16.gmra.mxu2 %v1846_v14  ;;  %v8154_v24 = vadd.f32 %v2962_v8, %v2762_v33  ;;  %v2507_v16 = vrot.slane %v2505_v38, 3  ;;  %v2510_v14 = vrot.slane %v2508_v58, 4  ;;  %v1285_v9 = vshrl.u32 %v1067_v6, 16 }
 0x1dc   : > { %2715 = vmatmul.bf16.gmra.mxu3 %v2503_v26  ;;  %5124 = vmatpush.bf16.msra.mxu0 %v6690_v47  ;;  %v1264_v26 = vor.u32 %v1263_v55, %v1260_v56  ;;  %v1288_v47 = vshll.u32 %v1067_v6, 16 }
 0x1dd   : > { %8897 = vst [vmem:[#allocation27_spill] sm:$0xff] %v8154_v24  ;;  %3004 = vmatmul.bf16.gmra.mxu0 %v7020_v7  ;;  %v1853_v7 = vrot.slane %v1851_v63, 1  ;;  %v2511_v34 = vor.u32 %v2510_v14, %v2507_v16  ;;  %v7575_v16 = vld [vmem:[#allocation2 + $0xc0] sm:$0xff]  }
 0x1de   : > { %v2015_v12 = vpop.f32.mrf.mxu2  ;;  %v1265_v38 = vsel %vm1068_vm0, %v1255_v40, %v1264_v26  ;;  %v8183_v40 = vld [vmem:[#allocation2 + $0xbc] sm:$0xff]  ;;  %v1276_v14 = vshrl.u32 %v7575_v16, 16 }
 0x1df   : > { %v2102_v23 = vadd.f32 %v2015_v12, %v1430_v21  ;;  %v2676_v8 = vpop.f32.mrf.mxu3  ;;  %v1854_v58 = vsel %vm1682_vm1, %v1849_v45, %v1853_v7 }
 0x1e0   : > { %v1431_v10 = vpop.f32.mrf.mxu1 }
 0x1e1   : > { %v2763_v13 = vadd.f32 %v2676_v8, %v2102_v23  ;;  %v1432_v3 = vadd.f32 %v1431_v10, %v7977_v48  ;;  %v2512_v8 = vsel %vm1068_vm0, %v2502_v37, %v2511_v34 }
 0x1e2   : > { %v2967_v28 = vpop.f32.mrf.mxu0 }
 0x1e3   : > { %v8173_v33 = vadd.f32 %v2965_v52, %v2763_v13  ;;  %v7021_v52 = vld [vmem:[#allocation2 + $0xb8] sm:$0xff]   ;;  %v7544_v13 = vld [vmem:[#allocation2 + $0xc4] sm:$0xff]  }
 0x1e4   : > { %v1267_v10 = vshrl.u32 %v7021_v52, 16  ;;  %v1270_v56 = vshll.u32 %v7021_v52, 16  ;;  %v2514_v4 = vshrl.u32 %v7544_v13, 16  ;;  %v2517_v63 = vshll.u32 %v7544_v13, 16 }
 0x1e5   : > { %8898 = vst [vmem:[#allocation28_spill] sm:$0xff] %v8173_v33  ;;  %v1290_v13 = vrot.slane %v1288_v47, 4  ;;  %v7022_v47 = vld [vmem:[#allocation2 + $0xc0] sm:$0xff]  }
 0x1e6   : > { %v2017_v11 = vpop.f32.mrf.mxu2 }
 0x1e7   : > { %v2103_v35 = vadd.f32 %v2017_v11, %v1432_v3  ;;  %v2678_v25 = vpop.f32.mrf.mxu3  ;;  %v1272_v11 = vrot.slane %v1270_v56, 4  ;;  %v1278_v56 = vrot.slane %v1276_v14, 3 }
 0x1e8   : > { %v1434_v21 = vpop.f32.mrf.mxu1 }
 0x1e9   : > { %v2764_v12 = vadd.f32 %v2678_v25, %v2103_v35  ;;  %v1435_v55 = vadd.f32 %v1434_v21, %v7860_v1  ;;  %v1855_v35 = vshrl.u32 %v8156_v31, 16  ;;  %v1859_v25 = vshll.u32 %v8183_v40, 16 }
 0x1ea   : > { %v2970_v23 = vpop.f32.mrf.mxu0  ;;  %v2516_v1 = vrot.slane %v2514_v4, 3  ;;  %v2519_v21 = vrot.slane %v2517_v63, 4 }
 0x1eb   : > { %1473 = vmatmul.bf16.gmra.mxu1 %v1265_v38  ;;  %2059 = vmatmul.bf16.gmra.mxu2 %v1854_v58  ;;  %v8181_v48 = vadd.f32 %v2967_v28, %v2764_v12  ;;  %v1269_v28 = vrot.slane %v1267_v10, 3  ;;  %v1279_v38 = vshll.u32 %v7575_v16, 16  ;;  %v1857_v6 = vor.u32 %v1855_v35, %v1853_v7 }
 0x1ec   : > { %2720 = vmatmul.bf16.gmra.mxu3 %v2512_v8  ;;  %v1287_v8 = vrot.slane %v1285_v9, 3  ;;  %v2520_v10 = vor.u32 %v2519_v21, %v2516_v1 }
 0x1ed   : > { %8899 = vst [vmem:[#allocation29_spill] sm:$0xff] %v8181_v48  ;;  %3009 = vmatmul.bf16.gmra.mxu0 %v7021_v52  ;;  %v1273_v48 = vor.u32 %v1272_v11, %v1269_v28  ;;  %v1281_v33 = vrot.slane %v1279_v38, 4 }
 0x1ee   : > { %v2020_v37 = vpop.f32.mrf.mxu2  ;;  %v2521_v9 = vsel %vm1068_vm0, %v2511_v34, %v2520_v10  ;;  %v1291_v28 = vor.u32 %v1290_v13, %v1287_v8 }
 0x1ef   : > { %v2104_v46 = vadd.f32 %v2020_v37, %v1435_v55  ;;  %v2681_v45 = vpop.f32.mrf.mxu3  ;;  %v1861_v55 = vrot.slane %v1859_v25, 1  ;;  %v1282_v7 = vor.u32 %v1281_v33, %v1278_v56  ;;  %v1863_v25 = vshrl.u32 %v8183_v40, 16 }
 0x1f0   : > { %v1436_v3 = vpop.f32.mrf.mxu1 }
 0x1f1   : > { %v2765_v58 = vadd.f32 %v2681_v45, %v2104_v46  ;;  %v1437_v37 = vadd.f32 %v1436_v3, %v7868_v15  ;;  %v1274_v46 = vsel %vm1068_vm0, %v1264_v26, %v1273_v48  ;;  %v1862_v4 = vsel %vm1682_vm1, %v1857_v6, %v1861_v55  ;;  %v7545_v45 = vld [vmem:[#allocation2 + $0xcc] sm:$0xff]   ;;  %v6593_v26 = vld [vmem:[#allocation2 + $0xc4] sm:$0xff] }
 0x1f2   : > { %v2972_v12 = vpop.f32.mrf.mxu0  ;;  %v8195_v15 = vsel %vm1068_vm0, %v1282_v7, %v1291_v28  ;;  %v1867_v38 = vshll.u32 %v6593_v26, 16  ;;  %v1865_v6 = vor.u32 %v1863_v25, %v1861_v55 }
 0x1f3   : > { %v8188_v52 = vadd.f32 %v2970_v23, %v2765_v58 }
 0x1f6   : > { %v2022_v31 = vpop.f32.mrf.mxu2 }
 0x1f7   : > { %v2105_v24 = vadd.f32 %v2022_v31, %v1437_v37  ;;  %v2683_v59 = vpop.f32.mrf.mxu3  ;;  %v1869_v37 = vrot.slane %v1867_v38, 1  ;;  %v1542_v31 = vld [vmem:[#allocation2 + $0xcc] sm:$0x1]  ;;  %v1871_v38 = vshrl.u32 %v6593_v26, 16 }
 0x1f8   : > { %v1439_v16 = vpop.f32.mrf.mxu1 }
 0x1f9   : > { %v2766_v63 = vadd.f32 %v2683_v59, %v2105_v24  ;;  %v1440_v3 = vadd.f32 %v1439_v16, %v7879_v29  ;;  %v2523_v59 = vshrl.u32 %v7545_v45, 16  ;;  %v2526_v24 = vshll.u32 %v7545_v45, 16 }
 0x1fa   : > { %v2975_v23 = vpop.f32.mrf.mxu0  ;;  %v1656_v45 = vunpack.c.l.b16 %v1542_v31 }
 0x1fb   : > { %1478 = vmatmul.bf16.gmra.mxu1 %v1274_v46  ;;  %2064 = vmatmul.bf16.gmra.mxu2 %v1862_v4  ;;  %v8197_v14 = vadd.f32 %v2972_v12, %v2766_v63  ;;  %v2525_v21 = vrot.slane %v2523_v59, 3  ;;  %v2528_v8 = vrot.slane %v2526_v24, 4  ;;  %v8201_v12 = vld [vmem:[#allocation2 + $0xd0] sm:$0xff]  }
 0x1fc   : > { %2725 = vmatmul.bf16.gmra.mxu3 %v2521_v9  ;;  %v6885_v16 = vunpack.c.h.b16 %v8201_v12  ;;  %v1283_v9 = vsel %vm1068_vm0, %v1273_v48, %v1282_v7  ;;  %v1681_v24 = vpack.c.b16 %v1656_v45, %v1656_v45  ;;  %v6618_v45 = vld [vmem:[#allocation2 + $0x18] sm:$0xff] }
 0x1fd   : > { %3014 = vmatmul.bf16.gmra.mxu0 %v7022_v47  ;;  %v2529_v56 = vor.u32 %v2528_v8, %v2525_v21  ;;  %v1870_v47 = vsel %vm1682_vm1, %v1865_v6, %v1869_v37 }
 0x1fe   : > { %v2025_v11 = vpop.f32.mrf.mxu2  ;;  %v2315_v59 = vpack.c.b16 %v6885_v16, %v6885_v16  ;;  %v1873_v16 = vor.u32 %v1871_v38, %v1869_v37  ;;  %v7025_v37 = vld [vmem:[#allocation2 + $0x28] sm:$0xff]  }
 0x1ff   : > { %v2106_v34 = vadd.f32 %v2025_v11, %v1440_v3  ;;  %v2686_v35 = vpop.f32.mrf.mxu3  ;;  %v2530_v55 = vsel %vm1068_vm0, %v2520_v10, %v2529_v56  ;;  %v7023_v3 = vld [vmem:[#allocation2 + $0xc8] sm:$0xff]  }
 0x200   : > { %v1441_v33 = vpop.f32.mrf.mxu1  ;;  %v2535_v48 = vshll.u32 %v2315_v59, 16 }
 0x201   : > { %v2767_v58 = vadd.f32 %v2686_v35, %v2106_v34  ;;  %v1442_v29 = vadd.f32 %v1441_v33, %v7887_v43  ;;  %v2532_v34 = vshrl.u32 %v2315_v59, 16 }
 0x202   : > { %v2977_v1 = vpop.f32.mrf.mxu0  ;;  %v2537_v6 = vrot.slane %v2535_v48, 4 }
 0x203   : > { %v8203_v13 = vadd.f32 %v2975_v23, %v2767_v58  ;;  %v1875_v58 = vshll.u32 %v1681_v24, 16  ;;  %v2534_v8 = vrot.slane %v2532_v34, 3  ;;  %v8222_v34 = vld [vmem:[#allocation2 + $0x20] sm:$0xff] }
 0x206   : > { %v2027_v46 = vpop.f32.mrf.mxu2 }
 0x207   : > { %v2107_v4 = vadd.f32 %v2027_v46, %v1442_v29  ;;  %v2688_v40 = vpop.f32.mrf.mxu3  ;;  %v3711_v29 = vld [vmem:[#allocation2 + $0x20] sm:$0x8]  ;;  %v1877_v46 = vrot.slane %v1875_v58, 1 }
 0x208   : > { %v1444_v63 = vpop.f32.mrf.mxu1 }
 0x209   : > { %v2768_v28 = vadd.f32 %v2688_v40, %v2107_v4  ;;  %v1445_v11 = vadd.f32 %v1444_v63, %v7904_v62  ;;  %v3825_v62 = vunpack.c.l.b16 %v3711_v29  ;;  %v2538_v63 = vor.u32 %v2537_v6, %v2534_v8 }
 0x20a   : > { %v2980_v23 = vpop.f32.mrf.mxu0  ;;  %v3267_v6 = vshrl.u32 %v6618_v45, 16 }
 0x20b   : > { %1483 = vmatmul.bf16.gmra.mxu1 %v1283_v9  ;;  %2069 = vmatmul.bf16.gmra.mxu2 %v1870_v47  ;;  %v8210_v43 = vadd.f32 %v2977_v1, %v2768_v28  ;;  %v8213_v1 = vld [vmem:[#allocation2 + $0x24] sm:$0xf] }
 0x20c   : > { %2730 = vmatmul.bf16.gmra.mxu3 %v2530_v55  ;;  %v3826_v4 = vunpack.c.l.b16 %v8213_v1  ;;  %v1878_v55 = vsel %vm1682_vm1, %v1873_v16, %v1877_v46 }
 0x20d   : > { %3019 = vmatmul.bf16.gmra.mxu0 %v7023_v3 }
 0x20e   : > { %v2030_v7 = vpop.f32.mrf.mxu2  ;;  %v3874_v3 = vpack.c.b16 %v3826_v4, %v3825_v62 }
 0x20f   : > { %v2108_v35 = vadd.f32 %v2030_v7, %v1445_v11  ;;  %v2691_v33 = vpop.f32.mrf.mxu3  ;;  %v6666_v11 = vld [vmem:[#allocation2 + $0x24] sm:$0xff] }
 0x210   : > { %v1446_v25 = vpop.f32.mrf.mxu1  ;;  %v3900_v7 = vshrl.u32 %v3874_v3, 16  ;;  %v4852_v58 = vshll.u32 %v6666_v11, 16 }
 0x211   : > { %v2769_v10 = vadd.f32 %v2691_v33, %v2108_v35  ;;  %v1447_v40 = vadd.f32 %v1446_v25, %v7918_v22  ;;  %v3269_v22 = vshll.u32 %v6618_v45, 16  ;;  %v3903_v35 = vshll.u32 %v3874_v3, 16 }
 0x212   : > { %v2982_v21 = vpop.f32.mrf.mxu0  ;;  %v3908_v33 = vshrl.u32 %v7025_v37, 16  ;;  %v3911_v25 = vshll.u32 %v7025_v37, 16  ;;  %v3902_v16 = vrot.slane %v3900_v7, 3 }
 0x213   : > { %v8215_v31 = vadd.f32 %v2980_v23, %v2769_v10  ;;  %v2539_v23 = vsel %vm1068_vm0, %v2529_v56, %v2538_v63  ;;  %v8228_v56 = vld [vmem:[#allocation2 + $0x2c] sm:$0xff]  ;;  %v3271_v29 = vrot.slane %v3269_v22, 1  ;;  %v3905_v46 = vrot.slane %v3903_v35, 4 }
 0x214   : > { %v3913_v62 = vrot.slane %v3911_v25, 4 }
 0x215   : > { %v3906_v3 = vor.u32 %v3905_v46, %v3902_v16  ;;  %v6668_v16 = vld [vmem:[#allocation2 + $0x34] sm:$0xff] }
 0x216   : > { %v2032_v9 = vpop.f32.mrf.mxu2 }
 0x217   : > { %v2109_v26 = vadd.f32 %v2032_v9, %v1447_v40  ;;  %v2693_v47 = vpop.f32.mrf.mxu3  ;;  %v4850_v9 = vshrl.u32 %v6666_v11, 16 }
 0x218   : > { %v1449_v28 = vpop.f32.mrf.mxu1 }
 0x219   : > { %v2770_v59 = vadd.f32 %v2693_v47, %v2109_v26  ;;  %v1450_v38 = vadd.f32 %v1449_v28, %v7929_v41  ;;  %v4854_v26 = vrot.slane %v4852_v58, 1  ;;  %v4857_v41 = vshll.u32 %v8228_v56, 16 }
 0x21a   : > { %v2985_v24 = vpop.f32.mrf.mxu0  ;;  %v3272_v47 = vor.u32 %v3271_v29, %v3267_v6  ;;  %v7026_v6 = vld [vmem:[#allocation2 + $0x30] sm:$0xff]  }
 0x21b   : > { %1488 = vmatmul.bf16.gmra.mxu1 %v8195_v15  ;;  %2074 = vmatmul.bf16.gmra.mxu2 %v1878_v55  ;;  %v8224_v48 = vadd.f32 %v2982_v21, %v2770_v59  ;;  %v3274_v21 = vshll.u32 %v8222_v34, 16  ;;  %v6888_v59 = vunpack.c.l.b16 %v7025_v37  ;;  %v4855_v22 = vor.u32 %v4854_v26, %v4850_v9 }
 0x21c   : > { %2735 = vmatmul.bf16.gmra.mxu3 %v2539_v23  ;;  %v4859_v7 = vrot.slane %v4857_v41, 1  ;;  %v3917_v29 = vshrl.u32 %v7026_v6, 16 }
 0x21d   : > { %3024 = vmatmul.bf16.gmra.mxu0 %v8201_v12  ;;  %v3910_v12 = vrot.slane %v3908_v33, 3  ;;  %v3276_v55 = vrot.slane %v3274_v21, 1  ;;  %v3920_v21 = vshll.u32 %v7026_v6, 16 }
 0x21e   : > { %v2035_v10 = vpop.f32.mrf.mxu2  ;;  %v3919_v26 = vrot.slane %v3917_v29, 3  ;;  %v7389_v29 = vld [vmem:[#allocation2 + $0x2c] sm:$0xff]  }
 0x21f   : > { %v2110_v15 = vadd.f32 %v2035_v10, %v1450_v38  ;;  %v2696_v8 = vpop.f32.mrf.mxu3  ;;  %v3914_v45 = vor.u32 %v3913_v62, %v3910_v12  ;;  %v3277_v11 = vsel %vm1682_vm1, %v3272_v47, %v3276_v55  ;;  %v4388_v10 = vpack.c.b16 %v6888_v59, %v3826_v4 }
 0x220   : > { %v1451_v1 = vpop.f32.mrf.mxu1  ;;  %v3922_v41 = vrot.slane %v3920_v21, 4  ;;  %v4865_v59 = vshll.u32 %v6668_v16, 16 }
 0x221   : > { %v2771_v40 = vadd.f32 %v2696_v8, %v2110_v15  ;;  %v1452_v23 = vadd.f32 %v1451_v1, %v7937_v0  ;;  %v3915_v58 = vsel %vm1068_vm0, %v3906_v3, %v3914_v45  ;;  %v4860_v8 = vsel %vm1682_vm1, %v4855_v22, %v4859_v7  ;;  %v6620_v0 = vld [vmem:[#allocation2 + $0x28] sm:$0xff] }
 0x222   : > { %v2987_v63 = vpop.f32.mrf.mxu0  ;;  %v3282_v9 = vshll.u32 %v6620_v0, 16  ;;  %v4861_v3 = vshrl.u32 %v8228_v56, 16 }
 0x223   : > { %v8232_v28 = vadd.f32 %v2985_v24, %v2771_v40  ;;  %v3278_v40 = vshrl.u32 %v8222_v34, 16 }
 0x225   : > { %v3280_v22 = vor.u32 %v3278_v40, %v3276_v55  ;;  %v7027_v55 = vld [vmem:[#allocation2 + $0x38] sm:$0xff]  }
 0x226   : > { %v2037_v35 = vpop.f32.mrf.mxu2  ;;  %v6669_v40 = vld [vmem:[#allocation2 + $0x3c] sm:$0xff] }
 0x227   : > { %v2111_v33 = vadd.f32 %v2037_v35, %v1452_v23  ;;  %v2698_v25 = vpop.f32.mrf.mxu3  ;;  %v3284_v35 = vrot.slane %v3282_v9, 1 }
 0x228   : > { %v1454_v38 = vpop.f32.mrf.mxu1 }
 0x229   : > { %v2772_v15 = vadd.f32 %v2698_v25, %v2111_v33  ;;  %v1455_v1 = vadd.f32 %v1454_v38, %v7948_v32  ;;  %v3923_v32 = vor.u32 %v3922_v41, %v3919_v26  ;;  %v8900_v33 = vld [vmem:[#allocation20_spill] sm:$0xff]  ;;  %v4863_v38 = vor.u32 %v4861_v3, %v4859_v7  ;;  %v6621_v7 = vld [vmem:[#allocation2 + $0x30] sm:$0xff] }
 0x22a   : > { %v2990_v24 = vpop.f32.mrf.mxu0  ;;  %v3290_v3 = vshll.u32 %v6621_v7, 16 }
 0x22b   : > { %3542 = vmatmul.bf16.vlgmr.msra.gmra.mxu1 %v3277_v11  ;;  %4203 = vmatmul.bf16.vlgmr.msra.gmra.mxu2 %v3915_v58  ;;  %v8238_v37 = vadd.f32 %v2987_v63, %v2772_v15  ;;  %v4867_v11 = vrot.slane %v4865_v59, 1  ;;  %v3924_v6 = vsel %vm1068_vm0, %v3914_v45, %v3923_v32 }
 0x22c   : > { %4492 = vmatmul.bf16.vlgmr.msra.gmra.mxu3 %v4388_v10 }
 0x22d   : > { %5125 = vmatmul.bf16.vlgmr.msra.gmra.mxu0 %v4860_v8  ;;  %v3285_v8 = vsel %vm1682_vm1, %v3280_v22, %v3284_v35 }
 0x22e   : > { %v2040_v46 = vpop.f32.mrf.mxu2 }
 0x22f   : > { %v2112_v12 = vadd.f32 %v2040_v46, %v1455_v1  ;;  %v2701_v4 = vpop.f32.mrf.mxu3  ;;  %v3926_v46 = vshrl.u32 %v7027_v55, 16 }
 0x230   : > { %v1456_v62 = vpop.f32.mrf.mxu1 }
 0x231   : > { %v2773_v47 = vadd.f32 %v2701_v4, %v2112_v12  ;;  %v1457_v25 = vadd.f32 %v1456_v62, %v8900_v33  ;;  %v3929_v12 = vshll.u32 %v7027_v55, 16  ;;  %v8901_v4 = vld [vmem:[#allocation22_spill] sm:$0xff]  ;;  %v3928_v59 = vrot.slane %v3926_v46, 3 }
 0x232   : > { %v2992_v63 = vpop.f32.mrf.mxu0 }
 0x233   : > { %v8243_v23 = vadd.f32 %v2990_v24, %v2773_v47  ;;  %v4868_v24 = vsel %vm1682_vm1, %v4863_v38, %v4867_v11  ;;  %v3286_v47 = vshrl.u32 %v6620_v0, 16  ;;  %v3931_v22 = vrot.slane %v3929_v12, 4 }
 0x234   : > { %v4873_v38 = vshll.u32 %v6669_v40, 16 }
 0x236   : > { %v2042_v58 = vpop.f32.mrf.mxu2 }
 0x237   : > { %v2113_v10 = vadd.f32 %v2042_v58, %v1457_v25  ;;  %v2703_v34 = vpop.f32.mrf.mxu3 }
 0x238   : > { %v1459_v15 = vpop.f32.mrf.mxu1 }
 0x239   : > { %v2774_v56 = vadd.f32 %v2703_v34, %v2113_v10  ;;  %v1460_v62 = vadd.f32 %v1459_v15, %v8901_v4  ;;  %v3288_v10 = vor.u32 %v3286_v47, %v3284_v35  ;;  %v3292_v34 = vrot.slane %v3290_v3, 1  ;;  %v7028_v35 = vld [vmem:[#allocation2 + $0x40] sm:$0xff]  }
 0x23a   : > { %v2995_v21 = vpop.f32.mrf.mxu0  ;;  %v8903_v47 = vld [vmem:[#allocation11_spill] sm:$0xff] }
 0x23b   : > { %3547 = vmatmul.bf16.gmra.mxu1 %v3285_v8  ;;  %4208 = vmatmul.bf16.gmra.mxu2 %v3924_v6  ;;  %v8249_v1 = vadd.f32 %v2992_v63, %v2774_v56  ;;  %v4869_v63 = vshrl.u32 %v6668_v16, 16  ;;  %v3932_v8 = vor.u32 %v3931_v22, %v3928_v59  ;;  %v8902_v6 = vld [vmem:[#allocation24_spill] sm:$0xff]  ;;  %v4875_v56 = vrot.slane %v4873_v38, 1 }
 0x23c   : > { %4497 = vmatmul.bf16.gmra.mxu3 %v7389_v29  ;;  %v3293_v46 = vsel %vm1682_vm1, %v3288_v10, %v3292_v34  ;;  %v6670_v59 = vld [vmem:[#allocation2 + $0x44] sm:$0xff]  ;;  %v3294_v38 = vshrl.u32 %v6621_v7, 16 }
 0x23d   : > { %5130 = vmatmul.bf16.gmra.mxu0 %v4868_v24  ;;  %v4871_v29 = vor.u32 %v4869_v63, %v4867_v11  ;;  %v3933_v12 = vsel %vm1068_vm0, %v3923_v32, %v3932_v8  ;;  %v6622_v11 = vld [vmem:[#allocation2 + $0x38] sm:$0xff] }
 0x23e   : > { %v2045_v9 = vpop.f32.mrf.mxu2  ;;  %v3298_v10 = vshll.u32 %v6622_v11, 16 }
 0x23f   : > { %v2114_v45 = vadd.f32 %v2045_v9, %v1460_v62  ;;  %v2706_v26 = vpop.f32.mrf.mxu3  ;;  %v7391_v62 = vld [vmem:[#allocation2 + $0x34] sm:$0xff]  }
 0x240   : > { %v1461_v41 = vpop.f32.mrf.mxu1 }
 0x241   : > { %v2775_v33 = vadd.f32 %v2706_v26, %v2114_v45  ;;  %v1462_v15 = vadd.f32 %v1461_v41, %v8902_v6  ;;  %v3935_v26 = vshrl.u32 %v7028_v35, 16  ;;  %v3938_v41 = vshll.u32 %v7028_v35, 16 }
 0x242   : > { %v2997_v25 = vpop.f32.mrf.mxu0 }
 0x243   : > { %v8252_v58 = vadd.f32 %v2995_v21, %v2775_v33  ;;  %v4876_v21 = vsel %vm1682_vm1, %v4871_v29, %v4875_v56  ;;  %v3937_v6 = vrot.slane %v3935_v26, 3 }
 0x246   : > { %v2047_v24 = vpop.f32.mrf.mxu2 }
 0x247   : > { %v2115_v55 = vadd.f32 %v2047_v24, %v1462_v15  ;;  %v2708_v4 = vpop.f32.mrf.mxu3  ;;  %v3940_v15 = vrot.slane %v3938_v41, 4 }
 0x248   : > { %v1464_v0 = vpop.f32.mrf.mxu1 }
 0x249   : > { %v2776_v16 = vadd.f32 %v2708_v4, %v2115_v55  ;;  %v1465_v3 = vadd.f32 %v1464_v0, %v8903_v47  ;;  %v4881_v55 = vshll.u32 %v6670_v59, 16 }
 0x24a   : > { %v3000_v9 = vpop.f32.mrf.mxu0 }
 0x24b   : > { %3552 = vmatmul.bf16.gmra.mxu1 %v3293_v46  ;;  %4213 = vmatmul.bf16.gmra.mxu2 %v3933_v12  ;;  %v8258_v45 = vadd.f32 %v2997_v25, %v2776_v16  ;;  %v4877_v25 = vshrl.u32 %v6669_v40, 16  ;;  %v3296_v46 = vor.u32 %v3294_v38, %v3292_v34  ;;  %v3300_v12 = vrot.slane %v3298_v10, 1  ;;  %v8905_v16 = vld [vmem:[#allocation12_spill] sm:$0xff] }
 0x24c   : > { %4502 = vmatmul.bf16.gmra.mxu3 %v7391_v62  ;;  %v3941_v62 = vor.u32 %v3940_v15, %v3937_v6  ;;  %v4883_v35 = vrot.slane %v4881_v55, 1  ;;  %v7029_v34 = vld [vmem:[#allocation2 + $0x48] sm:$0xff]   ;;  %v8907_v6 = vld [vmem:[#allocation13_spill] sm:$0xff] }
 0x24d   : > { %5135 = vmatmul.bf16.gmra.mxu0 %v4876_v21  ;;  %v4879_v21 = vor.u32 %v4877_v25, %v4875_v56  ;;  %v3301_v26 = vsel %vm1682_vm1, %v3296_v46, %v3300_v12  ;;  %v6623_v56 = vld [vmem:[#allocation2 + $0x40] sm:$0xff]  ;;  %v3947_v10 = vshll.u32 %v7029_v34, 16 }
 0x24e   : > { %v2050_v22 = vpop.f32.mrf.mxu2  ;;  %v3942_v41 = vsel %vm1068_vm0, %v3932_v8, %v3941_v62 }
 0x24f   : > { %v2116_v32 = vadd.f32 %v2050_v22, %v1465_v3  ;;  %v2711_v33 = vpop.f32.mrf.mxu3 }
 0x250   : > { %v1466_v63 = vpop.f32.mrf.mxu1 }
 0x251   : > { %v2777_v29 = vadd.f32 %v2711_v33, %v2116_v32  ;;  %v1467_v0 = vadd.f32 %v1466_v63, %v8905_v16  ;;  %v7393_v32 = vld [vmem:[#allocation2 + $0x3c] sm:$0xff]   ;;  %v3944_v63 = vshrl.u32 %v7029_v34, 16  ;;  %v3302_v16 = vshrl.u32 %v6622_v11, 16 }
 0x252   : > { %v3002_v24 = vpop.f32.mrf.mxu0  ;;  %v8909_v34 = vld [vmem:[#allocation14_spill] sm:$0xff] }
 0x253   : > { %v8261_v4 = vadd.f32 %v3000_v9, %v2777_v29  ;;  %v4884_v9 = vsel %vm1682_vm1, %v4879_v21, %v4883_v35  ;;  %v6671_v29 = vld [vmem:[#allocation2 + $0x4c] sm:$0xff]  ;;  %v3946_v21 = vrot.slane %v3944_v63, 3 }
 0x255   : > { %8904 = vst [vmem:[#allocation20_spill] sm:$0xff] %v8261_v4 }
 0x256   : > { %v2052_v47 = vpop.f32.mrf.mxu2 }
 0x257   : > { %v2117_v3 = vadd.f32 %v2052_v47, %v1467_v0  ;;  %v2713_v22 = vpop.f32.mrf.mxu3  ;;  %v3306_v0 = vshll.u32 %v6623_v56, 16  ;;  %v3949_v47 = vrot.slane %v3947_v10, 4 }
 0x258   : > { %v1469_v7 = vpop.f32.mrf.mxu1 }
 0x259   : > { %v2778_v40 = vadd.f32 %v2713_v22, %v2117_v3  ;;  %v1470_v15 = vadd.f32 %v1469_v7, %v8907_v6 }
 0x25a   : > { %v3005_v33 = vpop.f32.mrf.mxu0 }
 0x25b   : > { %3557 = vmatmul.bf16.gmra.mxu1 %v3301_v26  ;;  %4218 = vmatmul.bf16.gmra.mxu2 %v3942_v41  ;;  %v8267_v38 = vadd.f32 %v3002_v24, %v2778_v40  ;;  %v4885_v24 = vshrl.u32 %v6670_v59, 16  ;;  %v4889_v26 = vshll.u32 %v6671_v29, 16  ;;  %v3308_v40 = vrot.slane %v3306_v0, 1 }
 0x25c   : > { %4507 = vmatmul.bf16.gmra.mxu3 %v7393_v32  ;;  %v3304_v32 = vor.u32 %v3302_v16, %v3300_v12  ;;  %v7030_v12 = vld [vmem:[#allocation2 + $0x50] sm:$0xff]  }
 0x25d   : > { %8906 = vst [vmem:[#allocation22_spill] sm:$0xff] %v8267_v38  ;;  %5140 = vmatmul.bf16.gmra.mxu0 %v4884_v9  ;;  %v3950_v9 = vor.u32 %v3949_v47, %v3946_v21  ;;  %v4887_v6 = vor.u32 %v4885_v24, %v4883_v35  ;;  %v4891_v38 = vrot.slane %v4889_v26, 1  ;;  %v6624_v35 = vld [vmem:[#allocation2 + $0x48] sm:$0xff]  ;;  %v3956_v0 = vshll.u32 %v7030_v12, 16  ;;  %v8911_v21 = vld [vmem:[#allocation15_spill] sm:$0xff] }
 0x25e   : > { %v2055_v25 = vpop.f32.mrf.mxu2  ;;  %v3309_v63 = vsel %vm1682_vm1, %v3304_v32, %v3308_v40  ;;  %v3310_v32 = vshrl.u32 %v6623_v56, 16 }
 0x25f   : > { %v2118_v8 = vadd.f32 %v2055_v25, %v1470_v15  ;;  %v2716_v55 = vpop.f32.mrf.mxu3  ;;  %v3951_v10 = vsel %vm1068_vm0, %v3941_v62, %v3950_v9 }
 0x260   : > { %v1471_v46 = vpop.f32.mrf.mxu1 }
 0x261   : > { %v2779_v3 = vadd.f32 %v2716_v55, %v2118_v8  ;;  %v1472_v7 = vadd.f32 %v1471_v46, %v8909_v34  ;;  %v7395_v8 = vld [vmem:[#allocation2 + $0x44] sm:$0xff]   ;;  %v3953_v46 = vshrl.u32 %v7030_v12, 16  ;;  %v3314_v34 = vshll.u32 %v6624_v35, 16 }
 0x262   : > { %v3007_v22 = vpop.f32.mrf.mxu0  ;;  %v8913_v12 = vld [vmem:[#allocation16_spill] sm:$0xff] }
 0x263   : > { %v8270_v41 = vadd.f32 %v3005_v33, %v2779_v3  ;;  %v4892_v33 = vsel %vm1682_vm1, %v4887_v6, %v4891_v38  ;;  %v6672_v3 = vld [vmem:[#allocation2 + $0x54] sm:$0xff]  ;;  %v3958_v6 = vrot.slane %v3956_v0, 4 }
 0x265   : > { %8908 = vst [vmem:[#allocation24_spill] sm:$0xff] %v8270_v41 }
 0x266   : > { %v2057_v15 = vpop.f32.mrf.mxu2 }
 0x267   : > { %v2119_v25 = vadd.f32 %v2057_v15, %v1472_v7  ;;  %v2718_v4 = vpop.f32.mrf.mxu3  ;;  %v3955_v7 = vrot.slane %v3953_v46, 3 }
 0x268   : > { %v1474_v11 = vpop.f32.mrf.mxu1 }
 0x269   : > { %v2780_v59 = vadd.f32 %v2718_v4, %v2119_v25  ;;  %v1475_v47 = vadd.f32 %v1474_v11, %v8911_v21 }
 0x26a   : > { %v3010_v55 = vpop.f32.mrf.mxu0 }
 0x26b   : > { %3562 = vmatmul.bf16.gmra.mxu1 %v3309_v63  ;;  %4223 = vmatmul.bf16.gmra.mxu2 %v3951_v10  ;;  %v8276_v16 = vadd.f32 %v3007_v22, %v2780_v59  ;;  %v4893_v22 = vshrl.u32 %v6671_v29, 16  ;;  %v4897_v63 = vshll.u32 %v6672_v3, 16  ;;  %v3316_v59 = vrot.slane %v3314_v34, 1 }
 0x26c   : > { %4512 = vmatmul.bf16.gmra.mxu3 %v7395_v8  ;;  %v3312_v8 = vor.u32 %v3310_v32, %v3308_v40  ;;  %v7031_v40 = vld [vmem:[#allocation2 + $0x58] sm:$0xff]  }
 0x26d   : > { %8910 = vst [vmem:[#allocation11_spill] sm:$0xff] %v8276_v16  ;;  %5145 = vmatmul.bf16.gmra.mxu0 %v4892_v33  ;;  %v3959_v33 = vor.u32 %v3958_v6, %v3955_v7  ;;  %v4895_v21 = vor.u32 %v4893_v22, %v4891_v38  ;;  %v4899_v16 = vrot.slane %v4897_v63, 1  ;;  %v6625_v38 = vld [vmem:[#allocation2 + $0x50] sm:$0xff]  ;;  %v3965_v34 = vshll.u32 %v7031_v40, 16 }
 0x26e   : > { %v2060_v24 = vpop.f32.mrf.mxu2  ;;  %v3317_v46 = vsel %vm1682_vm1, %v3312_v8, %v3316_v59  ;;  %v8915_v7 = vld [vmem:[#allocation17_spill] sm:$0xff]  ;;  %v3318_v8 = vshrl.u32 %v6624_v35, 16 }
 0x26f   : > { %v2120_v62 = vadd.f32 %v2060_v24, %v1475_v47  ;;  %v2721_v26 = vpop.f32.mrf.mxu3  ;;  %v3960_v0 = vsel %vm1068_vm0, %v3950_v9, %v3959_v33 }
 0x270   : > { %v1476_v4 = vpop.f32.mrf.mxu1 }
 0x271   : > { %v2781_v15 = vadd.f32 %v2721_v26, %v2120_v62  ;;  %v1477_v11 = vadd.f32 %v1476_v4, %v8913_v12  ;;  %v7397_v62 = vld [vmem:[#allocation2 + $0x4c] sm:$0xff]   ;;  %v3962_v4 = vshrl.u32 %v7031_v40, 16  ;;  %v3322_v12 = vshll.u32 %v6625_v38, 16  ;;  %v8917_v40 = vld [vmem:[#allocation18_spill] sm:$0xff] }
 0x272   : > { %v3012_v25 = vpop.f32.mrf.mxu0 }
 0x273   : > { %v8279_v10 = vadd.f32 %v3010_v55, %v2781_v15  ;;  %v4900_v55 = vsel %vm1682_vm1, %v4895_v21, %v4899_v16  ;;  %v6673_v15 = vld [vmem:[#allocation2 + $0x5c] sm:$0xff]  ;;  %v3967_v21 = vrot.slane %v3965_v34, 4 }
 0x275   : > { %8912 = vst [vmem:[#allocation12_spill] sm:$0xff] %v8279_v10 }
 0x276   : > { %v2062_v47 = vpop.f32.mrf.mxu2 }
 0x277   : > { %v2121_v24 = vadd.f32 %v2062_v47, %v1477_v11  ;;  %v2723_v41 = vpop.f32.mrf.mxu3  ;;  %v3964_v11 = vrot.slane %v3962_v4, 3 }
 0x278   : > { %v1479_v56 = vpop.f32.mrf.mxu1 }
 0x279   : > { %v2782_v29 = vadd.f32 %v2723_v41, %v2121_v24  ;;  %v1480_v6 = vadd.f32 %v1479_v56, %v8915_v7 }
 0x27a   : > { %v3015_v26 = vpop.f32.mrf.mxu0 }
 0x27b   : > { %3567 = vmatmul.bf16.gmra.mxu1 %v3317_v46  ;;  %4228 = vmatmul.bf16.gmra.mxu2 %v3960_v0  ;;  %v8285_v32 = vadd.f32 %v3012_v25, %v2782_v29  ;;  %v4901_v25 = vshrl.u32 %v6672_v3, 16  ;;  %v4905_v46 = vshll.u32 %v6673_v15, 16  ;;  %v3324_v29 = vrot.slane %v3322_v12, 1 }
 0x27c   : > { %4517 = vmatmul.bf16.gmra.mxu3 %v7397_v62  ;;  %v3320_v62 = vor.u32 %v3318_v8, %v3316_v59  ;;  %v7032_v59 = vld [vmem:[#allocation2 + $0x60] sm:$0xff]  }
 0x27d   : > { %8914 = vst [vmem:[#allocation13_spill] sm:$0xff] %v8285_v32  ;;  %5150 = vmatmul.bf16.gmra.mxu0 %v4900_v55  ;;  %v3968_v55 = vor.u32 %v3967_v21, %v3964_v11  ;;  %v4903_v7 = vor.u32 %v4901_v25, %v4899_v16  ;;  %v4907_v32 = vrot.slane %v4905_v46, 1  ;;  %v6626_v16 = vld [vmem:[#allocation2 + $0x58] sm:$0xff]  ;;  %v3974_v12 = vshll.u32 %v7032_v59, 16  ;;  %v8919_v11 = vld [vmem:[#allocation19_spill] sm:$0xff] }
 0x27e   : > { %v2065_v22 = vpop.f32.mrf.mxu2  ;;  %v3325_v4 = vsel %vm1682_vm1, %v3320_v62, %v3324_v29  ;;  %v3326_v62 = vshrl.u32 %v6625_v38, 16 }
 0x27f   : > { %v2122_v9 = vadd.f32 %v2065_v22, %v1480_v6  ;;  %v2726_v63 = vpop.f32.mrf.mxu3  ;;  %v3969_v34 = vsel %vm1068_vm0, %v3959_v33, %v3968_v55 }
 0x280   : > { %v1481_v41 = vpop.f32.mrf.mxu1 }
 0x281   : > { %v2783_v47 = vadd.f32 %v2726_v63, %v2122_v9  ;;  %v1482_v56 = vadd.f32 %v1481_v41, %v8917_v40  ;;  %v7399_v9 = vld [vmem:[#allocation2 + $0x54] sm:$0xff]   ;;  %v3971_v41 = vshrl.u32 %v7032_v59, 16  ;;  %v3330_v40 = vshll.u32 %v6626_v16, 16 }
 0x282   : > { %v3017_v24 = vpop.f32.mrf.mxu0  ;;  %v8921_v59 = vld [vmem:[#allocation21_spill] sm:$0xff] }
 0x283   : > { %v8288_v0 = vadd.f32 %v3015_v26, %v2783_v47  ;;  %v4908_v26 = vsel %vm1682_vm1, %v4903_v7, %v4907_v32  ;;  %v6674_v47 = vld [vmem:[#allocation2 + $0x64] sm:$0xff]  ;;  %v3976_v7 = vrot.slane %v3974_v12, 4 }
 0x285   : > { %8916 = vst [vmem:[#allocation14_spill] sm:$0xff] %v8288_v0 }
 0x286   : > { %v2067_v6 = vpop.f32.mrf.mxu2 }
 0x287   : > { %v2123_v22 = vadd.f32 %v2067_v6, %v1482_v56  ;;  %v2728_v10 = vpop.f32.mrf.mxu3  ;;  %v3973_v56 = vrot.slane %v3971_v41, 3 }
 0x288   : > { %v1484_v35 = vpop.f32.mrf.mxu1 }
 0x289   : > { %v2784_v3 = vadd.f32 %v2728_v10, %v2123_v22  ;;  %v1485_v21 = vadd.f32 %v1484_v35, %v8919_v11 }
 0x28a   : > { %v3020_v63 = vpop.f32.mrf.mxu0 }
 0x28b   : > { %3572 = vmatmul.bf16.gmra.mxu1 %v3325_v4  ;;  %4233 = vmatmul.bf16.gmra.mxu2 %v3969_v34  ;;  %v8294_v8 = vadd.f32 %v3017_v24, %v2784_v3  ;;  %v4909_v24 = vshrl.u32 %v6673_v15, 16  ;;  %v4913_v4 = vshll.u32 %v6674_v47, 16  ;;  %v3332_v3 = vrot.slane %v3330_v40, 1 }
 0x28c   : > { %4522 = vmatmul.bf16.gmra.mxu3 %v7399_v9  ;;  %v3328_v9 = vor.u32 %v3326_v62, %v3324_v29  ;;  %v7033_v29 = vld [vmem:[#allocation2 + $0x68] sm:$0xff]  }
 0x28d   : > { %8918 = vst [vmem:[#allocation15_spill] sm:$0xff] %v8294_v8  ;;  %5155 = vmatmul.bf16.gmra.mxu0 %v4908_v26  ;;  %v3977_v26 = vor.u32 %v3976_v7, %v3973_v56  ;;  %v4911_v11 = vor.u32 %v4909_v24, %v4907_v32  ;;  %v4915_v8 = vrot.slane %v4913_v4, 1  ;;  %v8305_v32 = vld [vmem:[#allocation2 + $0x60] sm:$0xff]  ;;  %v3983_v40 = vshll.u32 %v7033_v29, 16 }
 0x28e   : > { %v2070_v25 = vpop.f32.mrf.mxu2  ;;  %v3333_v41 = vsel %vm1682_vm1, %v3328_v9, %v3332_v3  ;;  %v8923_v56 = vld [vmem:[#allocation23_spill] sm:$0xff]  ;;  %v3334_v9 = vshrl.u32 %v6626_v16, 16 }
 0x28f   : > { %v2124_v33 = vadd.f32 %v2070_v25, %v1485_v21  ;;  %v2731_v46 = vpop.f32.mrf.mxu3  ;;  %v3978_v12 = vsel %vm1068_vm0, %v3968_v55, %v3977_v26 }
 0x290   : > { %v1486_v10 = vpop.f32.mrf.mxu1 }
 0x291   : > { %v2785_v6 = vadd.f32 %v2731_v46, %v2124_v33  ;;  %v1487_v35 = vadd.f32 %v1486_v10, %v8921_v59  ;;  %v7401_v33 = vld [vmem:[#allocation2 + $0x5c] sm:$0xff]   ;;  %v3980_v10 = vshrl.u32 %v7033_v29, 16  ;;  %v3338_v59 = vshll.u32 %v8305_v32, 16 }
 0x292   : > { %v3022_v22 = vpop.f32.mrf.mxu0 }
 0x293   : > { %v8297_v34 = vadd.f32 %v3020_v63, %v2785_v6  ;;  %v4916_v63 = vsel %vm1682_vm1, %v4911_v11, %v4915_v8  ;;  %v8308_v6 = vld [vmem:[#allocation2 + $0x6c] sm:$0xff] }
 0x295   : > { %8920 = vst [vmem:[#allocation16_spill] sm:$0xff] %v8297_v34 }
 0x296   : > { %v2072_v21 = vpop.f32.mrf.mxu2 }
 0x297   : > { %v2125_v25 = vadd.f32 %v2072_v21, %v1487_v35  ;;  %v2733_v0 = vpop.f32.mrf.mxu3  ;;  %v3982_v35 = vrot.slane %v3980_v10, 3 }
 0x298   : > { %v1489_v38 = vpop.f32.mrf.mxu1 }
 0x299   : > { %v2786_v15 = vadd.f32 %v2733_v0, %v2125_v25  ;;  %v1490_v7 = vadd.f32 %v1489_v38, %v8923_v56  ;;  %v4917_v25 = vshrl.u32 %v6674_v47, 16  ;;  %v3340_v38 = vrot.slane %v3338_v59, 1  ;;  %v7403_v47 = vld [vmem:[#allocation2 + $0x64] sm:$0xff]  }
 0x29a   : > { %v3025_v46 = vpop.f32.mrf.mxu0 }
 0x29b   : > { %3577 = vmatmul.bf16.gmra.mxu1 %v3333_v41  ;;  %4238 = vmatmul.bf16.gmra.mxu2 %v3978_v12  ;;  %v8303_v62 = vadd.f32 %v3022_v22, %v2786_v15  ;;  %v3985_v22 = vrot.slane %v3983_v40, 4  ;;  %v4921_v41 = vshll.u32 %v8308_v6, 16  ;;  %v4919_v56 = vor.u32 %v4917_v25, %v4915_v8  ;;  %v8320_v8 = vld [vmem:[#allocation2 + $0x68] sm:$0xff] }
 0x29c   : > { %4527 = vmatmul.bf16.gmra.mxu3 %v7401_v33  ;;  %v3336_v33 = vor.u32 %v3334_v9, %v3332_v3  ;;  %v7034_v3 = vld [vmem:[#allocation2 + $0x70] sm:$0xff]   ;;  %v5494_v25 = vlaneseq }
 0x29d   : > { %8922 = vst [vmem:[#allocation17_spill] sm:$0xff] %v8303_v62  ;;  %5160 = vmatmul.bf16.gmra.mxu0 %v4916_v63  ;;  %v3986_v15 = vor.u32 %v3985_v22, %v3982_v35  ;;  %v8924_v63 = vld [vmem:[#allocation25_spill] sm:$0xff]  ;;  %v3992_v59 = vshll.u32 %v7034_v3, 16 }
 0x29e   : > { %v2075_v55 = vpop.f32.mrf.mxu2  ;;  %v3341_v10 = vsel %vm1682_vm1, %v3336_v33, %v3340_v38  ;;  %v8323_v22 = vld [vmem:[#allocation2 + $0x74] sm:$0xff]  ;;  %v3342_v33 = vshrl.u32 %v8305_v32, 16  ;;  %v8337_v32 = vld [vmem:[%s8879_s3] ss:$0 sm:$0xff] }
 0x29f   : > { %v2126_v0 = vadd.f32 %v2075_v55, %v1490_v7  ;;  %v2736_v24 = vpop.f32.mrf.mxu3  ;;  %v4923_v7 = vrot.slane %v4921_v41, 1  ;;  %v3987_v40 = vsel %vm1068_vm0, %v3977_v26, %v3986_v15 }
 0x2a0   : > { %v1491_v4 = vpop.f32.mrf.mxu1 }
 0x2a1   : > { %v2787_v11 = vadd.f32 %v2736_v24, %v2126_v0  ;;  %v1492_v29 = vadd.f32 %v1491_v4, %v8924_v63  ;;  %v3989_v4 = vshrl.u32 %v7034_v3, 16 }
 0x2a2   : > { %v3027_v21 = vpop.f32.mrf.mxu0 }
 0x2a3   : > { %v8312_v12 = vadd.f32 %v3025_v46, %v2787_v11  ;;  %v4924_v46 = vsel %vm1682_vm1, %v4919_v56, %v4923_v7  ;;  %v3991_v63 = vrot.slane %v3989_v4, 3 }
 0x2a6   : > { %v2077_v55 = vpop.f32.mrf.mxu2 }
 0x2a7   : > { %v2127_v16 = vadd.f32 %v2077_v55, %v1492_v29  ;;  %v2738_v62 = vpop.f32.mrf.mxu3  ;;  %v3994_v29 = vrot.slane %v3992_v59, 4  ;;  %v8330_v55 = vld [vmem:[%s8878_s2] ss:$0 sm:$0xff] }
 0x2a8   : > { %v3543_v34 = vpop.f32.mrf.mxu1 }
 0x2a9   : > { %v2788_v0 = vadd.f32 %v2738_v62, %v2127_v16  ;;  %v3663_v35 = vadd.f32 %v3543_v34, %v7995_v2  ;;  %v4925_v34 = vshrl.u32 %v8308_v6, 16  ;;  %v4929_v16 = vshll.u32 %v8323_v22, 16 }
 0x2aa   : > { %v5126_v24 = vpop.f32.mrf.mxu0 }
 0x2ab   : > { %3582 = vmatmul.bf16.gmra.mxu1 %v3341_v10  ;;  %4243 = vmatmul.bf16.gmra.mxu2 %v3987_v40  ;;  %v8318_v9 = vadd.f32 %v3027_v21, %v2788_v0  ;;  %v3346_v21 = vshll.u32 %v8320_v8, 16  ;;  %v5495_v40 = vshrl.u32 %v5494_v25, 7  ;;  %v4927_v59 = vor.u32 %v4925_v34, %v4923_v7  ;;  %v7405_v25 = vld [vmem:[#allocation2 + $0x6c] sm:$0xff]   ;;  %v7035_v7 = vld [vmem:[#allocation2 + $0x78] sm:$0xff]  }
 0x2ac   : > { %4532 = vmatmul.bf16.gmra.mxu3 %v7403_v47  ;;  %v3344_v47 = vor.u32 %v3342_v33, %v3340_v38 }
 0x2ad   : > { %8925 = vst [vmem:[#allocation18_spill] sm:$0xff] %v8318_v9  ;;  %5165 = vmatmul.bf16.gmra.mxu0 %v4924_v46  ;;  %v3348_v0 = vrot.slane %v3346_v21, 1  ;;  %v8339_v46 = vor.u32 %v3994_v29, %v3991_v63  ;;  %vm5498_vm2 = vcmp.ge.s32.totalorder %v5495_v40, 1 }
 0x2ae   : > { %v4204_v26 = vpop.f32.mrf.mxu2  ;;  %vm8348_vm3 = vmpackc.low %vm5498_vm2, %vm5498_vm2 }
 0x2af   : > { %v4324_v62 = vadd.f32 %v4204_v26, %v3663_v35  ;;  %v4493_v11 = vpop.f32.mrf.mxu3  ;;  %v4931_v35 = vrot.slane %v4929_v16, 1  ;;  %v3996_v38 = vsel %vm1068_vm0, %v3986_v15, %v8339_v46  ;;  %v8352_v16 = vld [vmem:[#allocation2 + $0x70] sm:$0xff]  ;;  %v3998_v15 = vshrl.u32 %v7035_v7, 16 }
 0x2b0   : > { %v3545_v41 = vpop.f32.mrf.mxu1 }
 0x2b1   : > { %v4613_v56 = vadd.f32 %v4493_v11, %v4324_v62  ;;  %v3664_v4 = vadd.f32 %v3545_v41, %v8001_v30  ;;  %v4932_v30 = vsel %vm1682_vm1, %v4927_v59, %v4931_v35  ;;  %v8358_v59 = vld [vmem:[#allocation2 + $0x7c] sm:$0xff] }
 0x2b2   : > { %v5128_v2 = vpop.f32.mrf.mxu0 }
 0x2b3   : > { %v5246_v10 = vadd.f32 %v5126_v24, %v4613_v56  ;;  %v3349_v56 = vsel %vm1682_vm1, %v3344_v47, %v3348_v0 }
 0x2b5   : > { %v5298_v3 = vmul.f32 %v8330_v55, %v5246_v10  ;;  %v4001_v10 = vshll.u32 %v7035_v7, 16 }
 0x2b6   : > { %v4206_v6 = vpop.f32.mrf.mxu2 }
 0x2b7   : > { %v5350_v26 = vadd.f32 %v8337_v32, %v5298_v3  ;;  %v4325_v24 = vadd.f32 %v4206_v6, %v3664_v4  ;;  %v4495_v62 = vpop.f32.mrf.mxu3 }
 0x2b8   : > { %v3548_v11 = vpop.f32.mrf.mxu1 }
 0x2b9   : > { %v5398_v33 = vmax.f32 %v5350_v26, 0.0  ;;  %v4614_v21 = vadd.f32 %v4495_v62, %v4325_v24  ;;  %v3665_v4 = vadd.f32 %v3548_v11, %v8007_v54  ;;  %v3350_v62 = vshrl.u32 %v8320_v8, 16 }
 0x2ba   : > { %v5131_v63 = vpop.f32.mrf.mxu0  ;;  %v4937_v11 = vshll.u32 %v8358_v59, 16 }
 0x2bb   : > { %v5446_v29 = vpack.c.bf16 %v5398_v33, %v5398_v33  ;;  %v5247_v34 = vadd.f32 %v5128_v2, %v4614_v21  ;;  %3587 = vmatmul.bf16.gmra.mxu1 %v3349_v56  ;;  %4248 = vmatmul.bf16.gmra.mxu2 %v3996_v38  ;;  %v3354_v38 = vshll.u32 %v8352_v16, 16  ;;  %v4003_v33 = vrot.slane %v4001_v10, 4 }
 0x2bc   : > { %4537 = vmatmul.bf16.gmra.mxu3 %v7405_v25  ;;  %v4000_v25 = vrot.slane %v3998_v15, 3  ;;  %v4933_v21 = vshrl.u32 %v8323_v22, 16 }
 0x2bd   : > { %5170 = vmatmul.bf16.gmra.mxu0 %v4932_v30  ;;  %v5516_v47 = vsel %vm8348_vm3, %v5446_v29, 0  ;;  %v5299_v3 = vmul.f32 %v8330_v55, %v5247_v34 }
 0x2be   : > { %5564 = vst [vmem:[%s7653_s24] sm:$0xf] %v5516_v47  ;;  %v4209_v6 = vpop.f32.mrf.mxu2  ;;  %v5497_v47 = vadd.s32 16, %v5495_v40  ;;  %v8370_v15 = vor.u32 %v4003_v33, %v4000_v25  ;;  %v4935_v10 = vor.u32 %v4933_v21, %v4931_v35 }
 0x2bf   : > { %v5351_v2 = vadd.f32 %v8337_v32, %v5299_v3  ;;  %v4326_v26 = vadd.f32 %v4209_v6, %v3665_v4  ;;  %v4498_v24 = vpop.f32.mrf.mxu3  ;;  %v3352_v3 = vor.u32 %v3350_v62, %v3348_v0  ;;  %v3356_v4 = vrot.slane %v3354_v38, 1  ;;  %v7407_v38 = vld [vmem:[#allocation2 + $0x74] sm:$0xff]  }
 0x2c0   : > { %v3550_v56 = vpop.f32.mrf.mxu1  ;;  %vm5503_vm6 = vcmp.le.s32.totalorder %v5497_v47, 16  ;;  %v4005_v35 = vsel %vm1068_vm0, %v8339_v46, %v8370_v15 }
 0x2c1   : > { %v5399_v30 = vmax.f32 %v5351_v2, 0.0  ;;  %v4615_v7 = vadd.f32 %v4498_v24, %v4326_v26  ;;  %v3666_v2 = vadd.f32 %v3550_v56, %v8013_v61  ;;  %v4939_v26 = vrot.slane %v4937_v11, 1  ;;  %v7036_v56 = vld [vmem:[#allocation2 + $0x80] sm:$0xff]   ;;  %vm8383_vm7 = vmpackc.low %vm5503_vm6, %vm5503_vm6 }
 0x2c2   : > { %v5133_v54 = vpop.f32.mrf.mxu0  ;;  %v3357_v62 = vsel %vm1682_vm1, %v3352_v3, %v3356_v4  ;;  %v4007_v46 = vshrl.u32 %v7036_v56, 16 }
 0x2c3   : > { %v5447_v34 = vpack.c.bf16 %v5399_v30, %v5399_v30  ;;  %v5248_v8 = vadd.f32 %v5131_v63, %v4615_v7  ;;  %v4940_v61 = vsel %vm1682_vm1, %v4935_v10, %v4939_v26  ;;  %v8393_v10 = vld [vmem:[#allocation2 + $0x84] sm:$0xff] }
 0x2c5   : > { %v5517_v22 = vsel %vm8366_vm5, %v5447_v34, 0  ;;  %v5300_v6 = vmul.f32 %v8330_v55, %v5248_v8  ;;  %v8387_v34 = vld [vmem:[#allocation2 + $0x78] sm:$0xff] }
 0x2c6   : > { %5565 = vst [vmem:[%s7653_s24 + $0x4] sm:$0xf] %v5517_v22  ;;  %v4211_v24 = vpop.f32.mrf.mxu2 }
 0x2c7   : > { %v5352_v9 = vadd.f32 %v8337_v32, %v5300_v6  ;;  %v4327_v63 = vadd.f32 %v4211_v24, %v3666_v2  ;;  %v4500_v40 = vpop.f32.mrf.mxu3  ;;  %v3358_v24 = vshrl.u32 %v8352_v16, 16 }
 0x2c8   : > { %v3553_v0 = vpop.f32.mrf.mxu1 }
 0x2c9   : > { %v5400_v25 = vmax.f32 %v5352_v9, 0.0  ;;  %v4616_v33 = vadd.f32 %v4500_v40, %v4327_v63  ;;  %v4010_v9 = vshll.u32 %v7036_v56, 16  ;;  %v3667_v3 = vadd.f32 %v3553_v0, %v8032_v19 }
 0x2ca   : > { %v5136_v21 = vpop.f32.mrf.mxu0  ;;  %v3362_v40 = vshll.u32 %v8387_v34, 16 }
 0x2cb   : > { %v5448_v7 = vpack.c.bf16 %v5400_v25, %v5400_v25  ;;  %v5249_v11 = vadd.f32 %v5133_v54, %v4616_v33  ;;  %3592 = vmatmul.bf16.gmra.mxu1 %v3357_v62  ;;  %4253 = vmatmul.bf16.gmra.mxu2 %v4005_v35  ;;  %v4009_v62 = vrot.slane %v4007_v46, 3  ;;  %v4012_v35 = vrot.slane %v4010_v9, 4 }
 0x2cc   : > { %4542 = vmatmul.bf16.gmra.mxu3 %v7407_v38  ;;  %v4941_v38 = vshrl.u32 %v8358_v59, 16  ;;  %v4945_v33 = vshll.u32 %v8393_v10, 16 }
 0x2cd   : > { %5175 = vmatmul.bf16.gmra.mxu0 %v4940_v61  ;;  %v5518_v8 = vsel %vm8383_vm7, %v5448_v7, 0  ;;  %v5301_v47 = vmul.f32 %v8330_v55, %v5249_v11  ;;  %v3360_v7 = vor.u32 %v3358_v24, %v3356_v4  ;;  %v3364_v11 = vrot.slane %v3362_v40, 1 }
 0x2ce   : > { %5566 = vst [vmem:[%s7653_s24 + $0x8] sm:$0xf] %v5518_v8  ;;  %v4214_v22 = vpop.f32.mrf.mxu2  ;;  %v8401_v8 = vor.u32 %v4012_v35, %v4009_v62  ;;  %v4943_v16 = vor.u32 %v4941_v38, %v4939_v26  ;;  %v4947_v59 = vrot.slane %v4945_v33, 1 }
 0x2cf   : > { %v5353_v54 = vadd.f32 %v8337_v32, %v5301_v47  ;;  %v4328_v6 = vadd.f32 %v4214_v22, %v3667_v3  ;;  %v4503_v2 = vpop.f32.mrf.mxu3  ;;  %v3365_v4 = vsel %vm1682_vm1, %v3360_v7, %v3364_v11  ;;  %v8420_v7 = vld [vmem:[#allocation2 + $0x8c] sm:$0xff] }
 0x2d0   : > { %v3555_v63 = vpop.f32.mrf.mxu1  ;;  %v4014_v26 = vsel %vm1068_vm0, %v8370_v15, %v8401_v8 }
 0x2d1   : > { %v5401_v25 = vmax.f32 %v5353_v54, 0.0  ;;  %v4617_v19 = vadd.f32 %v4503_v2, %v4328_v6  ;;  %v3668_v9 = vadd.f32 %v3555_v63, %v8038_v20  ;;  %v7409_v2 = vld [vmem:[#allocation2 + $0x7c] sm:$0xff]   ;;  %v4948_v20 = vsel %vm1682_vm1, %v4943_v16, %v4947_v59  ;;  %v7037_v63 = vld [vmem:[#allocation2 + $0x88] sm:$0xff]  }
 0x2d2   : > { %v5138_v0 = vpop.f32.mrf.mxu0  ;;  %v4019_v33 = vshll.u32 %v7037_v63, 16 }
 0x2d3   : > { %v5449_v61 = vpack.c.bf16 %v5401_v25, %v5401_v25  ;;  %v5250_v56 = vadd.f32 %v5136_v21, %v4617_v19  ;;  %v8414_v25 = vld [vmem:[#allocation2 + $0x80] sm:$0xff]  ;;  %v4016_v19 = vshrl.u32 %v7037_v63, 16 }
 0x2d5   : > { %v5519_v47 = vsel %vm8348_vm3, %v5449_v61, 0  ;;  %v5302_v46 = vmul.f32 %v8330_v55, %v5250_v56 }
 0x2d6   : > { %5567 = vst [vmem:[%s7653_s24 + $0xc] sm:$0xf] %v5519_v47  ;;  %v4216_v3 = vpop.f32.mrf.mxu2 }
 0x2d7   : > { %v5354_v22 = vadd.f32 %v8337_v32, %v5302_v46  ;;  %v4329_v54 = vadd.f32 %v4216_v3, %v3668_v9  ;;  %v4505_v6 = vpop.f32.mrf.mxu3  ;;  %v3366_v9 = vshrl.u32 %v8387_v34, 16 }
 0x2d8   : > { %v3558_v21 = vpop.f32.mrf.mxu1 }
 0x2d9   : > { %v5402_v24 = vmax.f32 %v5354_v22, 0.0  ;;  %v4618_v40 = vadd.f32 %v4505_v6, %v4329_v54  ;;  %v3669_v56 = vadd.f32 %v3558_v21, %v8042_v5  ;;  %v3370_v22 = vshll.u32 %v8414_v25, 16 }
 0x2da   : > { %v5141_v62 = vpop.f32.mrf.mxu0  ;;  %v4018_v54 = vrot.slane %v4016_v19, 3  ;;  %v4021_v6 = vrot.slane %v4019_v33, 4 }
 0x2db   : > { %v5450_v35 = vpack.c.bf16 %v5402_v24, %v5402_v24  ;;  %v5251_v38 = vadd.f32 %v5138_v0, %v4618_v40  ;;  %3597 = vmatmul.bf16.gmra.mxu1 %v3365_v4  ;;  %4258 = vmatmul.bf16.gmra.mxu2 %v4014_v26  ;;  %v4949_v4 = vshrl.u32 %v8393_v10, 16  ;;  %v3372_v63 = vrot.slane %v3370_v22, 1 }
 0x2dc   : > { %4547 = vmatmul.bf16.gmra.mxu3 %v7409_v2  ;;  %v4953_v2 = vshll.u32 %v8420_v7, 16 }
 0x2dd   : > { %5180 = vmatmul.bf16.gmra.mxu0 %v4948_v20  ;;  %v5520_v15 = vsel %vm8366_vm5, %v5450_v35, 0  ;;  %v5303_v61 = vmul.f32 %v8330_v55, %v5251_v38  ;;  %v3368_v20 = vor.u32 %v3366_v9, %v3364_v11  ;;  %v8428_v35 = vor.u32 %v4021_v6, %v4018_v54  ;;  %v8441_v6 = vld [vmem:[#allocation2 + $0x88] sm:$0xff] }
 0x2de   : > { %5568 = vst [vmem:[%s7653_s24 + $0x10] sm:$0xf] %v5520_v15  ;;  %v4219_v16 = vpop.f32.mrf.mxu2  ;;  %v4951_v34 = vor.u32 %v4949_v4, %v4947_v59  ;;  %v4955_v10 = vrot.slane %v4953_v2, 1 }
 0x2df   : > { %v5355_v0 = vadd.f32 %v8337_v32, %v5303_v61  ;;  %v4330_v47 = vadd.f32 %v4219_v16, %v3669_v56  ;;  %v4508_v46 = vpop.f32.mrf.mxu3  ;;  %v3373_v11 = vsel %vm1682_vm1, %v3368_v20, %v3372_v63  ;;  %v4023_v59 = vsel %vm1068_vm0, %v8401_v8, %v8428_v35 }
 0x2e0   : > { %v3560_v3 = vpop.f32.mrf.mxu1 }
 0x2e1   : > { %v5403_v26 = vmax.f32 %v5355_v0, 0.0  ;;  %v4619_v5 = vadd.f32 %v4508_v46, %v4330_v47  ;;  %v3670_v33 = vadd.f32 %v3560_v3, %v8048_v42  ;;  %v7411_v0 = vld [vmem:[#allocation2 + $0x84] sm:$0xff]   ;;  %v4956_v42 = vsel %vm1682_vm1, %v4951_v34, %v4955_v10  ;;  %v7038_v3 = vld [vmem:[#allocation2 + $0x90] sm:$0xff]  }
 0x2e2   : > { %v5143_v21 = vpop.f32.mrf.mxu0  ;;  %v4025_v4 = vshrl.u32 %v7038_v3, 16 }
 0x2e3   : > { %v5451_v24 = vpack.c.bf16 %v5403_v26, %v5403_v26  ;;  %v5252_v40 = vadd.f32 %v5141_v62, %v4619_v5  ;;  %v4028_v26 = vshll.u32 %v7038_v3, 16 }
 0x2e5   : > { %v5521_v38 = vsel %vm8383_vm7, %v5451_v24, 0  ;;  %v5304_v19 = vmul.f32 %v8330_v55, %v5252_v40  ;;  %v8447_v24 = vld [vmem:[#allocation2 + $0x94] sm:$0xff] }
 0x2e6   : > { %5569 = vst [vmem:[%s7653_s24 + $0x14] sm:$0xf] %v5521_v38  ;;  %v4221_v15 = vpop.f32.mrf.mxu2  ;;  %v3374_v38 = vshrl.u32 %v8414_v25, 16 }
 0x2e7   : > { %v5356_v61 = vadd.f32 %v8337_v32, %v5304_v19  ;;  %v4331_v56 = vadd.f32 %v4221_v15, %v3670_v33  ;;  %v4510_v16 = vpop.f32.mrf.mxu3  ;;  %v3378_v33 = vshll.u32 %v8441_v6, 16  ;;  %v4027_v15 = vrot.slane %v4025_v4, 3 }
 0x2e8   : > { %v3563_v62 = vpop.f32.mrf.mxu1 }
 0x2e9   : > { %v5404_v47 = vmax.f32 %v5356_v61, 0.0  ;;  %v4620_v46 = vadd.f32 %v4510_v16, %v4331_v56  ;;  %v3671_v2 = vadd.f32 %v3563_v62, %v8054_v51  ;;  %v4030_v61 = vrot.slane %v4028_v26, 4 }
 0x2ea   : > { %v5146_v9 = vpop.f32.mrf.mxu0  ;;  %v4957_v56 = vshrl.u32 %v8420_v7, 16 }
 0x2eb   : > { %v5452_v22 = vpack.c.bf16 %v5404_v47, %v5404_v47  ;;  %v5253_v54 = vadd.f32 %v5143_v21, %v4620_v46  ;;  %3602 = vmatmul.bf16.gmra.mxu1 %v3373_v11  ;;  %4263 = vmatmul.bf16.gmra.mxu2 %v4023_v59  ;;  %v4961_v11 = vshll.u32 %v8447_v24, 16  ;;  %v3376_v47 = vor.u32 %v3374_v38, %v3372_v63 }
 0x2ec   : > { %4552 = vmatmul.bf16.gmra.mxu3 %v7411_v0  ;;  %v3380_v46 = vrot.slane %v3378_v33, 1  ;;  %v4959_v25 = vor.u32 %v4957_v56, %v4955_v10  ;;  %v8468_v33 = vld [vmem:[#allocation2 + $0x90] sm:$0xff] }
 0x2ed   : > { %5185 = vmatmul.bf16.gmra.mxu0 %v4956_v42  ;;  %v5522_v8 = vsel %vm8348_vm3, %v5452_v22, 0  ;;  %v5305_v5 = vmul.f32 %v8330_v55, %v5253_v54  ;;  %v8455_v42 = vor.u32 %v4030_v61, %v4027_v15  ;;  %v4963_v7 = vrot.slane %v4961_v11, 1 }
 0x2ee   : > { %5570 = vst [vmem:[%s7653_s24 + $0x18] sm:$0xf] %v5522_v8  ;;  %v4224_v40 = vpop.f32.mrf.mxu2  ;;  %v3381_v63 = vsel %vm1682_vm1, %v3376_v47, %v3380_v46  ;;  %v3382_v47 = vshrl.u32 %v8441_v6, 16 }
 0x2ef   : > { %v5357_v21 = vadd.f32 %v8337_v32, %v5305_v5  ;;  %v4332_v20 = vadd.f32 %v4224_v40, %v3671_v2  ;;  %v4513_v34 = vpop.f32.mrf.mxu3  ;;  %v4032_v10 = vsel %vm1068_vm0, %v8428_v35, %v8455_v42  ;;  %v7413_v2 = vld [vmem:[#allocation2 + $0x8c] sm:$0xff]  }
 0x2f0   : > { %v3565_v19 = vpop.f32.mrf.mxu1 }
 0x2f1   : > { %v5405_v16 = vmax.f32 %v5357_v21, 0.0  ;;  %v4621_v51 = vadd.f32 %v4513_v34, %v4332_v20  ;;  %v3672_v54 = vadd.f32 %v3565_v19, %v8060_v27  ;;  %v4964_v27 = vsel %vm1682_vm1, %v4959_v25, %v4963_v7  ;;  %v7039_v34 = vld [vmem:[#allocation2 + $0x98] sm:$0xff]  }
 0x2f2   : > { %v5148_v62 = vpop.f32.mrf.mxu0  ;;  %v4034_v15 = vshrl.u32 %v7039_v34, 16  ;;  %v4037_v61 = vshll.u32 %v7039_v34, 16 }
 0x2f3   : > { %v5453_v59 = vpack.c.bf16 %v5405_v16, %v5405_v16  ;;  %v5254_v0 = vadd.f32 %v5146_v9, %v4621_v51  ;;  %v8474_v51 = vld [vmem:[#allocation2 + $0x9c] sm:$0xff] }
 0x2f5   : > { %v5523_v3 = vsel %vm8366_vm5, %v5453_v59, 0  ;;  %v5306_v22 = vmul.f32 %v8330_v55, %v5254_v0 }
 0x2f6   : > { %5571 = vst [vmem:[%s7653_s24 + $0x1c] sm:$0xf] %v5523_v3  ;;  %v4226_v4 = vpop.f32.mrf.mxu2  ;;  %v3386_v3 = vshll.u32 %v8468_v33, 16 }
 0x2f7   : > { %v5358_v26 = vadd.f32 %v8337_v32, %v5306_v22  ;;  %v4333_v8 = vadd.f32 %v4226_v4, %v3672_v54  ;;  %v4515_v5 = vpop.f32.mrf.mxu3  ;;  %v4036_v22 = vrot.slane %v4034_v15, 3  ;;  %v4039_v54 = vrot.slane %v4037_v61, 4 }
 0x2f8   : > { %v3568_v9 = vpop.f32.mrf.mxu1  ;;  %v4965_v4 = vshrl.u32 %v8447_v24, 16 }
 0x2f9   : > { %v5406_v40 = vmax.f32 %v5358_v26, 0.0  ;;  %v4622_v21 = vadd.f32 %v4515_v5, %v4333_v8  ;;  %v3673_v16 = vadd.f32 %v3568_v9, %v8079_v60  ;;  %v4969_v5 = vshll.u32 %v8474_v51, 16 }
 0x2fa   : > { %v5151_v20 = vpop.f32.mrf.mxu0  ;;  %v4967_v6 = vor.u32 %v4965_v4, %v4963_v7  ;;  %v8501_v4 = vld [vmem:[#allocation2 + $0xa4] sm:$0xff] }
 0x2fb   : > { %v5454_v38 = vpack.c.bf16 %v5406_v40, %v5406_v40  ;;  %v5255_v19 = vadd.f32 %v5148_v62, %v4622_v21  ;;  %3607 = vmatmul.bf16.gmra.mxu1 %v3381_v63  ;;  %4268 = vmatmul.bf16.gmra.mxu2 %v4032_v10  ;;  %v3384_v10 = vor.u32 %v3382_v47, %v3380_v46  ;;  %v4971_v24 = vrot.slane %v4969_v5, 1  ;;  %v8495_v47 = vld [vmem:[#allocation2 + $0x98] sm:$0xff] }
 0x2fc   : > { %4557 = vmatmul.bf16.gmra.mxu3 %v7413_v2  ;;  %v3388_v2 = vrot.slane %v3386_v3, 1  ;;  %v8482_v40 = vor.u32 %v4039_v54, %v4036_v22 }
 0x2fd   : > { %5190 = vmatmul.bf16.gmra.mxu0 %v4964_v27  ;;  %v5524_v35 = vsel %vm8383_vm7, %v5454_v38, 0  ;;  %v5307_v56 = vmul.f32 %v8330_v55, %v5255_v19 }
 0x2fe   : > { %5572 = vst [vmem:[%s7653_s24 + $0x20] sm:$0xf] %v5524_v35  ;;  %v4229_v11 = vpop.f32.mrf.mxu2  ;;  %v3389_v46 = vsel %vm1682_vm1, %v3384_v10, %v3388_v2  ;;  %v4041_v7 = vsel %vm1068_vm0, %v8455_v42, %v8482_v40  ;;  %v7415_v35 = vld [vmem:[#allocation2 + $0x94] sm:$0xff]   ;;  %v3394_v10 = vshll.u32 %v8495_v47, 16 }
 0x2ff   : > { %v5359_v62 = vadd.f32 %v8337_v32, %v5307_v56  ;;  %v4334_v59 = vadd.f32 %v4229_v11, %v3673_v16  ;;  %v4518_v0 = vpop.f32.mrf.mxu3 }
 0x300   : > { %v3570_v25 = vpop.f32.mrf.mxu1 }
 0x301   : > { %v5407_v26 = vmax.f32 %v5359_v62, 0.0  ;;  %v4623_v60 = vadd.f32 %v4518_v0, %v4334_v59  ;;  %v3674_v34 = vadd.f32 %v3570_v25, %v8085_v57  ;;  %v4972_v57 = vsel %vm1682_vm1, %v4967_v6, %v4971_v24  ;;  %v7040_v62 = vld [vmem:[#allocation2 + $0xa0] sm:$0xff]  }
 0x302   : > { %v5153_v8 = vpop.f32.mrf.mxu0  ;;  %v4043_v25 = vshrl.u32 %v7040_v62, 16  ;;  %v4046_v3 = vshll.u32 %v7040_v62, 16 }
 0x303   : > { %v5455_v9 = vpack.c.bf16 %v5407_v26, %v5407_v26  ;;  %v5256_v63 = vadd.f32 %v5151_v20, %v4623_v60 }
 0x304   : > { %v4045_v6 = vrot.slane %v4043_v25, 3  ;;  %v7417_v25 = vld [vmem:[#allocation2 + $0x9c] sm:$0xff]  }
 0x305   : > { %v5525_v21 = vsel %vm8348_vm3, %v5455_v9, 0  ;;  %v5308_v27 = vmul.f32 %v8330_v55, %v5256_v63  ;;  %v3390_v9 = vshrl.u32 %v8468_v33, 16 }
 0x306   : > { %5573 = vst [vmem:[%s7653_s24 + $0x24] sm:$0xf] %v5525_v21  ;;  %v4231_v38 = vpop.f32.mrf.mxu2  ;;  %v4048_v21 = vrot.slane %v4046_v3, 4 }
 0x307   : > { %v5360_v19 = vadd.f32 %v8337_v32, %v5308_v27  ;;  %v4335_v15 = vadd.f32 %v4231_v38, %v3674_v34  ;;  %v4520_v61 = vpop.f32.mrf.mxu3  ;;  %v4973_v27 = vshrl.u32 %v8474_v51, 16 }
 0x308   : > { %v3573_v20 = vpop.f32.mrf.mxu1 }
 0x309   : > { %v5408_v56 = vmax.f32 %v5360_v19, 0.0  ;;  %v4624_v16 = vadd.f32 %v4520_v61, %v4335_v15  ;;  %v3675_v54 = vadd.f32 %v3573_v20, %v8089_v44  ;;  %v4977_v19 = vshll.u32 %v8501_v4, 16 }
 0x30a   : > { %v5156_v11 = vpop.f32.mrf.mxu0  ;;  %v3392_v20 = vor.u32 %v3390_v9, %v3388_v2  ;;  %v4975_v33 = vor.u32 %v4973_v27, %v4971_v24 }
 0x30b   : > { %v5456_v59 = vpack.c.bf16 %v5408_v56, %v5408_v56  ;;  %v5257_v0 = vadd.f32 %v5153_v8, %v4624_v16  ;;  %3612 = vmatmul.bf16.gmra.mxu1 %v3389_v46  ;;  %4273 = vmatmul.bf16.gmra.mxu2 %v4041_v7  ;;  %v3396_v46 = vrot.slane %v3394_v10, 1  ;;  %v8509_v7 = vor.u32 %v4048_v21, %v4045_v6  ;;  %v8528_v6 = vld [vmem:[#allocation2 + $0xac] sm:$0xff] }
 0x30c   : > { %4562 = vmatmul.bf16.gmra.mxu3 %v7415_v35  ;;  %v4979_v51 = vrot.slane %v4977_v19, 1 }
 0x30d   : > { %5195 = vmatmul.bf16.gmra.mxu0 %v4972_v57  ;;  %v5526_v42 = vsel %vm8366_vm5, %v5456_v59, 0  ;;  %v5309_v22 = vmul.f32 %v8330_v55, %v5257_v0  ;;  %v3397_v2 = vsel %vm1682_vm1, %v3392_v20, %v3396_v46  ;;  %v4050_v24 = vsel %vm1068_vm0, %v8482_v40, %v8509_v7 }
 0x30e   : > { %5574 = vst [vmem:[%s7653_s24 + $0x28] sm:$0xf] %v5526_v42  ;;  %v4234_v26 = vpop.f32.mrf.mxu2 }
 0x30f   : > { %v5361_v60 = vadd.f32 %v8337_v32, %v5309_v22  ;;  %v4336_v8 = vadd.f32 %v4234_v26, %v3675_v54  ;;  %v4523_v5 = vpop.f32.mrf.mxu3  ;;  %v7041_v54 = vld [vmem:[#allocation2 + $0xa8] sm:$0xff]  }
 0x310   : > { %v3575_v63 = vpop.f32.mrf.mxu1  ;;  %v4055_v9 = vshll.u32 %v7041_v54, 16 }
 0x311   : > { %v5409_v34 = vmax.f32 %v5361_v60, 0.0  ;;  %v4625_v44 = vadd.f32 %v4523_v5, %v4336_v8  ;;  %v3676_v16 = vadd.f32 %v3575_v63, %v8095_v50  ;;  %v4980_v50 = vsel %vm1682_vm1, %v4975_v33, %v4979_v51  ;;  %v8522_v8 = vld [vmem:[#allocation2 + $0xa0] sm:$0xff] }
 0x312   : > { %v5158_v38 = vpop.f32.mrf.mxu0  ;;  %v4052_v5 = vshrl.u32 %v7041_v54, 16  ;;  %v4057_v20 = vrot.slane %v4055_v9, 4  ;;  %v4981_v33 = vshrl.u32 %v8501_v4, 16 }
 0x313   : > { %v5457_v15 = vpack.c.bf16 %v5409_v34, %v5409_v34  ;;  %v5258_v61 = vadd.f32 %v5156_v11, %v4625_v44 }
 0x315   : > { %v5527_v35 = vsel %vm8383_vm7, %v5457_v15, 0  ;;  %v5310_v56 = vmul.f32 %v8330_v55, %v5258_v61  ;;  %v3402_v15 = vshll.u32 %v8522_v8, 16  ;;  %v4054_v61 = vrot.slane %v4052_v5, 3 }
 0x316   : > { %5575 = vst [vmem:[%s7653_s24 + $0x2c] sm:$0xf] %v5527_v35  ;;  %v4236_v57 = vpop.f32.mrf.mxu2 }
 0x317   : > { %v5362_v62 = vadd.f32 %v8337_v32, %v5310_v56  ;;  %v4337_v59 = vadd.f32 %v4236_v57, %v3676_v16  ;;  %v4525_v0 = vpop.f32.mrf.mxu3  ;;  %v4985_v16 = vshll.u32 %v8528_v6, 16 }
 0x318   : > { %v3578_v11 = vpop.f32.mrf.mxu1 }
 0x319   : > { %v5410_v3 = vmax.f32 %v5362_v62, 0.0  ;;  %v4626_v42 = vadd.f32 %v4525_v0, %v4337_v59  ;;  %v3677_v10 = vadd.f32 %v3578_v11, %v8101_v39  ;;  %v3404_v0 = vrot.slane %v3402_v15, 1 }
 0x31a   : > { %v5161_v22 = vpop.f32.mrf.mxu0  ;;  %v8536_v11 = vor.u32 %v4057_v20, %v4054_v61  ;;  %v4987_v4 = vrot.slane %v4985_v16, 1 }
 0x31b   : > { %v5458_v26 = vpack.c.bf16 %v5410_v3, %v5410_v3  ;;  %v5259_v60 = vadd.f32 %v5158_v38, %v4626_v42  ;;  %3617 = vmatmul.bf16.gmra.mxu1 %v3397_v2  ;;  %4278 = vmatmul.bf16.gmra.mxu2 %v4050_v24  ;;  %v3398_v38 = vshrl.u32 %v8495_v47, 16  ;;  %v4983_v47 = vor.u32 %v4981_v33, %v4979_v51 }
 0x31c   : > { %4567 = vmatmul.bf16.gmra.mxu3 %v7417_v25  ;;  %v4059_v51 = vsel %vm1068_vm0, %v8509_v7, %v8536_v11 }
 0x31d   : > { %5200 = vmatmul.bf16.gmra.mxu0 %v4980_v50  ;;  %v5528_v40 = vsel %vm8348_vm3, %v5458_v26, 0  ;;  %v5311_v63 = vmul.f32 %v8330_v55, %v5259_v60  ;;  %v3400_v59 = vor.u32 %v3398_v38, %v3396_v46  ;;  %v7419_v26 = vld [vmem:[#allocation2 + $0xa4] sm:$0xff]  }
 0x31e   : > { %5576 = vst [vmem:[%s7653_s24 + $0x30] sm:$0xf] %v5528_v40  ;;  %v4239_v21 = vpop.f32.mrf.mxu2  ;;  %v7042_v40 = vld [vmem:[#allocation2 + $0xb0] sm:$0xff]  }
 0x31f   : > { %v5363_v27 = vadd.f32 %v8337_v32, %v5311_v63  ;;  %v4338_v34 = vadd.f32 %v4239_v21, %v3677_v10  ;;  %v4528_v44 = vpop.f32.mrf.mxu3  ;;  %v3405_v46 = vsel %vm1682_vm1, %v3400_v59, %v3404_v0  ;;  %v8549_v21 = vld [vmem:[#allocation2 + $0xa8] sm:$0xff] }
 0x320   : > { %v3580_v19 = vpop.f32.mrf.mxu1 }
 0x321   : > { %v5411_v35 = vmax.f32 %v5363_v27, 0.0  ;;  %v4627_v39 = vadd.f32 %v4528_v44, %v4338_v34  ;;  %v3678_v25 = vadd.f32 %v3580_v19, %v8107_v53  ;;  %v4988_v53 = vsel %vm1682_vm1, %v4983_v47, %v4987_v4  ;;  %v8555_v19 = vld [vmem:[#allocation2 + $0xb4] sm:$0xff] }
 0x322   : > { %v5163_v56 = vpop.f32.mrf.mxu0  ;;  %v4061_v27 = vshrl.u32 %v7042_v40, 16  ;;  %v4064_v34 = vshll.u32 %v7042_v40, 16 }
 0x323   : > { %v5459_v57 = vpack.c.bf16 %v5411_v35, %v5411_v35  ;;  %v5260_v62 = vadd.f32 %v5161_v22, %v4627_v39  ;;  %v3406_v35 = vshrl.u32 %v8522_v8, 16 }
 0x324   : > { %v4063_v16 = vrot.slane %v4061_v27, 3  ;;  %v7043_v27 = vld [vmem:[#allocation2 + $0xb8] sm:$0xff]  }
 0x325   : > { %v5529_v2 = vsel %vm8366_vm5, %v5459_v57, 0  ;;  %v5312_v24 = vmul.f32 %v8330_v55, %v5260_v62  ;;  %v4066_v57 = vrot.slane %v4064_v34, 4  ;;  %v4989_v62 = vshrl.u32 %v8528_v6, 16 }
 0x326   : > { %5577 = vst [vmem:[%s7653_s24 + $0x34] sm:$0xf] %v5529_v2  ;;  %v4241_v3 = vpop.f32.mrf.mxu2  ;;  %v4993_v2 = vshll.u32 %v8555_v19, 16 }
 0x327   : > { %v5364_v42 = vadd.f32 %v8337_v32, %v5312_v24  ;;  %v4339_v50 = vadd.f32 %v4241_v3, %v3678_v25  ;;  %v4530_v54 = vpop.f32.mrf.mxu3  ;;  %v3408_v3 = vor.u32 %v3406_v35, %v3404_v0  ;;  %v4991_v8 = vor.u32 %v4989_v62, %v4987_v4 }
 0x328   : > { %v3583_v22 = vpop.f32.mrf.mxu1  ;;  %v4995_v6 = vrot.slane %v4993_v2, 1  ;;  %v4997_v2 = vshrl.u32 %v8555_v19, 16 }
 0x329   : > { %v5412_v60 = vmax.f32 %v5364_v42, 0.0  ;;  %v4628_v5 = vadd.f32 %v4530_v54, %v4339_v50  ;;  %v3679_v38 = vadd.f32 %v3583_v22, %v8126_v49  ;;  %v8563_v50 = vor.u32 %v4066_v57, %v4063_v16 }
 0x32a   : > { %v5166_v9 = vpop.f32.mrf.mxu0  ;;  %v3414_v57 = vshrl.u32 %v8549_v21, 16 }
 0x32b   : > { %v5460_v63 = vpack.c.bf16 %v5412_v60, %v5412_v60  ;;  %v5261_v10 = vadd.f32 %v5163_v56, %v4628_v5  ;;  %3622 = vmatmul.bf16.gmra.mxu1 %v3405_v46  ;;  %4283 = vmatmul.bf16.gmra.mxu2 %v4059_v51  ;;  %v3410_v56 = vshll.u32 %v8549_v21, 16  ;;  %v4068_v4 = vsel %vm1068_vm0, %v8536_v11, %v8563_v50 }
 0x32c   : > { %4572 = vmatmul.bf16.gmra.mxu3 %v7419_v26  ;;  %v4999_v21 = vor.u32 %v4997_v2, %v4995_v6 }
 0x32d   : > { %5205 = vmatmul.bf16.gmra.mxu0 %v4988_v53  ;;  %v5530_v7 = vsel %vm8383_vm7, %v5460_v63, 0  ;;  %v5313_v44 = vmul.f32 %v8330_v55, %v5261_v10  ;;  %v3412_v42 = vrot.slane %v3410_v56, 1  ;;  %v7421_v53 = vld [vmem:[#allocation2 + $0xac] sm:$0xff]  }
 0x32e   : > { %5578 = vst [vmem:[%s7653_s24 + $0x38] sm:$0xf] %v5530_v7  ;;  %v4244_v15 = vpop.f32.mrf.mxu2 }
 0x32f   : > { %v5365_v61 = vadd.f32 %v8337_v32, %v5313_v44  ;;  %v4340_v20 = vadd.f32 %v4244_v15, %v3679_v38  ;;  %v4533_v33 = vpop.f32.mrf.mxu3  ;;  %v3413_v0 = vsel %vm1682_vm1, %v3408_v3, %v3412_v42  ;;  %v8576_v44 = vld [vmem:[#allocation2 + $0xb0] sm:$0xff]  ;;  %v4070_v38 = vshrl.u32 %v7043_v27, 16 }
 0x330   : > { %v3585_v39 = vpop.f32.mrf.mxu1  ;;  %v4073_v15 = vshll.u32 %v7043_v27, 16  ;;  %v7044_v27 = vld [vmem:[#allocation2 + $0xc0] sm:$0xff]  }
 0x331   : > { %v5413_v59 = vmax.f32 %v5365_v61, 0.0  ;;  %v4629_v49 = vadd.f32 %v4533_v33, %v4340_v20  ;;  %v3680_v46 = vadd.f32 %v3585_v39, %v8132_v17  ;;  %v4996_v17 = vsel %vm1682_vm1, %v4991_v8, %v4995_v6  ;;  %v8582_v33 = vld [vmem:[#allocation2 + $0xbc] sm:$0xff] }
 0x332   : > { %v5168_v47 = vpop.f32.mrf.mxu0  ;;  %v5001_v3 = vshll.u32 %v8582_v33, 16 }
 0x333   : > { %v5461_v24 = vpack.c.bf16 %v5413_v59, %v5413_v59  ;;  %v5262_v25 = vadd.f32 %v5166_v9, %v4629_v49  ;;  %v3418_v59 = vshll.u32 %v8576_v44, 16  ;;  %v4072_v49 = vrot.slane %v4070_v38, 3 }
 0x334   : > { %v5003_v19 = vrot.slane %v5001_v3, 1  ;;  %v4079_v38 = vshrl.u32 %v7044_v27, 16 }
 0x335   : > { %v5531_v54 = vsel %vm8348_vm3, %v5461_v24, 0  ;;  %v5314_v22 = vmul.f32 %v8330_v55, %v5262_v25 }
 0x336   : > { %5579 = vst [vmem:[%s7653_s24 + $0x3c] sm:$0xf] %v5531_v54  ;;  %v4246_v51 = vpop.f32.mrf.mxu2 }
 0x337   : > { %v5366_v26 = vadd.f32 %v8337_v32, %v5314_v22  ;;  %v4341_v60 = vadd.f32 %v4246_v51, %v3680_v46  ;;  %v4535_v5 = vpop.f32.mrf.mxu3  ;;  %v3416_v22 = vor.u32 %v3414_v57, %v3412_v42  ;;  %v3420_v46 = vrot.slane %v3418_v59, 1 }
 0x338   : > { %v3588_v9 = vpop.f32.mrf.mxu1 }
 0x339   : > { %v5414_v40 = vmax.f32 %v5366_v26, 0.0  ;;  %v4630_v63 = vadd.f32 %v4535_v5, %v4341_v60  ;;  %v3681_v20 = vadd.f32 %v3588_v9, %v8136_v36  ;;  %v3421_v42 = vsel %vm1682_vm1, %v3416_v22, %v3420_v46 }
 0x33a   : > { %v5171_v10 = vpop.f32.mrf.mxu0 }
 0x33b   : > { %v5462_v34 = vpack.c.bf16 %v5414_v40, %v5414_v40  ;;  %v5263_v7 = vadd.f32 %v5168_v47, %v4630_v63  ;;  %3627 = vmatmul.bf16.gmra.mxu1 %v3413_v0  ;;  %4288 = vmatmul.bf16.gmra.mxu2 %v4068_v4  ;;  %v4075_v47 = vrot.slane %v4073_v15, 4  ;;  %v7423_v63 = vld [vmem:[#allocation2 + $0xb4] sm:$0xff]   ;;  %v4082_v15 = vshll.u32 %v7044_v27, 16 }
 0x33c   : > { %4577 = vmatmul.bf16.gmra.mxu3 %v7421_v53 }
 0x33d   : > { %5210 = vmatmul.bf16.gmra.mxu0 %v4996_v17  ;;  %v5532_v11 = vsel %vm8366_vm5, %v5462_v34, 0  ;;  %v5315_v61 = vmul.f32 %v8330_v55, %v5263_v7  ;;  %v8590_v51 = vor.u32 %v4075_v47, %v4072_v49  ;;  %v3422_v49 = vshrl.u32 %v8576_v44, 16 }
 0x33e   : > { %5580 = vst [vmem:[%s7653_s24 + $0x40] sm:$0xf] %v5532_v11  ;;  %v4249_v35 = vpop.f32.mrf.mxu2  ;;  %v8610_v11 = vld [vmem:[%s8878_s2] ss:$0 sm:$0xff] }
 0x33f   : > { %v5367_v39 = vadd.f32 %v8337_v32, %v5315_v61  ;;  %v4342_v56 = vadd.f32 %v4249_v35, %v3681_v20  ;;  %v4538_v16 = vpop.f32.mrf.mxu3  ;;  %v4077_v6 = vsel %vm1068_vm0, %v8563_v50, %v8590_v51  ;;  %v8932_v20 = vld [vmem:[#allocation26_spill] sm:$0xff] }
 0x340   : > { %v3590_v62 = vpop.f32.mrf.mxu1 }
 0x341   : > { %v5415_v24 = vmax.f32 %v5367_v39, 0.0  ;;  %v4631_v36 = vadd.f32 %v4538_v16, %v4342_v56  ;;  %v3682_v5 = vadd.f32 %v3590_v62, %v8142_v18  ;;  %v5004_v18 = vsel %vm1682_vm1, %v4999_v21, %v5003_v19  ;;  %v8614_v39 = vld [vmem:[#allocation2 + $0xc4] sm:$0xff]  ;;  %v8620_v16 = vld [vmem:[%s8879_s3] ss:$0 sm:$0xff] }
 0x342   : > { %v5173_v25 = vpop.f32.mrf.mxu0  ;;  %v5009_v22 = vshll.u32 %v8614_v39, 16 }
 0x343   : > { %v5463_v8 = vpack.c.bf16 %v5415_v24, %v5415_v24  ;;  %v5264_v54 = vadd.f32 %v5171_v10, %v4631_v36  ;;  %v4081_v24 = vrot.slane %v4079_v38, 3  ;;  %v4084_v36 = vrot.slane %v4082_v15, 4  ;;  %v7045_v38 = vld [vmem:[#allocation2 + $0xc8] sm:$0xff]  }
 0x345   : > { %v5533_v26 = vsel %vm8383_vm7, %v5463_v8, 0  ;;  %v5316_v60 = vmul.f32 %v8330_v55, %v5264_v54 }
 0x346   : > { %5581 = vst [vmem:[%s7653_s24 + $0x44] sm:$0xf] %v5533_v26  ;;  %v4251_v9 = vpop.f32.mrf.mxu2 }
 0x347   : > { %v5368_v0 = vadd.f32 %v8337_v32, %v5316_v60  ;;  %v4343_v4 = vadd.f32 %v4251_v9, %v3682_v5  ;;  %v4540_v53 = vpop.f32.mrf.mxu3  ;;  %v8603_v32 = vld [vmem:[#allocation2 + $0xb8] sm:$0xff]  ;;  %v3424_v60 = vor.u32 %v3422_v49, %v3420_v46  ;;  %v8627_v9 = vor.u32 %v4084_v36, %v4081_v24 }
 0x348   : > { %v3593_v40 = vpop.f32.mrf.mxu1  ;;  %v3426_v2 = vshll.u32 %v8603_v32, 16  ;;  %v3430_v36 = vshrl.u32 %v8603_v32, 16 }
 0x349   : > { %v5416_v10 = vmax.f32 %v5368_v0, 0.0  ;;  %v4632_v17 = vadd.f32 %v4540_v53, %v4343_v4  ;;  %v3683_v35 = vadd.f32 %v3593_v40, %v8932_v20  ;;  %v8933_v53 = vld [vmem:[#allocation27_spill] sm:$0xff]  ;;  %v4088_v20 = vshrl.u32 %v7045_v38, 16 }
 0x34a   : > { %v5176_v55 = vpop.f32.mrf.mxu0  ;;  %v3428_v5 = vrot.slane %v3426_v2, 1 }
 0x34b   : > { %v5464_v34 = vpack.c.bf16 %v5416_v10, %v5416_v10  ;;  %v5265_v7 = vadd.f32 %v5173_v25, %v4632_v17  ;;  %3632 = vmatmul.bf16.gmra.mxu1 %v3421_v42  ;;  %4293 = vmatmul.bf16.gmra.mxu2 %v4077_v6  ;;  %v5005_v25 = vshrl.u32 %v8582_v33, 16  ;;  %v5011_v33 = vrot.slane %v5009_v22, 1 }
 0x34c   : > { %4582 = vmatmul.bf16.gmra.mxu3 %v7423_v63  ;;  %v3429_v46 = vsel %vm1682_vm1, %v3424_v60, %v3428_v5  ;;  %v5013_v22 = vshrl.u32 %v8614_v39, 16 }
 0x34d   : > { %5215 = vmatmul.bf16.gmra.mxu0 %v5004_v18  ;;  %v5534_v50 = vsel %vm8348_vm3, %v5464_v34, 0  ;;  %v5317_v61 = vmul.f32 %v8610_v11, %v5265_v7  ;;  %v5007_v44 = vor.u32 %v5005_v25, %v5003_v19  ;;  %v4086_v19 = vsel %vm1068_vm0, %v8590_v51, %v8627_v9 }
 0x34e   : > { %5582 = vst [vmem:[%s7653_s24 + $0x48] sm:$0xf] %v5534_v50  ;;  %v4254_v56 = vpop.f32.mrf.mxu2  ;;  %v5015_v32 = vor.u32 %v5013_v22, %v5011_v33 }
 0x34f   : > { %v5369_v57 = vadd.f32 %v8620_v16, %v5317_v61  ;;  %v4344_v62 = vadd.f32 %v4254_v56, %v3683_v35  ;;  %v4543_v59 = vpop.f32.mrf.mxu3  ;;  %v5012_v7 = vsel %vm1682_vm1, %v5007_v44, %v5011_v33  ;;  %v8640_v61 = vld [vmem:[#allocation2 + $0xc0] sm:$0xff]  ;;  %v4091_v35 = vshll.u32 %v7045_v38, 16 }
 0x350   : > { %v3595_v47 = vpop.f32.mrf.mxu1 }
 0x351   : > { %v5417_v3 = vmax.f32 %v5369_v57, 0.0  ;;  %v4633_v8 = vadd.f32 %v4543_v59, %v4344_v62  ;;  %v3684_v40 = vadd.f32 %v3595_v47, %v8933_v53  ;;  %v8934_v57 = vld [vmem:[#allocation28_spill] sm:$0xff]  ;;  %v3432_v53 = vor.u32 %v3430_v36, %v3428_v5 }
 0x352   : > { %v5178_v54 = vpop.f32.mrf.mxu0  ;;  %v8646_v59 = vld [vmem:[#allocation2 + $0xcc] sm:$0xff] }
 0x353   : > { %v5465_v21 = vpack.c.bf16 %v5417_v3, %v5417_v3  ;;  %v5266_v26 = vadd.f32 %v5176_v55, %v4633_v8  ;;  %v7425_v55 = vld [vmem:[#allocation2 + $0xbc] sm:$0xff]   ;;  %v3434_v3 = vshll.u32 %v8640_v61, 16  ;;  %v4090_v8 = vrot.slane %v4088_v20, 3  ;;  %v7046_v20 = vld [vmem:[#allocation2 + $0xd0] sm:$0xff]  }
 0x354   : > { %v5017_v44 = vshll.u32 %v8646_v59, 16 }
 0x355   : > { %v5535_v0 = vsel %vm8366_vm5, %v5465_v21, 0  ;;  %v5318_v4 = vmul.f32 %v8610_v11, %v5266_v26 }
 0x356   : > { %5583 = vst [vmem:[%s7653_s24 + $0x4c] sm:$0xf] %v5535_v0  ;;  %v4256_v42 = vpop.f32.mrf.mxu2  ;;  %v5019_v39 = vrot.slane %v5017_v44, 1 }
 0x357   : > { %v5370_v6 = vadd.f32 %v8620_v16, %v5318_v4  ;;  %v4345_v63 = vadd.f32 %v4256_v42, %v3684_v40  ;;  %v4545_v10 = vpop.f32.mrf.mxu3  ;;  %v3436_v40 = vrot.slane %v3434_v3, 1 }
 0x358   : > { %v3598_v17 = vpop.f32.mrf.mxu1 }
 0x359   : > { %v5418_v18 = vmax.f32 %v5370_v6, 0.0  ;;  %v4634_v27 = vadd.f32 %v4545_v10, %v4345_v63  ;;  %v3685_v62 = vadd.f32 %v3598_v17, %v8934_v57  ;;  %v8935_v10 = vld [vmem:[#allocation29_spill] sm:$0xff]  ;;  %v3437_v5 = vsel %vm1682_vm1, %v3432_v53, %v3436_v40 }
 0x35a   : > { %v5181_v34 = vpop.f32.mrf.mxu0  ;;  %v4097_v57 = vshrl.u32 %v7046_v20, 16 }
 0x35b   : > { %v5466_v15 = vpack.c.bf16 %v5418_v18, %v5418_v18  ;;  %v5267_v50 = vadd.f32 %v5178_v54, %v4634_v27  ;;  %3637 = vmatmul.bf16.gmra.mxu1 %v3429_v46  ;;  %4298 = vmatmul.bf16.gmra.mxu2 %v4086_v19  ;;  %v4093_v54 = vrot.slane %v4091_v35, 4 }
 0x35c   : > { %4587 = vmatmul.bf16.gmra.mxu3 %v7425_v55 }
 0x35d   : > { %5220 = vmatmul.bf16.gmra.mxu0 %v5012_v7  ;;  %v5536_v51 = vsel %vm8383_vm7, %v5466_v15, 0  ;;  %v5319_v56 = vmul.f32 %v8610_v11, %v5267_v50  ;;  %v8654_v42 = vor.u32 %v4093_v54, %v4090_v8  ;;  %v5020_v50 = vsel %vm1682_vm1, %v5015_v32, %v5019_v39 }
 0x35e   : > { %5584 = vst [vmem:[%s7653_s24 + $0x50] sm:$0xf] %v5536_v51  ;;  %v4259_v49 = vpop.f32.mrf.mxu2  ;;  %v3438_v8 = vshrl.u32 %v8640_v61, 16 }
 0x35f   : > { %v5371_v47 = vadd.f32 %v8620_v16, %v5319_v56  ;;  %v4346_v2 = vadd.f32 %v4259_v49, %v3685_v62  ;;  %v4548_v24 = vpop.f32.mrf.mxu3  ;;  %v4095_v33 = vsel %vm1068_vm0, %v8627_v9, %v8654_v42  ;;  %v8667_v56 = vld [vmem:[#allocation2 + $0xc8] sm:$0xff]  ;;  %v4100_v62 = vshll.u32 %v7046_v20, 16 }
 0x360   : > { %v3600_v25 = vpop.f32.mrf.mxu1  ;;  %v3442_v22 = vshll.u32 %v8667_v56, 16 }
 0x361   : > { %v5419_v21 = vmax.f32 %v5371_v47, 0.0  ;;  %v4635_v26 = vadd.f32 %v4548_v24, %v4346_v2  ;;  %v3686_v17 = vadd.f32 %v3600_v25, %v8935_v10  ;;  %v8673_v2 = vld [vmem:[#allocation2 + $0xd4] sm:$0xff] }
 0x362   : > { %v5183_v60 = vpop.f32.mrf.mxu0 }
 0x363   : > { %v5467_v0 = vpack.c.bf16 %v5419_v21, %v5419_v21  ;;  %v5268_v4 = vadd.f32 %v5181_v34, %v4635_v26  ;;  %v7427_v34 = vld [vmem:[#allocation2 + $0xc4] sm:$0xff]   ;;  %v4099_v21 = vrot.slane %v4097_v57, 3  ;;  %v4102_v26 = vrot.slane %v4100_v62, 4 }
 0x365   : > { %v5537_v6 = vsel %vm8348_vm3, %v5467_v0, 0  ;;  %v5320_v63 = vmul.f32 %v8610_v11, %v5268_v4  ;;  %v5025_v4 = vshll.u32 %v8673_v2, 16  ;;  %v8681_v10 = vor.u32 %v4102_v26, %v4099_v21 }
 0x366   : > { %5585 = vst [vmem:[%s7653_s24 + $0x54] sm:$0xf] %v5537_v6  ;;  %v4261_v46 = vpop.f32.mrf.mxu2  ;;  %v3440_v6 = vor.u32 %v3438_v8, %v3436_v40  ;;  %v3446_v8 = vshrl.u32 %v8667_v56, 16 }
 0x367   : > { %v5372_v19 = vadd.f32 %v8620_v16, %v5320_v63  ;;  %v4347_v55 = vadd.f32 %v4261_v46, %v3686_v17  ;;  %v4550_v18 = vpop.f32.mrf.mxu3  ;;  %v3444_v63 = vrot.slane %v3442_v22, 1 }
 0x368   : > { %v3603_v27 = vpop.f32.mrf.mxu1 }
 0x369   : > { %v5420_v7 = vmax.f32 %v5372_v19, 0.0  ;;  %v4636_v38 = vadd.f32 %v4550_v18, %v4347_v55  ;;  %v3687_v47 = vadd.f32 %v3603_v27, %v8188_v52  ;;  %v3445_v40 = vsel %vm1682_vm1, %v3440_v6, %v3444_v63 }
 0x36a   : > { %v5186_v15 = vpop.f32.mrf.mxu0  ;;  %v3448_v6 = vor.u32 %v3446_v8, %v3444_v63 }
 0x36b   : > { %v5468_v35 = vpack.c.bf16 %v5420_v7, %v5420_v7  ;;  %v5269_v51 = vadd.f32 %v5183_v60, %v4636_v38  ;;  %3642 = vmatmul.bf16.gmra.mxu1 %v3437_v5  ;;  %4303 = vmatmul.bf16.gmra.mxu2 %v4095_v33  ;;  %v5021_v60 = vshrl.u32 %v8646_v59, 16  ;;  %v5027_v59 = vrot.slane %v5025_v4, 1  ;;  %v3759_v4 = vld [vmem:[#allocation2 + $0xe0] sm:$0xf] }
 0x36c   : > { %4592 = vmatmul.bf16.gmra.mxu3 %v7427_v34  ;;  %v7429_v34 = vld [vmem:[#allocation2 + $0xcc] sm:$0xff]  }
 0x36d   : > { %5225 = vmatmul.bf16.gmra.mxu0 %v5020_v50  ;;  %v5538_v9 = vsel %vm8366_vm5, %v5468_v35, 0  ;;  %v5321_v49 = vmul.f32 %v8610_v11, %v5269_v51  ;;  %v5023_v61 = vor.u32 %v5021_v60, %v5019_v39  ;;  %v4104_v39 = vsel %vm1068_vm0, %v8654_v42, %v8681_v10  ;;  %v8694_v50 = vld [vmem:[#allocation2 + $0xd8] sm:$0xff]   ;;  %v8696_v51 = vld [vmem:[#allocation2 + $0xd0] sm:$0xff] }
 0x36e   : > { %5586 = vst [vmem:[%s7653_s24 + $0x58] sm:$0xf] %v5538_v9  ;;  %v4264_v24 = vpop.f32.mrf.mxu2  ;;  %v4106_v57 = vshrl.u32 %v8694_v50, 16  ;;  %v4109_v42 = vshll.u32 %v8694_v50, 16  ;;  %v3450_v22 = vshll.u32 %v8696_v51, 16  ;;  %v5029_v60 = vshrl.u32 %v8673_v2, 16 }
 0x36f   : > { %v5373_v36 = vadd.f32 %v8620_v16, %v5321_v49  ;;  %v4348_v25 = vadd.f32 %v4264_v24, %v3687_v47  ;;  %v4553_v3 = vpop.f32.mrf.mxu3  ;;  %v8704_v47 = vld [vmem:[#allocation2 + $0xdc] sm:$0xff] }
 0x370   : > { %v3605_v54 = vpop.f32.mrf.mxu1  ;;  %v4108_v21 = vrot.slane %v4106_v57, 3  ;;  %v4111_v26 = vrot.slane %v4109_v42, 4  ;;  %v5031_v56 = vor.u32 %v5029_v60, %v5027_v59  ;;  %v3454_v60 = vshrl.u32 %v8696_v51, 16 }
 0x371   : > { %v5421_v44 = vmax.f32 %v5373_v36, 0.0  ;;  %v4637_v52 = vadd.f32 %v4553_v3, %v4348_v25  ;;  %v3688_v19 = vadd.f32 %v3605_v54, %v8197_v14  ;;  %v5028_v14 = vsel %vm1682_vm1, %v5023_v61, %v5027_v59 }
 0x372   : > { %v5188_v0 = vpop.f32.mrf.mxu0  ;;  %v3452_v61 = vrot.slane %v3450_v22, 1 }
 0x373   : > { %v5469_v53 = vpack.c.bf16 %v5421_v44, %v5421_v44  ;;  %v5270_v32 = vadd.f32 %v5186_v15, %v4637_v52 }
 0x374   : > { %v3453_v59 = vsel %vm1682_vm1, %v3448_v6, %v3452_v61 }
 0x375   : > { %v5539_v17 = vsel %vm8383_vm7, %v5469_v53, 0  ;;  %v5322_v46 = vmul.f32 %v8610_v11, %v5270_v32 }
 0x376   : > { %5587 = vst [vmem:[%s7653_s24 + $0x5c] sm:$0xf] %v5539_v17  ;;  %v4266_v55 = vpop.f32.mrf.mxu2  ;;  %v8712_v17 = vor.u32 %v4111_v26, %v4108_v21 }
 0x377   : > { %v5374_v18 = vadd.f32 %v8620_v16, %v5322_v46  ;;  %v4349_v27 = vadd.f32 %v4266_v55, %v3688_v19  ;;  %v4555_v5 = vpop.f32.mrf.mxu3  ;;  %v8714_v46 = vunpack.c.l.b16 %v3759_v4  ;;  %v5037_v4 = vshrl.u32 %v8704_v47, 16 }
 0x378   : > { %v3608_v33 = vpop.f32.mrf.mxu1 }
 0x379   : > { %v5422_v7 = vmax.f32 %v5374_v18, 0.0  ;;  %v4638_v38 = vadd.f32 %v4555_v5, %v4349_v27  ;;  %v3689_v49 = vadd.f32 %v3608_v33, %v8203_v13  ;;  %v3126_v27 = vld [vmem:[#allocation2 + $0xd8] sm:$0x1]  ;;  %v4709_v33 = vld [vmem:[#allocation2 + $0xe4] sm:$0x1] }
 0x37a   : > { %v5191_v15 = vpop.f32.mrf.mxu0  ;;  %v4823_v42 = vunpack.c.l.b16 %v4709_v33 }
 0x37b   : > { %v5470_v20 = vpack.c.bf16 %v5422_v7, %v5422_v7  ;;  %v5271_v35 = vadd.f32 %v5188_v0, %v4638_v38  ;;  %3647 = vmatmul.bf16.gmra.mxu1 %v3445_v40  ;;  %4308 = vmatmul.bf16.gmra.mxu2 %v4104_v39  ;;  %v5033_v0 = vshll.u32 %v8704_v47, 16  ;;  %v4113_v7 = vsel %vm1068_vm0, %v8681_v10, %v8712_v17  ;;  %v7430_v38 = vld [vmem:[#allocation2 + $0xd4] sm:$0xff]  }
 0x37c   : > { %4597 = vmatmul.bf16.gmra.mxu3 %v7429_v34  ;;  %v4848_v8 = vpack.c.b16 %v4823_v42, %v4823_v42 }
 0x37d   : > { %5230 = vmatmul.bf16.gmra.mxu0 %v5028_v14  ;;  %v5540_v62 = vsel %vm8348_vm3, %v5470_v20, 0  ;;  %v5323_v9 = vmul.f32 %v8610_v11, %v5271_v35  ;;  %v5035_v18 = vrot.slane %v5033_v0, 1 }
 0x37e   : > { %5588 = vst [vmem:[%s7653_s24 + $0x60] sm:$0xf] %v5540_v62  ;;  %v4269_v24 = vpop.f32.mrf.mxu2 }
 0x37f   : > { %v5375_v36 = vadd.f32 %v8620_v16, %v5323_v9  ;;  %v4350_v25 = vadd.f32 %v4269_v24, %v3689_v49  ;;  %v4558_v3 = vpop.f32.mrf.mxu3  ;;  %v5036_v57 = vsel %vm1682_vm1, %v5031_v56, %v5035_v18  ;;  %v5039_v33 = vor.u32 %v5037_v4, %v5035_v18 }
 0x380   : > { %v3610_v54 = vpop.f32.mrf.mxu1 }
 0x381   : > { %v5423_v44 = vmax.f32 %v5375_v36, 0.0  ;;  %v4639_v52 = vadd.f32 %v4558_v3, %v4350_v25  ;;  %v3690_v55 = vadd.f32 %v3610_v54, %v8210_v43  ;;  %v3898_v43 = vpack.c.b16 %v8714_v46, %v8714_v46 }
 0x382   : > { %v5193_v13 = vpop.f32.mrf.mxu0 }
 0x383   : > { %v5471_v53 = vpack.c.bf16 %v5423_v44, %v5423_v44  ;;  %v5272_v32 = vadd.f32 %v5191_v15, %v4639_v52  ;;  %v3240_v15 = vunpack.c.l.b16 %v3126_v27  ;;  %v4115_v10 = vshrl.u32 %v3898_v43, 16 }
 0x384   : > { %v4118_v24 = vshll.u32 %v3898_v43, 16 }
 0x385   : > { %v5541_v19 = vsel %vm8366_vm5, %v5471_v53, 0  ;;  %v5324_v2 = vmul.f32 %v8610_v11, %v5272_v32  ;;  %v3265_v49 = vpack.c.b16 %v3240_v15, %v3240_v15 }
 0x386   : > { %5589 = vst [vmem:[%s7653_s24 + $0x64] sm:$0xf] %v5541_v19  ;;  %v4271_v5 = vpop.f32.mrf.mxu2  ;;  %v4120_v0 = vrot.slane %v4118_v24, 4 }
 0x387   : > { %v5376_v63 = vadd.f32 %v8620_v16, %v5324_v2  ;;  %v4351_v40 = vadd.f32 %v4271_v5, %v3690_v55  ;;  %v4560_v39 = vpop.f32.mrf.mxu3  ;;  %v3458_v52 = vshll.u32 %v3265_v49, 16  ;;  %v6977_v2 = vunpack.c.h.b16 %v8694_v50 }
 0x388   : > { %v3613_v34 = vpop.f32.mrf.mxu1  ;;  %v3456_v55 = vor.u32 %v3454_v60, %v3452_v61 }
 0x389   : > { %v5424_v14 = vmax.f32 %v5376_v63, 0.0  ;;  %v4640_v20 = vadd.f32 %v4560_v39, %v4351_v40  ;;  %v3691_v3 = vadd.f32 %v3613_v34, %v8215_v31  ;;  %v5041_v31 = vshll.u32 %v4848_v8, 16 }
 0x38a   : > { %v5196_v35 = vpop.f32.mrf.mxu0  ;;  %v3460_v27 = vrot.slane %v3458_v52, 1  ;;  %v4411_v18 = vpack.c.b16 %v8714_v46, %v6977_v2 }
 0x38b   : > { %v5472_v62 = vpack.c.bf16 %v5424_v14, %v5424_v14  ;;  %v5273_v9 = vadd.f32 %v5193_v13, %v4640_v20  ;;  %3652 = vmatmul.bf16.gmra.mxu1 %v3453_v59  ;;  %4313 = vmatmul.bf16.gmra.mxu2 %v4113_v7  ;;  %v4117_v13 = vrot.slane %v4115_v10, 3  ;;  %v5043_v40 = vrot.slane %v5041_v31, 1 }
 0x38c   : > { %4602 = vmatmul.bf16.gmra.mxu3 %v7430_v38  ;;  %v3461_v50 = vsel %vm1682_vm1, %v3456_v55, %v3460_v27 }
 0x38d   : > { %5235 = vmatmul.bf16.gmra.mxu0 %v5036_v57  ;;  %v5542_v36 = vsel %vm8383_vm7, %v5472_v62, 0  ;;  %v5325_v25 = vmul.f32 %v8610_v11, %v5273_v9  ;;  %v4121_v5 = vor.u32 %v4120_v0, %v4117_v13 }
 0x38e   : > { %5590 = vst [vmem:[%s7653_s24 + $0x68] sm:$0xf] %v5542_v36  ;;  %v4274_v54 = vpop.f32.mrf.mxu2 }
 0x38f   : > { %v5377_v22 = vadd.f32 %v8620_v16, %v5325_v25  ;;  %v4352_v21 = vadd.f32 %v4274_v54, %v3691_v3  ;;  %v4563_v26 = vpop.f32.mrf.mxu3  ;;  %v4122_v61 = vsel %vm1068_vm0, %v8712_v17, %v4121_v5 }
 0x390   : > { %v3615_v44 = vpop.f32.mrf.mxu1 }
 0x391   : > { %v5425_v53 = vmax.f32 %v5377_v22, 0.0  ;;  %v4641_v32 = vadd.f32 %v4563_v26, %v4352_v21  ;;  %v3692_v47 = vadd.f32 %v3615_v44, %v8224_v48  ;;  %v5044_v48 = vsel %vm1682_vm1, %v5039_v33, %v5043_v40 }
 0x392   : > { %v5198_v6 = vpop.f32.mrf.mxu0 }
 0x393   : > { %v5473_v56 = vpack.c.bf16 %v5425_v53, %v5425_v53  ;;  %v5274_v19 = vadd.f32 %v5196_v35, %v4641_v32 }
 0x395   : > { %v5543_v51 = vsel %vm8348_vm3, %v5473_v56, 0  ;;  %v5326_v63 = vmul.f32 %v8610_v11, %v5274_v19 }
 0x396   : > { %5591 = vst [vmem:[%s7653_s24 + $0x6c] sm:$0xf] %v5543_v51  ;;  %v4276_v39 = vpop.f32.mrf.mxu2 }
 0x397   : > { %v5378_v34 = vadd.f32 %v8620_v16, %v5326_v63  ;;  %v4353_v59 = vadd.f32 %v4276_v39, %v3692_v47  ;;  %v4565_v7 = vpop.f32.mrf.mxu3 }
 0x398   : > { %v3618_v38 = vpop.f32.mrf.mxu1 }
 0x399   : > { %v5426_v15 = vmax.f32 %v5378_v34, 0.0  ;;  %v4642_v43 = vadd.f32 %v4565_v7, %v4353_v59  ;;  %v3693_v17 = vadd.f32 %v3618_v38, %v8232_v28 }
 0x39a   : > { %v5201_v14 = vpop.f32.mrf.mxu0 }
 0x39b   : > { %v5474_v20 = vpack.c.bf16 %v5426_v15, %v5426_v15  ;;  %v5275_v35 = vadd.f32 %v5198_v6, %v4642_v43  ;;  %3657 = vmatmul.bf16.gmra.mxu1 %v3461_v50  ;;  %4318 = vmatmul.bf16.gmra.mxu2 %v4122_v61 }
 0x39c   : > { %4607 = vmatmul.bf16.gmra.mxu3 %v4411_v18 }
 0x39d   : > { %5240 = vmatmul.bf16.gmra.mxu0 %v5044_v48  ;;  %v5544_v57 = vsel %vm8366_vm5, %v5474_v20, 0  ;;  %v5327_v42 = vmul.f32 %v8610_v11, %v5275_v35 }
 0x39e   : > { %5592 = vst [vmem:[%s7653_s24 + $0x70] sm:$0xf] %v5544_v57  ;;  %v4279_v46 = vpop.f32.mrf.mxu2 }
 0x39f   : > { %v5379_v62 = vadd.f32 %v8620_v16, %v5327_v42  ;;  %v4354_v9 = vadd.f32 %v4279_v46, %v3693_v17  ;;  %v4568_v49 = vpop.f32.mrf.mxu3 }
 0x3a0   : > { %v3620_v10 = vpop.f32.mrf.mxu1 }
 0x3a1   : > { %v5427_v24 = vmax.f32 %v5379_v62, 0.0  ;;  %v4643_v36 = vadd.f32 %v4568_v49, %v4354_v9  ;;  %v3694_v28 = vadd.f32 %v3620_v10, %v8238_v37 }
 0x3a2   : > { %v5203_v25 = vpop.f32.mrf.mxu0 }
 0x3a3   : > { %v5475_v3 = vpack.c.bf16 %v5427_v24, %v5427_v24  ;;  %v5276_v8 = vadd.f32 %v5201_v14, %v4643_v36 }
 0x3a5   : > { %v5545_v54 = vsel %vm8383_vm7, %v5475_v3, 0  ;;  %v5328_v22 = vmul.f32 %v8610_v11, %v5276_v8 }
 0x3a6   : > { %5593 = vst [vmem:[%s7653_s24 + $0x74] sm:$0xf] %v5545_v54  ;;  %v4281_v21 = vpop.f32.mrf.mxu2 }
 0x3a7   : > { %v5380_v26 = vadd.f32 %v8620_v16, %v5328_v22  ;;  %v4355_v60 = vadd.f32 %v4281_v21, %v3694_v28  ;;  %v4570_v44 = vpop.f32.mrf.mxu3 }
 0x3a8   : > { %v3623_v52 = vpop.f32.mrf.mxu1 }
 0x3a9   : > { %v5428_v13 = vmax.f32 %v5380_v26, 0.0  ;;  %v4644_v0 = vadd.f32 %v4570_v44, %v4355_v60  ;;  %v3695_v37 = vadd.f32 %v3623_v52, %v8243_v23 }
 0x3aa   : > { %v5206_v4 = vpop.f32.mrf.mxu0 }
 0x3ab   : > { %v5476_v53 = vpack.c.bf16 %v5428_v13, %v5428_v13  ;;  %v5277_v32 = vadd.f32 %v5203_v25, %v4644_v0 }
 0x3ad   : > { %v5546_v6 = vsel %vm8348_vm3, %v5476_v53, 0  ;;  %v5329_v31 = vmul.f32 %v8610_v11, %v5277_v32 }
 0x3ae   : > { %5594 = vst [vmem:[%s7653_s24 + $0x78] sm:$0xf] %v5546_v6  ;;  %v4284_v56 = vpop.f32.mrf.mxu2 }
 0x3af   : > { %v5381_v19 = vadd.f32 %v8620_v16, %v5329_v31  ;;  %v4356_v2 = vadd.f32 %v4284_v56, %v3695_v37  ;;  %v4573_v55 = vpop.f32.mrf.mxu3 }
 0x3b0   : > { %v3625_v27 = vpop.f32.mrf.mxu1 }
 0x3b1   : > { %v5429_v5 = vmax.f32 %v5381_v19, 0.0  ;;  %v4645_v33 = vadd.f32 %v4573_v55, %v4356_v2  ;;  %v3696_v23 = vadd.f32 %v3625_v27, %v8249_v1 }
 0x3b2   : > { %v5208_v51 = vpop.f32.mrf.mxu0 }
 0x3b3   : > { %v5477_v63 = vpack.c.bf16 %v5429_v5, %v5429_v5  ;;  %v5278_v47 = vadd.f32 %v5206_v4, %v4645_v33  ;;  %v8936_v4 = vld [vmem:[#allocation20_spill] sm:$0xff] }
 0x3b5   : > { %v5547_v40 = vsel %vm8366_vm5, %v5477_v63, 0  ;;  %v5330_v39 = vmul.f32 %v8610_v11, %v5278_v47 }
 0x3b6   : > { %5595 = vst [vmem:[%s7653_s24 + $0x7c] sm:$0xf] %v5547_v40  ;;  %v4286_v34 = vpop.f32.mrf.mxu2 }
 0x3b7   : > { %v5382_v59 = vadd.f32 %v8620_v16, %v5330_v39  ;;  %v4357_v7 = vadd.f32 %v4286_v34, %v3696_v23  ;;  %v4575_v38 = vpop.f32.mrf.mxu3 }
 0x3b8   : > { %v3628_v50 = vpop.f32.mrf.mxu1 }
 0x3b9   : > { %v5430_v61 = vmax.f32 %v5382_v59, 0.0  ;;  %v4646_v18 = vadd.f32 %v4575_v38, %v4357_v7  ;;  %v3697_v1 = vadd.f32 %v3628_v50, %v8252_v58 }
 0x3ba   : > { %v5211_v15 = vpop.f32.mrf.mxu0 }
 0x3bb   : > { %v5478_v43 = vpack.c.bf16 %v5430_v61, %v5430_v61  ;;  %v5279_v14 = vadd.f32 %v5208_v51, %v4646_v18  ;;  %v8937_v51 = vld [vmem:[#allocation22_spill] sm:$0xff] }
 0x3bd   : > { %v5548_v48 = vsel %vm8383_vm7, %v5478_v43, 0  ;;  %v5331_v20 = vmul.f32 %v8610_v11, %v5279_v14  ;;  %v8938_v43 = vld [vmem:[#allocation24_spill] sm:$0xff] }
 0x3be   : > { %5596 = vst [vmem:[%s7653_s24 + $0x80] sm:$0xf] %v5548_v48  ;;  %v4289_v35 = vpop.f32.mrf.mxu2 }
 0x3bf   : > { %v5383_v57 = vadd.f32 %v8620_v16, %v5331_v20  ;;  %v4358_v42 = vadd.f32 %v4289_v35, %v3697_v1  ;;  %v4578_v17 = vpop.f32.mrf.mxu3 }
 0x3c0   : > { %v3630_v46 = vpop.f32.mrf.mxu1 }
 0x3c1   : > { %v5431_v62 = vmax.f32 %v5383_v57, 0.0  ;;  %v4647_v9 = vadd.f32 %v4578_v17, %v4358_v42  ;;  %v3698_v58 = vadd.f32 %v3630_v46, %v8258_v45 }
 0x3c2   : > { %v5213_v49 = vpop.f32.mrf.mxu0 }
 0x3c3   : > { %v5479_v10 = vpack.c.bf16 %v5431_v62, %v5431_v62  ;;  %v5280_v24 = vadd.f32 %v5211_v15, %v4647_v9 }
 0x3c5   : > { %v5549_v36 = vsel %vm8348_vm3, %v5479_v10, 0  ;;  %v5332_v25 = vmul.f32 %v8610_v11, %v5280_v24  ;;  %v8939_v24 = vld [vmem:[#allocation11_spill] sm:$0xff] }
 0x3c6   : > { %5597 = vst [vmem:[%s7653_s24 + $0x84] sm:$0xf] %v5549_v36  ;;  %v4291_v3 = vpop.f32.mrf.mxu2 }
 0x3c7   : > { %v5384_v8 = vadd.f32 %v8620_v16, %v5332_v25  ;;  %v4359_v54 = vadd.f32 %v4291_v3, %v3698_v58  ;;  %v4580_v22 = vpop.f32.mrf.mxu3 }
 0x3c8   : > { %v3633_v28 = vpop.f32.mrf.mxu1 }
 0x3c9   : > { %v5432_v21 = vmax.f32 %v5384_v8, 0.0  ;;  %v4648_v26 = vadd.f32 %v4580_v22, %v4359_v54  ;;  %v3699_v45 = vadd.f32 %v3633_v28, %v8936_v4 }
 0x3ca   : > { %v5216_v60 = vpop.f32.mrf.mxu0 }
 0x3cb   : > { %v5480_v44 = vpack.c.bf16 %v5432_v21, %v5432_v21  ;;  %v5281_v52 = vadd.f32 %v5213_v49, %v4648_v26 }
 0x3cd   : > { %v5550_v13 = vsel %vm8366_vm5, %v5480_v44, 0  ;;  %v5333_v0 = vmul.f32 %v8610_v11, %v5281_v52 }
 0x3ce   : > { %5598 = vst [vmem:[%s7653_s24 + $0x88] sm:$0xf] %v5550_v13  ;;  %v4294_v53 = vpop.f32.mrf.mxu2  ;;  %v8940_v13 = vld [vmem:[#allocation12_spill] sm:$0xff] }
 0x3cf   : > { %v5385_v32 = vadd.f32 %v8620_v16, %v5333_v0  ;;  %v4360_v6 = vadd.f32 %v4294_v53, %v3699_v45  ;;  %v4583_v31 = vpop.f32.mrf.mxu3 }
 0x3d0   : > { %v3635_v37 = vpop.f32.mrf.mxu1 }
 0x3d1   : > { %v5433_v56 = vmax.f32 %v5385_v32, 0.0  ;;  %v4649_v19 = vadd.f32 %v4583_v31, %v4360_v6  ;;  %v3700_v63 = vadd.f32 %v3635_v37, %v8937_v51 }
 0x3d2   : > { %v5218_v2 = vpop.f32.mrf.mxu0 }
 0x3d3   : > { %v5481_v55 = vpack.c.bf16 %v5433_v56, %v5433_v56  ;;  %v5282_v27 = vadd.f32 %v5216_v60, %v4649_v19 }
 0x3d5   : > { %v5551_v5 = vsel %vm8383_vm7, %v5481_v55, 0  ;;  %v5334_v33 = vmul.f32 %v8610_v11, %v5282_v27 }
 0x3d6   : > { %5599 = vst [vmem:[%s7653_s24 + $0x8c] sm:$0xf] %v5551_v5  ;;  %v4296_v47 = vpop.f32.mrf.mxu2  ;;  %v8941_v5 = vld [vmem:[#allocation13_spill] sm:$0xff] }
 0x3d7   : > { %v5386_v40 = vadd.f32 %v8620_v16, %v5334_v33  ;;  %v4361_v39 = vadd.f32 %v4296_v47, %v3700_v63  ;;  %v4585_v23 = vpop.f32.mrf.mxu3 }
 0x3d8   : > { %v3638_v34 = vpop.f32.mrf.mxu1 }
 0x3d9   : > { %v5434_v59 = vmax.f32 %v5386_v40, 0.0  ;;  %v4650_v7 = vadd.f32 %v4585_v23, %v4361_v39  ;;  %v3701_v14 = vadd.f32 %v3638_v34, %v8938_v43 }
 0x3da   : > { %v5221_v38 = vpop.f32.mrf.mxu0 }
 0x3db   : > { %v5482_v50 = vpack.c.bf16 %v5434_v59, %v5434_v59  ;;  %v5283_v61 = vadd.f32 %v5218_v2, %v4650_v7 }
 0x3dd   : > { %v5552_v18 = vsel %vm8348_vm3, %v5482_v50, 0  ;;  %v5335_v15 = vmul.f32 %v8610_v11, %v5283_v61 }
 0x3de   : > { %5600 = vst [vmem:[%s7653_s24 + $0x90] sm:$0xf] %v5552_v18  ;;  %v4299_v48 = vpop.f32.mrf.mxu2  ;;  %v8942_v18 = vld [vmem:[#allocation14_spill] sm:$0xff] }
 0x3df   : > { %v5387_v20 = vadd.f32 %v8620_v16, %v5335_v15  ;;  %v4362_v1 = vadd.f32 %v4299_v48, %v3701_v14  ;;  %v4588_v35 = vpop.f32.mrf.mxu3 }
 0x3e0   : > { %v3640_v57 = vpop.f32.mrf.mxu1 }
 0x3e1   : > { %v5435_v42 = vmax.f32 %v5387_v20, 0.0  ;;  %v4651_v17 = vadd.f32 %v4588_v35, %v4362_v1  ;;  %v3702_v36 = vadd.f32 %v3640_v57, %v8939_v24 }
 0x3e2   : > { %v5223_v46 = vpop.f32.mrf.mxu0 }
 0x3e3   : > { %v5483_v62 = vpack.c.bf16 %v5435_v42, %v5435_v42  ;;  %v5284_v9 = vadd.f32 %v5221_v38, %v4651_v17 }
 0x3e5   : > { %v5553_v49 = vsel %vm8366_vm5, %v5483_v62, 0  ;;  %v5336_v10 = vmul.f32 %v8610_v11, %v5284_v9 }
 0x3e6   : > { %5601 = vst [vmem:[%s7653_s24 + $0x94] sm:$0xf] %v5553_v49  ;;  %v4301_v25 = vpop.f32.mrf.mxu2  ;;  %v8943_v49 = vld [vmem:[#allocation15_spill] sm:$0xff] }
 0x3e7   : > { %v5388_v58 = vadd.f32 %v8620_v16, %v5336_v10  ;;  %v4363_v3 = vadd.f32 %v4301_v25, %v3702_v36  ;;  %v4590_v8 = vpop.f32.mrf.mxu3 }
 0x3e8   : > { %v3643_v54 = vpop.f32.mrf.mxu1 }
 0x3e9   : > { %v5436_v22 = vmax.f32 %v5388_v58, 0.0  ;;  %v4652_v28 = vadd.f32 %v4590_v8, %v4363_v3  ;;  %v3703_v0 = vadd.f32 %v3643_v54, %v8940_v13 }
 0x3ea   : > { %v5226_v21 = vpop.f32.mrf.mxu0 }
 0x3eb   : > { %v5484_v26 = vpack.c.bf16 %v5436_v22, %v5436_v22  ;;  %v5285_v60 = vadd.f32 %v5223_v46, %v4652_v28 }
 0x3ed   : > { %v5554_v44 = vsel %vm8383_vm7, %v5484_v26, 0  ;;  %v5337_v52 = vmul.f32 %v8610_v11, %v5285_v60 }
 0x3ee   : > { %5602 = vst [vmem:[%s7653_s24 + $0x98] sm:$0xf] %v5554_v44  ;;  %v4304_v4 = vpop.f32.mrf.mxu2  ;;  %v8944_v44 = vld [vmem:[#allocation16_spill] sm:$0xff] }
 0x3ef   : > { %v5389_v45 = vadd.f32 %v8620_v16, %v5337_v52  ;;  %v4364_v53 = vadd.f32 %v4304_v4, %v3703_v0  ;;  %v4593_v32 = vpop.f32.mrf.mxu3 }
 0x3f0   : > { %v3645_v6 = vpop.f32.mrf.mxu1 }
 0x3f1   : > { %v5437_v31 = vmax.f32 %v5389_v45, 0.0  ;;  %v4653_v37 = vadd.f32 %v4593_v32, %v4364_v53  ;;  %v3704_v33 = vadd.f32 %v3645_v6, %v8941_v5 }
 0x3f2   : > { %v5228_v56 = vpop.f32.mrf.mxu0 }
 0x3f3   : > { %v5485_v19 = vpack.c.bf16 %v5437_v31, %v5437_v31  ;;  %v5286_v2 = vadd.f32 %v5226_v21, %v4653_v37 }
 0x3f5   : > { %v5555_v55 = vsel %vm8348_vm3, %v5485_v19, 0  ;;  %v5338_v27 = vmul.f32 %v8610_v11, %v5286_v2  ;;  %v8945_v2 = vld [vmem:[#allocation17_spill] sm:$0xff] }
 0x3f6   : > { %5603 = vst [vmem:[%s7653_s24 + $0x9c] sm:$0xf] %v5555_v55  ;;  %v4306_v51 = vpop.f32.mrf.mxu2 }
 0x3f7   : > { %v5390_v63 = vadd.f32 %v8620_v16, %v5338_v27  ;;  %v4365_v47 = vadd.f32 %v4306_v51, %v3704_v33  ;;  %v4595_v40 = vpop.f32.mrf.mxu3 }
 0x3f8   : > { %v3648_v39 = vpop.f32.mrf.mxu1 }
 0x3f9   : > { %v5438_v23 = vmax.f32 %v5390_v63, 0.0  ;;  %v4654_v34 = vadd.f32 %v4595_v40, %v4365_v47  ;;  %v3705_v15 = vadd.f32 %v3648_v39, %v8942_v18 }
 0x3fa   : > { %v5231_v59 = vpop.f32.mrf.mxu0 }
 0x3fb   : > { %v5486_v7 = vpack.c.bf16 %v5438_v23, %v5438_v23  ;;  %v5287_v38 = vadd.f32 %v5228_v56, %v4654_v34 }
 0x3fd   : > { %v5556_v50 = vsel %vm8366_vm5, %v5486_v7, 0  ;;  %v5339_v61 = vmul.f32 %v8610_v11, %v5287_v38 }
 0x3fe   : > { %5604 = vst [vmem:[%s7653_s24 + $0xa0] sm:$0xf] %v5556_v50  ;;  %v4309_v43 = vpop.f32.mrf.mxu2 }
 0x3ff   : > { %v5391_v14 = vadd.f32 %v8620_v16, %v5339_v61  ;;  %v4366_v48 = vadd.f32 %v4309_v43, %v3705_v15  ;;  %v4598_v20 = vpop.f32.mrf.mxu3 }
 0x400   : > { %v3650_v1 = vpop.f32.mrf.mxu1 }
 0x401   : > { %v5439_v35 = vmax.f32 %v5391_v14, 0.0  ;;  %v4655_v57 = vadd.f32 %v4598_v20, %v4366_v48  ;;  %v3706_v10 = vadd.f32 %v3650_v1, %v8943_v49 }
 0x402   : > { %v5233_v42 = vpop.f32.mrf.mxu0 }
 0x403   : > { %v5487_v17 = vpack.c.bf16 %v5439_v35, %v5439_v35  ;;  %v5288_v46 = vadd.f32 %v5231_v59, %v4655_v57 }
 0x405   : > { %v5557_v62 = vsel %vm8383_vm7, %v5487_v17, 0  ;;  %v5340_v9 = vmul.f32 %v8610_v11, %v5288_v46  ;;  %v8946_v17 = vld [vmem:[#allocation18_spill] sm:$0xff] }
 0x406   : > { %5605 = vst [vmem:[%s7653_s24 + $0xa4] sm:$0xf] %v5557_v62  ;;  %v4311_v24 = vpop.f32.mrf.mxu2 }
 0x407   : > { %v5392_v36 = vadd.f32 %v8620_v16, %v5340_v9  ;;  %v4367_v25 = vadd.f32 %v4311_v24, %v3706_v10  ;;  %v4600_v58 = vpop.f32.mrf.mxu3 }
 0x408   : > { %v3653_v3 = vpop.f32.mrf.mxu1 }
 0x409   : > { %v5440_v8 = vmax.f32 %v5392_v36, 0.0  ;;  %v4656_v54 = vadd.f32 %v4600_v58, %v4367_v25  ;;  %v3707_v52 = vadd.f32 %v3653_v3, %v8944_v44 }
 0x40a   : > { %v5236_v21 = vpop.f32.mrf.mxu0 }
 0x40b   : > { %v5488_v22 = vpack.c.bf16 %v5440_v8, %v5440_v8  ;;  %v5289_v28 = vadd.f32 %v5233_v42, %v4656_v54 }
 0x40d   : > { %v5558_v26 = vsel %vm8348_vm3, %v5488_v22, 0  ;;  %v5341_v60 = vmul.f32 %v8610_v11, %v5289_v28 }
 0x40e   : > { %5606 = vst [vmem:[%s7653_s24 + $0xa8] sm:$0xf] %v5558_v26  ;;  %v4314_v13 = vpop.f32.mrf.mxu2 }
 0x40f   : > { %v5393_v0 = vadd.f32 %v8620_v16, %v5341_v60  ;;  %v4368_v4 = vadd.f32 %v4314_v13, %v3707_v52  ;;  %v4603_v45 = vpop.f32.mrf.mxu3 }
 0x410   : > { %v3655_v53 = vpop.f32.mrf.mxu1 }
 0x411   : > { %v5441_v32 = vmax.f32 %v5393_v0, 0.0  ;;  %v4657_v6 = vadd.f32 %v4603_v45, %v4368_v4  ;;  %v3708_v55 = vadd.f32 %v3655_v53, %v8945_v2 }
 0x412   : > { %v5238_v27 = vpop.f32.mrf.mxu0 }
 0x413   : > { %v5489_v31 = vpack.c.bf16 %v5441_v32, %v5441_v32  ;;  %v5290_v37 = vadd.f32 %v5236_v21, %v4657_v6 }
 0x415   : > { %v5559_v56 = vsel %vm8366_vm5, %v5489_v31, 0  ;;  %v5342_v19 = vmul.f32 %v8610_v11, %v5290_v37 }
 0x416   : > { %5607 = vst [vmem:[%s7653_s24 + $0xac] sm:$0xf] %v5559_v56  ;;  %v4316_v5 = vpop.f32.mrf.mxu2 }
 0x417   : > { %v5394_v33 = vadd.f32 %v8620_v16, %v5342_v19  ;;  %v4369_v51 = vadd.f32 %v4316_v5, %v3708_v55  ;;  %v4605_v63 = vpop.f32.mrf.mxu3 }
 0x418   : > { %v3658_v47 = vpop.f32.mrf.mxu1 }
 0x419   : > { %v5442_v40 = vmax.f32 %v5394_v33, 0.0  ;;  %v4658_v39 = vadd.f32 %v4605_v63, %v4369_v51  ;;  %v3709_v38 = vadd.f32 %v3658_v47, %v8312_v12 }
 0x41a   : > { %v5241_v43 = vpop.f32.mrf.mxu0 }
 0x41b   : > { %v5490_v23 = vpack.c.bf16 %v5442_v40, %v5442_v40  ;;  %v5291_v34 = vadd.f32 %v5238_v27, %v4658_v39 }
 0x41d   : > { %v5560_v59 = vsel %vm8383_vm7, %v5490_v23, 0  ;;  %v5343_v7 = vmul.f32 %v8610_v11, %v5291_v34 }
 0x41e   : > { %5608 = vst [vmem:[%s7653_s24 + $0xb0] sm:$0xf] %v5560_v59  ;;  %v4319_v50 = vpop.f32.mrf.mxu2 }
 0x41f   : > { %v5395_v61 = vadd.f32 %v8620_v16, %v5343_v7  ;;  %v4370_v18 = vadd.f32 %v4319_v50, %v3709_v38  ;;  %v4608_v15 = vpop.f32.mrf.mxu3 }
 0x420   : > { %v3660_v20 = vpop.f32.mrf.mxu1 }
 0x421   : > { %v5443_v14 = vmax.f32 %v5395_v61, 0.0  ;;  %v4659_v48 = vadd.f32 %v4608_v15, %v4370_v18  ;;  %v3710_v12 = vadd.f32 %v3660_v20, %v8946_v17 }
 0x422   : > { %v5243_v36 = vpop.f32.mrf.mxu0 }
 0x423   : > { %v5491_v1 = vpack.c.bf16 %v5443_v14, %v5443_v14  ;;  %v5292_v35 = vadd.f32 %v5241_v43, %v4659_v48 }
 0x425   : > { %v5561_v57 = vsel %vm8348_vm3, %v5491_v1, 0  ;;  %v5344_v42 = vmul.f32 %v8610_v11, %v5292_v35  ;;  %v7578_v11 = vld [vmem:[%s8878_s2] ss:$0 sm:$0xff] }
 0x426   : > { %5609 = vst [vmem:[%s7653_s24 + $0xb4] sm:$0xf] %v5561_v57  ;;  %v4321_v46 = vpop.f32.mrf.mxu2 }
 0x427   : > { %v5396_v62 = vadd.f32 %v8620_v16, %v5344_v42  ;;  %v4371_v9 = vadd.f32 %v4321_v46, %v3710_v12  ;;  %v4610_v49 = vpop.f32.mrf.mxu3 }
 0x429   : > { %v5444_v10 = vmax.f32 %v5396_v62, 0.0  ;;  %v4660_v24 = vadd.f32 %v4610_v49, %v4371_v9 }
 0x42b   : > { %v5492_v25 = vpack.c.bf16 %v5444_v10, %v5444_v10  ;;  %v5293_v58 = vadd.f32 %v5243_v36, %v4660_v24 }
 0x42d   : > { %v5562_v41 = vsel %vm8366_vm5, %v5492_v25, 0  ;;  %v5345_v3 = vmul.f32 %v7578_v11, %v5293_v58 }
 0x42e   : > { %5610 = vst [vmem:[%s7653_s24 + $0xb8] sm:$0xf] %v5562_v41 }
 0x42f   : > { %v5397_v8 = vadd.f32 %v8620_v16, %v5345_v3 }
 0x431   : > { %v5445_v54 = vmax.f32 %v5397_v8, 0.0 }
 0x433   : > { %v5493_v22 = vpack.c.bf16 %v5445_v54, %v5445_v54 }
 0x435   : > { %v5563_v28 = vsel %vm8383_vm7, %v5493_v22, 0 }
 0x436   : > { %5611 = vst [vmem:[%s7653_s24 + $0xbc] sm:$0xf] %v5563_v28 }
 0x437 PF: > { %s14_s17 = sadd.s32 1, %s7603_s17   ;;  %s8947_s15 = smov %s7599_s16 }
 0x438   : > { %p11_p5 = scmp.ge.s32.totalorder %s14_s17, 4   ;;  %s8948_s16 = smov %s8950_s18 }
 0x43a   :  { %13 = sbr.rel (!%p11_p5) target bundleno = 2 (0x2), region = 313 }
 0x43f   :  { %5648 = vsyncmov [#allocation3] }
 0x442   :  { %s5649_s28 = vpop.sfrf %5648 }
 0x443   :  { %p6539_p6 = scmp.ne.s32.totalorder %s5649_s28, 0 }
 0x445   :  { %5653 = shalt.err (%p6539_p6)  }
 0x446   :  { %5655 = vsyncmov [#allocation3 + $0x1] }
 0x449   :  { %s5656_s29 = vpop.sfrf %5655 }
 0x44a   :  { %p6540_p7 = scmp.ne.s32.totalorder %s5656_s29, 0 }
 0x44c   :  { %5660 = shalt.err (%p6540_p7)  }
 0x44d   :  { %5662 = vsyncmov [#allocation3 + $0x2] }
 0x450   :  { %s5663_s24 = vpop.sfrf %5662 }
 0x451   :  { %p6541_p8 = scmp.ne.s32.totalorder %s5663_s24, 0 }
 0x453   :  { %5667 = shalt.err (%p6541_p8)  }
 0x454   :  { %5669 = vsyncmov [#allocation3 + $0x3] }
 0x457   :  { %s5670_s30 = vpop.sfrf %5669 }
 0x458   :  { %p6542_p9 = scmp.ne.s32.totalorder %s5670_s30, 0 }
 0x45a   :  { %5674 = shalt.err (%p6542_p9)  }
 0x45b   :  { %5676 = vsyncmov [#allocation3 + $0x4] }
 0x45e   :  { %s5677_s18 = vpop.sfrf %5676 }
 0x45f   :  { %p6543_p10 = scmp.ne.s32.totalorder %s5677_s18, 0 }
 0x461   :  { %5681 = shalt.err (%p6543_p10)  }
 0x462   :  { %5683 = vsyncmov [#allocation3 + $0x5] }
 0x465   :  { %s5684_s0 = vpop.sfrf %5683 }
 0x466   :  { %p6544_p11 = scmp.ne.s32.totalorder %s5684_s0, 0 }
 0x468   :  { %5688 = shalt.err (%p6544_p11)  }

</bundles_post_ra>
